<compile_context>
chip_gen: v7x
topology: tpu7x:2x2x1
jax: 0.10.0
libtpu: 0.0.40
codegen_flags: <defaults>
</compile_context>

<pallas_src>
import jax
import jax.numpy as jnp
from jax.experimental import pallas as pl
from jax.experimental.pallas import tpu as pltpu

# ----- static model dimensions (fixed by the PyTorch module) -----
VOCAB = 2000
SEQ = 50              # tokens per example == Conv1d #1 in_channels
EMB = 32              # embedding dim == Conv1d spatial length
C1 = 256              # conv1 out channels
C2 = 50               # conv2 out channels
K = 5                 # conv kernel size
L1 = EMB + 2 - K + 1  # 30 valid conv1 output positions (pad=1, stride=1)
LP = 10               # MaxPool1d(k=3, stride=3, pad=1) output length
L2 = LP + 2 - K + 1   # 8 conv2 output positions (pad=1, stride=1)
FLAT = C2 * L2        # 400
H1 = 256
NCLS = 10
BN_EPS = 1e-5

# ----- TPU-friendly padded dimensions -----
CP = 64               # channel (lane) axis padded 50 -> 64
L1P = 32              # conv1 output rows padded 30 -> 32 (layout-preserving reshapes)
POSP = L1P + K - 1    # 36 pre-padded input positions (1 front zero + 32 real + 3 back zeros)
NPAD = 128            # class lanes padded 10 -> 128 (lane-dense output store)


def _cnn_kernel(x_ref, w1_ref, b1_ref, wc_ref, bfc1_ref, wfc2_ref, bfc2_ref, out_ref):
    tb = x_ref.shape[0]
    x = x_ref[...]                                                           # (tb, 36, 64) bf16

    # ---- Conv1d(50->256, k=5, pad=1): one im2col MXU matmul (320-wide contraction).
    # 32 output rows are produced so both reshapes are layout preserving; rows 30/31
    # only see the extra zero padding and are never read below.
    im1 = jnp.concatenate([x[:, k:k + L1P, :] for k in range(K)], axis=-1)   # (tb, 32, 320)
    h1 = jnp.dot(im1.reshape(tb * L1P, K * CP), w1_ref[...],
                 preferred_element_type=jnp.float32)                         # (tb*32, 256)
    h1 = jnp.maximum(h1 + b1_ref[...], 0.0).astype(jnp.bfloat16)             # bf16 early
    h1 = h1.reshape(tb, L1P, C1)                                             # (tb, 32, 256)

    # ---- MaxPool1d(kernel=3, stride=3, padding=1): window l covers rows {3l-1,3l,3l+1};
    # post-ReLU values are >= 0, so dropping the zero-padding tap of window 0 is exact.
    # Each pooled row is emitted directly as a 256-lane block of conv2's matmul input.
    cols = []
    for l in range(LP):
        lo = max(3 * l - 1, 0)
        cols.append(jnp.max(h1[:, lo:3 * l + 2, :], axis=1))                 # (tb, 256)
    xcat = jnp.concatenate(cols, axis=1)                                     # (tb, 2560) bf16

    # ---- Conv1d(256->50, k=5, pad=1) (block-Toeplitz) + conv2 bias + BatchNorm1d(400)
    # (eval) + Dropout(identity) + Linear(400,256): one affine chain, folded at trace
    # time into a single (2560, 256) matmul + bias.
    h = jnp.dot(xcat, wc_ref[...], preferred_element_type=jnp.float32) + bfc1_ref[...]
    h = jnp.maximum(h, 0.0).astype(jnp.bfloat16)                             # (tb, 256)

    # ---- Linear(256->10), lane-padded to 128 (pad bias = -1e30 -> softmax prob 0),
    # then Softmax(dim=1).
    logits = jnp.dot(h, wfc2_ref[...], preferred_element_type=jnp.float32) + bfc2_ref[...]
    e = jnp.exp(logits - jnp.max(logits, axis=-1, keepdims=True))
    out_ref[...] = e * pl.reciprocal(jnp.sum(e, axis=-1, keepdims=True), approx=False)


def _round_up(n, m):
    return ((n + m - 1) // m) * m


def init_params(key):
    ks = jax.random.split(key, 13)
    p = {}
    p['emb'] = jax.random.normal(ks[0], (VOCAB, EMB), jnp.float32)
    p['w1'] = jax.random.normal(ks[1], (C1, SEQ, K), jnp.float32) * 0.05   # (out,in,k)
    p['b1'] = jax.random.normal(ks[2], (C1,), jnp.float32) * 0.05
    p['w2'] = jax.random.normal(ks[3], (C2, C1, K), jnp.float32) * 0.02
    p['b2'] = jax.random.normal(ks[4], (C2,), jnp.float32) * 0.02
    p['bn_g'] = 1.0 + 0.1 * jax.random.normal(ks[5], (FLAT,), jnp.float32)
    p['bn_b'] = 0.1 * jax.random.normal(ks[6], (FLAT,), jnp.float32)
    p['bn_rm'] = 0.1 * jax.random.normal(ks[7], (FLAT,), jnp.float32)
    p['bn_rv'] = jax.random.uniform(ks[8], (FLAT,), jnp.float32, 0.5, 1.5)
    p['wfc1'] = jax.random.normal(ks[9], (H1, FLAT), jnp.float32) * 0.05   # (out,in)
    p['bfc1'] = jax.random.normal(ks[10], (H1,), jnp.float32) * 0.05
    p['wfc2'] = jax.random.normal(ks[11], (NCLS, H1), jnp.float32) * 0.05
    p['bfc2'] = jax.random.normal(ks[12], (NCLS,), jnp.float32) * 0.05
    return p


def model_cnn_forward(x_idx, p, *, block_b=256):
    """x_idx: int32 token ids of shape (B, 50), values in [0, 2000)."""
    B = x_idx.shape[0]

    # batch tile: multiple of 8 sublanes; capped so the grid has >=2 steps when the
    # batch allows it (both v7x TensorCores stay busy via dimension_semantics).
    B8 = _round_up(B, 8)
    TB = max(8, min(block_b, _round_up((B8 + 1) // 2, 8)))
    Bp = _round_up(B, TB)

    # ---- glue: embedding gather + channels-last + bf16 + all zero padding (batch,
    # position 32->36, channels 50->64).  Fuses with the gather/transpose XLA pass.
    emb_x = p['emb'][x_idx]                                        # (B, 50, 32)  (NCW)
    x_cl = jnp.transpose(emb_x, (0, 2, 1)).astype(jnp.bfloat16)    # (B, 32, 50)  channels-last
    x_pad = jnp.pad(x_cl, ((0, Bp - B), (1, POSP - EMB - 1), (0, CP - SEQ)))   # (Bp, 36, 64)

    # ---- conv1 weights as a (K*CP, C1) im2col matrix (channels zero-padded 50->64) ----
    w1_2d = jnp.pad(jnp.transpose(p['w1'], (2, 1, 0)),
                    ((0, 0), (0, CP - SEQ), (0, 0))).reshape(K * CP, C1).astype(jnp.bfloat16)
    b1 = p['b1'].reshape(1, C1).astype(jnp.float32)

    # ---- conv2 as a block-Toeplitz (LP*C1, FLAT) matrix, columns in PyTorch flatten
    # order (c*L2 + l); taps that fall on the conv2 zero padding are simply dropped.
    wk = jnp.transpose(p['w2'], (2, 1, 0)).astype(jnp.float32)     # (K, C1, C2)
    zblk = jnp.zeros((C1, C2), jnp.float32)
    rows = []
    for l_in in range(LP):
        blocks = [wk[l_in - l_out + 1] if 0 <= l_in - l_out + 1 < K else zblk
                  for l_out in range(L2)]
        rows.append(jnp.stack(blocks, axis=-1).reshape(C1, FLAT))  # (256, 400)
    w2t = jnp.concatenate(rows, axis=0)                            # (2560, 400)

    # ---- fold conv2 bias + BatchNorm1d(400) (eval) + Dropout(identity) + Linear(400,256)
    # into ONE (2560, 256) weight + (256,) bias (the whole chain is affine).
    scale = p['bn_g'] / jnp.sqrt(p['bn_rv'] + BN_EPS)              # (400,)
    shift = p['bn_b'] - p['bn_rm'] * scale
    w1t = p['wfc1'].T                                              # (400, 256)
    b2_flat = jnp.repeat(p['b2'], L2)                              # b2[c] at idx c*L2+l
    wcomb = (w2t @ (w1t * scale[:, None])).astype(jnp.bfloat16)    # (2560, 256)
    bfc1_f = (p['bfc1'] + (b2_flat * scale + shift) @ w1t).reshape(1, H1).astype(jnp.float32)

    # ---- Linear(256,10) padded to 128 lanes; padded logits get bias -1e30 -> prob 0 ----
    wfc2_p = jnp.pad(p['wfc2'].T, ((0, 0), (0, NPAD - NCLS))).astype(jnp.bfloat16)
    bfc2_p = jnp.concatenate(
        [p['bfc2'].astype(jnp.float32),
         jnp.full((NPAD - NCLS,), -1e30, jnp.float32)]).reshape(1, NPAD)

    # <=48 MiB keeps the request inside v7x's 64 MiB/TC; larger tiles need more on v6e.
    vmem_limit = (48 if TB <= 256 else 96) * 1024 * 1024

    out = pl.pallas_call(
        _cnn_kernel,
        out_shape=jax.ShapeDtypeStruct((Bp, NPAD), jnp.float32),
        grid=(Bp // TB,),
        in_specs=[
            pl.BlockSpec((TB, POSP, CP), lambda i: (i, 0, 0)),   # x, batch-tiled, pre-padded
            pl.BlockSpec((K * CP, C1), lambda i: (0, 0)),        # conv1 im2col weight
            pl.BlockSpec((1, C1), lambda i: (0, 0)),             # conv1 bias
            pl.BlockSpec((LP * C1, H1), lambda i: (0, 0)),       # conv2+BN+FC1 folded weight
            pl.BlockSpec((1, H1), lambda i: (0, 0)),             # folded bias
            pl.BlockSpec((H1, NPAD), lambda i: (0, 0)),          # FC2 weight (lane padded)
            pl.BlockSpec((1, NPAD), lambda i: (0, 0)),           # FC2 bias (-1e30 pad)
        ],
        out_specs=pl.BlockSpec((TB, NPAD), lambda i: (i, 0)),
        compiler_params=pltpu.CompilerParams(
            dimension_semantics=("parallel",),
            vmem_limit_bytes=vmem_limit),
    )(x_pad, w1_2d, b1, wcomb, bfc1_f, wfc2_p, bfc2_p)
    return out[:B, :NCLS]


def reference_forward(x_idx, p):
    """Pure-JAX reference replicating the PyTorch forward (eval mode)."""
    emb = p['emb'][x_idx]                                            # (B, 50, 32)
    y = jax.lax.conv_general_dilated(
        emb, p['w1'], window_strides=(1,), padding=[(1, 1)],
        dimension_numbers=('NCH', 'OIH', 'NCH'),
        precision=jax.lax.Precision.HIGHEST)                         # (B, 256, 30)
    y = jnp.maximum(y + p['b1'][None, :, None], 0.0)
    y = jax.lax.reduce_window(
        y, -jnp.inf, jax.lax.max,
        window_dimensions=(1, 1, 3), window_strides=(1, 1, 3),
        padding=((0, 0), (0, 0), (1, 1)))                            # (B, 256, 10)
    y = jax.lax.conv_general_dilated(
        y, p['w2'], window_strides=(1,), padding=[(1, 1)],
        dimension_numbers=('NCH', 'OIH', 'NCH'),
        precision=jax.lax.Precision.HIGHEST)                         # (B, 50, 8)
    y = y + p['b2'][None, :, None]
    y = y.reshape(y.shape[0], -1)                                    # (B, 400)
    y = (y - p['bn_rm']) / jnp.sqrt(p['bn_rv'] + BN_EPS) * p['bn_g'] + p['bn_b']
    y = jnp.maximum(y @ p['wfc1'].T + p['bfc1'], 0.0)
    y = y @ p['wfc2'].T + p['bfc2']
    return jax.nn.softmax(y, axis=-1)


if __name__ == "__main__":
    key = jax.random.PRNGKey(0)
    pkey, xkey = jax.random.split(key)
    params = init_params(pkey)

    B = 4
    x_idx = jax.random.randint(xkey, (B, SEQ), 0, VOCAB, dtype=jnp.int32)

    out = jax.block_until_ready(jax.jit(model_cnn_forward)(x_idx, params))
    ref = jax.block_until_ready(reference_forward(x_idx, params))

    assert out.shape == (B, NCLS)
    assert bool(jnp.all(jnp.isfinite(out)))
    assert float(jnp.max(jnp.abs(jnp.sum(out, axis=-1) - 1.0))) < 1e-4
    assert float(jnp.max(jnp.abs(out - ref))) < 2e-2   # bf16 weights/activations vs f32 ref
    print("KERNEL_OK")
</pallas_src>

<mosaic_0001>
module attributes {stable_mosaic.version = 11 : i64} {
  func.func @_cnn_kernel(%arg0: i32, %arg1: memref<8x36x64xbf16, #tpu.memory_space<vmem>>, %arg2: memref<320x256xbf16, #tpu.memory_space<vmem>>, %arg3: memref<1x256xf32, #tpu.memory_space<vmem>>, %arg4: memref<2560x256xbf16, #tpu.memory_space<vmem>>, %arg5: memref<1x256xf32, #tpu.memory_space<vmem>>, %arg6: memref<256x128xbf16, #tpu.memory_space<vmem>>, %arg7: memref<1x128xf32, #tpu.memory_space<vmem>>, %arg8: memref<8x128xf32, #tpu.memory_space<vmem>>) attributes {dimension_semantics = [#tpu.dimension_semantics<parallel>], iteration_bounds = array<i64: 1>, scalar_prefetch = 0 : i64, scratch_operands = 0 : i64, tpu.core_type = #tpu.core_type<tc>, window_params = [{transform_indices = @transform_0, window_bounds = array<i64: 8, 36, 64>}, {pipeline_mode = #tpu.pipeline_mode<synchronous>, transform_indices = @transform_1, window_bounds = array<i64: 320, 256>}, {pipeline_mode = #tpu.pipeline_mode<synchronous>, transform_indices = @transform_2, window_bounds = array<i64: 1, 256>}, {pipeline_mode = #tpu.pipeline_mode<synchronous>, transform_indices = @transform_3, window_bounds = array<i64: 2560, 256>}, {pipeline_mode = #tpu.pipeline_mode<synchronous>, transform_indices = @transform_4, window_bounds = array<i64: 1, 256>}, {pipeline_mode = #tpu.pipeline_mode<synchronous>, transform_indices = @transform_5, window_bounds = array<i64: 256, 128>}, {pipeline_mode = #tpu.pipeline_mode<synchronous>, transform_indices = @transform_6, window_bounds = array<i64: 1, 128>}, {transform_indices = @transform_7, window_bounds = array<i64: 8, 128>}]} {
    %c0 = arith.constant 0 : index
    %c0_0 = arith.constant 0 : index
    %c0_1 = arith.constant 0 : index
    %0 = vector.load %arg1[%c0, %c0_0, %c0_1] : memref<8x36x64xbf16, #tpu.memory_space<vmem>>, vector<8x36x64xbf16>
    %1 = vector.extract_strided_slice %0 {offsets = [0, 0, 0], sizes = [8, 32, 64], strides = [1, 1, 1]} : vector<8x36x64xbf16> to vector<8x32x64xbf16>
    %2 = vector.extract_strided_slice %0 {offsets = [0, 1, 0], sizes = [8, 32, 64], strides = [1, 1, 1]} : vector<8x36x64xbf16> to vector<8x32x64xbf16>
    %3 = vector.extract_strided_slice %0 {offsets = [0, 2, 0], sizes = [8, 32, 64], strides = [1, 1, 1]} : vector<8x36x64xbf16> to vector<8x32x64xbf16>
    %4 = vector.extract_strided_slice %0 {offsets = [0, 3, 0], sizes = [8, 32, 64], strides = [1, 1, 1]} : vector<8x36x64xbf16> to vector<8x32x64xbf16>
    %5 = vector.extract_strided_slice %0 {offsets = [0, 4, 0], sizes = [8, 32, 64], strides = [1, 1, 1]} : vector<8x36x64xbf16> to vector<8x32x64xbf16>
    %6 = tpu.concatenate %1, %2, %3, %4, %5 in 2 : vector<8x32x64xbf16>, vector<8x32x64xbf16>, vector<8x32x64xbf16>, vector<8x32x64xbf16>, vector<8x32x64xbf16> -> vector<8x32x320xbf16>
    %7 = vector.shape_cast %6 : vector<8x32x320xbf16> to vector<256x320xbf16>
    %c0_2 = arith.constant 0 : index
    %c0_3 = arith.constant 0 : index
    %8 = vector.load %arg2[%c0_2, %c0_3] : memref<320x256xbf16, #tpu.memory_space<vmem>>, vector<320x256xbf16>
    %cst = arith.constant dense<0.000000e+00> : vector<256x256xf32>
    %9 = tpu.matmul %7, %8, %cst {dimension_numbers = #tpu.dot_dimension_numbers<[1], [0], [0], [1], [0, 0, 1, 1], [], []>} : vector<256x320xbf16>, vector<320x256xbf16>, vector<256x256xf32> -> vector<256x256xf32>
    %c0_4 = arith.constant 0 : index
    %c0_5 = arith.constant 0 : index
    %10 = vector.load %arg3[%c0_4, %c0_5] : memref<1x256xf32, #tpu.memory_space<vmem>>, vector<1x256xf32>
    %11 = vector.broadcast %10 : vector<1x256xf32> to vector<256x256xf32>
    %12 = arith.addf %9, %11 : vector<256x256xf32>
    %cst_6 = arith.constant 0.000000e+00 : f32
    %13 = vector.broadcast %cst_6 : f32 to vector<256x256xf32>
    %14 = arith.maximumf %12, %13 : vector<256x256xf32>
    %15 = arith.truncf %14 : vector<256x256xf32> to vector<256x256xbf16>
    %16 = vector.shape_cast %15 : vector<256x256xbf16> to vector<8x32x256xbf16>
    %17 = vector.extract_strided_slice %16 {offsets = [0, 0, 0], sizes = [8, 2, 256], strides = [1, 1, 1]} : vector<8x32x256xbf16> to vector<8x2x256xbf16>
    %cst_7 = arith.constant dense<0xFF80> : vector<8x256xbf16>
    %18 = vector.multi_reduction <maximumf>, %17, %cst_7 [1] : vector<8x2x256xbf16> to vector<8x256xbf16>
    %19 = vector.extract_strided_slice %16 {offsets = [0, 2, 0], sizes = [8, 3, 256], strides = [1, 1, 1]} : vector<8x32x256xbf16> to vector<8x3x256xbf16>
    %cst_8 = arith.constant dense<0xFF80> : vector<8x256xbf16>
    %20 = vector.multi_reduction <maximumf>, %19, %cst_8 [1] : vector<8x3x256xbf16> to vector<8x256xbf16>
    %21 = vector.extract_strided_slice %16 {offsets = [0, 5, 0], sizes = [8, 3, 256], strides = [1, 1, 1]} : vector<8x32x256xbf16> to vector<8x3x256xbf16>
    %cst_9 = arith.constant dense<0xFF80> : vector<8x256xbf16>
    %22 = vector.multi_reduction <maximumf>, %21, %cst_9 [1] : vector<8x3x256xbf16> to vector<8x256xbf16>
    %23 = vector.extract_strided_slice %16 {offsets = [0, 8, 0], sizes = [8, 3, 256], strides = [1, 1, 1]} : vector<8x32x256xbf16> to vector<8x3x256xbf16>
    %cst_10 = arith.constant dense<0xFF80> : vector<8x256xbf16>
    %24 = vector.multi_reduction <maximumf>, %23, %cst_10 [1] : vector<8x3x256xbf16> to vector<8x256xbf16>
    %25 = vector.extract_strided_slice %16 {offsets = [0, 11, 0], sizes = [8, 3, 256], strides = [1, 1, 1]} : vector<8x32x256xbf16> to vector<8x3x256xbf16>
    %cst_11 = arith.constant dense<0xFF80> : vector<8x256xbf16>
    %26 = vector.multi_reduction <maximumf>, %25, %cst_11 [1] : vector<8x3x256xbf16> to vector<8x256xbf16>
    %27 = vector.extract_strided_slice %16 {offsets = [0, 14, 0], sizes = [8, 3, 256], strides = [1, 1, 1]} : vector<8x32x256xbf16> to vector<8x3x256xbf16>
    %cst_12 = arith.constant dense<0xFF80> : vector<8x256xbf16>
    %28 = vector.multi_reduction <maximumf>, %27, %cst_12 [1] : vector<8x3x256xbf16> to vector<8x256xbf16>
    %29 = vector.extract_strided_slice %16 {offsets = [0, 17, 0], sizes = [8, 3, 256], strides = [1, 1, 1]} : vector<8x32x256xbf16> to vector<8x3x256xbf16>
    %cst_13 = arith.constant dense<0xFF80> : vector<8x256xbf16>
    %30 = vector.multi_reduction <maximumf>, %29, %cst_13 [1] : vector<8x3x256xbf16> to vector<8x256xbf16>
    %31 = vector.extract_strided_slice %16 {offsets = [0, 20, 0], sizes = [8, 3, 256], strides = [1, 1, 1]} : vector<8x32x256xbf16> to vector<8x3x256xbf16>
    %cst_14 = arith.constant dense<0xFF80> : vector<8x256xbf16>
    %32 = vector.multi_reduction <maximumf>, %31, %cst_14 [1] : vector<8x3x256xbf16> to vector<8x256xbf16>
    %33 = vector.extract_strided_slice %16 {offsets = [0, 23, 0], sizes = [8, 3, 256], strides = [1, 1, 1]} : vector<8x32x256xbf16> to vector<8x3x256xbf16>
    %cst_15 = arith.constant dense<0xFF80> : vector<8x256xbf16>
    %34 = vector.multi_reduction <maximumf>, %33, %cst_15 [1] : vector<8x3x256xbf16> to vector<8x256xbf16>
    %35 = vector.extract_strided_slice %16 {offsets = [0, 26, 0], sizes = [8, 3, 256], strides = [1, 1, 1]} : vector<8x32x256xbf16> to vector<8x3x256xbf16>
    %cst_16 = arith.constant dense<0xFF80> : vector<8x256xbf16>
    %36 = vector.multi_reduction <maximumf>, %35, %cst_16 [1] : vector<8x3x256xbf16> to vector<8x256xbf16>
    %37 = tpu.concatenate %18, %20, %22, %24, %26, %28, %30, %32, %34, %36 in 1 : vector<8x256xbf16>, vector<8x256xbf16>, vector<8x256xbf16>, vector<8x256xbf16>, vector<8x256xbf16>, vector<8x256xbf16>, vector<8x256xbf16>, vector<8x256xbf16>, vector<8x256xbf16>, vector<8x256xbf16> -> vector<8x2560xbf16>
    %c0_17 = arith.constant 0 : index
    %c0_18 = arith.constant 0 : index
    %38 = vector.load %arg4[%c0_17, %c0_18] : memref<2560x256xbf16, #tpu.memory_space<vmem>>, vector<2560x256xbf16>
    %cst_19 = arith.constant dense<0.000000e+00> : vector<8x256xf32>
    %39 = tpu.matmul %37, %38, %cst_19 {dimension_numbers = #tpu.dot_dimension_numbers<[1], [0], [0], [1], [0, 0, 1, 1], [], []>} : vector<8x2560xbf16>, vector<2560x256xbf16>, vector<8x256xf32> -> vector<8x256xf32>
    %c0_20 = arith.constant 0 : index
    %c0_21 = arith.constant 0 : index
    %40 = vector.load %arg5[%c0_20, %c0_21] : memref<1x256xf32, #tpu.memory_space<vmem>>, vector<1x256xf32>
    %41 = vector.broadcast %40 : vector<1x256xf32> to vector<8x256xf32>
    %42 = arith.addf %39, %41 : vector<8x256xf32>
    %cst_22 = arith.constant 0.000000e+00 : f32
    %43 = vector.broadcast %cst_22 : f32 to vector<8x256xf32>
    %44 = arith.maximumf %42, %43 : vector<8x256xf32>
    %45 = arith.truncf %44 : vector<8x256xf32> to vector<8x256xbf16>
    %c0_23 = arith.constant 0 : index
    %c0_24 = arith.constant 0 : index
    %46 = vector.load %arg6[%c0_23, %c0_24] : memref<256x128xbf16, #tpu.memory_space<vmem>>, vector<256x128xbf16>
    %cst_25 = arith.constant dense<0.000000e+00> : vector<8x128xf32>
    %47 = tpu.matmul %45, %46, %cst_25 {dimension_numbers = #tpu.dot_dimension_numbers<[1], [0], [0], [1], [0, 0, 1, 1], [], []>} : vector<8x256xbf16>, vector<256x128xbf16>, vector<8x128xf32> -> vector<8x128xf32>
    %c0_26 = arith.constant 0 : index
    %c0_27 = arith.constant 0 : index
    %48 = vector.load %arg7[%c0_26, %c0_27] : memref<1x128xf32, #tpu.memory_space<vmem>>, vector<1x128xf32>
    %49 = vector.broadcast %48 : vector<1x128xf32> to vector<8x128xf32>
    %50 = arith.addf %47, %49 : vector<8x128xf32>
    %cst_28 = arith.constant dense<0xFF800000> : vector<8xf32>
    %51 = vector.multi_reduction <maximumf>, %50, %cst_28 [1] : vector<8x128xf32> to vector<8xf32>
    %52 = vector.shape_cast %51 : vector<8xf32> to vector<8x1xf32>
    %53 = vector.broadcast %52 : vector<8x1xf32> to vector<8x128xf32>
    %54 = arith.subf %50, %53 : vector<8x128xf32>
    %55 = math.exp %54 : vector<8x128xf32>
    %cst_29 = arith.constant dense<0.000000e+00> : vector<8xf32>
    %56 = vector.multi_reduction <add>, %55, %cst_29 [1] : vector<8x128xf32> to vector<8xf32>
    %57 = vector.shape_cast %56 : vector<8xf32> to vector<8x1xf32>
    %58 = tpu.reciprocal %57 : vector<8x1xf32> -> vector<8x1xf32>
    %59 = vector.broadcast %58 : vector<8x1xf32> to vector<8x128xf32>
    %60 = arith.mulf %55, %59 : vector<8x128xf32>
    %c0_30 = arith.constant 0 : index
    %c0_31 = arith.constant 0 : index
    %61 = vector.load %arg8[%c0_30, %c0_31] : memref<8x128xf32, #tpu.memory_space<vmem>>, vector<8x128xf32>
    tpu.vector_store %arg8[%c0_30, %c0_31], %60 {strides = array<i32>} : memref<8x128xf32, #tpu.memory_space<vmem>>, vector<8x128xf32>,
    return
  }
  func.func @transform_0(%arg0: i32) -> (i32, i32, i32) {
    %c0_i32 = arith.constant 0 : i32
    %c0_i32_0 = arith.constant 0 : i32
    %c0_i32_1 = arith.constant 0 : i32
    return %arg0, %c0_i32, %c0_i32_0 : i32, i32, i32
  }
  func.func @transform_1(%arg0: i32) -> (i32, i32) {
    %c0_i32 = arith.constant 0 : i32
    %c0_i32_0 = arith.constant 0 : i32
    %c0_i32_1 = arith.constant 0 : i32
    return %c0_i32, %c0_i32_0 : i32, i32
  }
  func.func @transform_2(%arg0: i32) -> (i32, i32) {
    %c0_i32 = arith.constant 0 : i32
    %c0_i32_0 = arith.constant 0 : i32
    %c0_i32_1 = arith.constant 0 : i32
    return %c0_i32, %c0_i32_0 : i32, i32
  }
  func.func @transform_3(%arg0: i32) -> (i32, i32) {
    %c0_i32 = arith.constant 0 : i32
    %c0_i32_0 = arith.constant 0 : i32
    %c0_i32_1 = arith.constant 0 : i32
    return %c0_i32, %c0_i32_0 : i32, i32
  }
  func.func @transform_4(%arg0: i32) -> (i32, i32) {
    %c0_i32 = arith.constant 0 : i32
    %c0_i32_0 = arith.constant 0 : i32
    %c0_i32_1 = arith.constant 0 : i32
    return %c0_i32, %c0_i32_0 : i32, i32
  }
  func.func @transform_5(%arg0: i32) -> (i32, i32) {
    %c0_i32 = arith.constant 0 : i32
    %c0_i32_0 = arith.constant 0 : i32
    %c0_i32_1 = arith.constant 0 : i32
    return %c0_i32, %c0_i32_0 : i32, i32
  }
  func.func @transform_6(%arg0: i32) -> (i32, i32) {
    %c0_i32 = arith.constant 0 : i32
    %c0_i32_0 = arith.constant 0 : i32
    %c0_i32_1 = arith.constant 0 : i32
    return %c0_i32, %c0_i32_0 : i32, i32
  }
  func.func @transform_7(%arg0: i32) -> (i32, i32) {
    %c0_i32 = arith.constant 0 : i32
    %c0_i32_0 = arith.constant 0 : i32
    return %arg0, %c0_i32 : i32, i32
  }
}

</mosaic_0001>

<bundles_post_ra>
// kernel: model_cnn_forward.1
= control target key start
LH: loop header
LB: loop body
LE: loop exit
PB: predicated region body
PF: predicated region fallthrough
CT: control target
= control target key end

     0   :  { %vm406_vm0 = vsmask.f32 6400  ;;  %vm172_vm1 = vsmask.f32 7424  ;;  %s7596_s15 = smov 64   ;;  %vm365_vm2 = vcmask 1046528   ;;  %s11198_s0 = inlined_call_operand.vmem [shape: bf16[8,36,64], index: 0, kind: input, shape index: {}]   ;;  %s11199_s1 = inlined_call_operand.vmem [shape: bf16[320,256], index: 1, kind: input, shape index: {}]   ;;  %s11200_s2 = inlined_call_operand.vmem [shape: f32[1,256], index: 2, kind: input, shape index: {}]   ;;  %s11201_s3 = inlined_call_operand.vmem [shape: bf16[2560,256], index: 3, kind: input, shape index: {}]   ;;  %s11202_s5 = inlined_call_operand.vmem [shape: bf16[256,128], index: 5, kind: input, shape index: {}]   ;;  %s11203_s4 = inlined_call_operand.vmem [shape: f32[1,256], index: 4, kind: input, shape index: {}]   ;;  %s11204_s6 = inlined_call_operand.vmem [shape: f32[1,128], index: 6, kind: input, shape index: {}]   ;;  %s11205_s7 = inlined_call_operand.vmem [shape: f32[8,128], index: 7, kind: output, shape index: {}]  }
   0x1   :  { %v7641_v0 = vld [vmem:[%s11198_s0] sm:$0xff]   ;;  %v7646_v1 = vld [vmem:[%s11198_s0 + $0x8] sm:$0xff]   ;;  %v7651_v2 = vld [vmem:[%s11198_s0 + $0x10] ss:$0 sps:$4 sm:$0x33]   ;;  %vm543_vm3 = vcmask 1045504  }
   0x2   :  { %v7656_v3 = vld [vmem:[%s11198_s0 + $0x14] sm:$0xff]   ;;  %v174_v4 = vshrl.u32 %v7641_v0, 16  ;;  %v176_v5 = vshll.u32 %v7641_v0, 16  ;;  %v181_v6 = vshll.u32 %v7646_v1, 16  ;;  %v185_v7 = vshrl.u32 %v7646_v1, 16  ;;  %v7667_v18 = vld [vmem:[%s11198_s0 + $0x1c] sm:$0xff]  }
   0x3   :  { %v189_v8 = vshll.u32 %v7651_v2, 16  ;;  %v414_v9 = vshrl.u32 %v7651_v2, 16  ;;  %v7672_v19 = vld [vmem:[%s11198_s0 + $0x28] sm:$0xff]   ;;  %v194_v23 = vshrl.u32 %v7656_v3, 16  ;;  %v196_v27 = vshll.u32 %v7656_v3, 16  ;;  %v7691_v37 = vld [vmem:[%s11198_s0 + $0x30] sm:$0xff]  }
   0x4   :  { %v407_v10 = vrot.slane %v174_v4, 1  ;;  %v408_v11 = vrot.slane %v176_v5, 2  ;;  %v410_v12 = vrot.slane %v185_v7, 1  ;;  %v411_v13 = vrot.slane %v181_v6, 2  ;;  %v7706_v50 = vld [vmem:[%s11198_s0 + $0x3c] sm:$0xff]   ;;  %v7713_v55 = vld [vmem:[%s11198_s0 + $0x44] sm:$0xff]  }
   0x5   :  { %v178_v14 = vrot.slane %v176_v5, 1  ;;  %v183_v15 = vrot.slane %v181_v6, 1  ;;  %v416_v16 = vrot.slane %v414_v9, 1  ;;  %v417_v17 = vrot.slane %v189_v8, 2  ;;  %v7011_v60 = vld [vmem:[%s11199_s1 + $0x4] ss:$8 sps:$4 sm:$0xff]  }
   0x6   :  { %v409_v20 = vor.u32 %v408_v11, %v407_v10  ;;  %v412_v21 = vor.u32 %v411_v13, %v410_v12  ;;  %v191_v22 = vrot.slane %v189_v8, 1  ;;  %v7679_v28 = vld [vmem:[%s11198_s0 + $0x24] ss:$0 sps:$4 sm:$0x33]   ;;  %v201_v30 = vshll.u32 %v7667_v18, 16  ;;  %997 = vmatprep.subr.bf16.mxu0 %v7011_v60 }
   0x7   :  { %v179_v24 = vor.u32 %v178_v14, %v174_v4  ;;  %v418_v25 = vor.u32 %v417_v17, %v416_v16  ;;  %v187_v26 = vor.u32 %v185_v7, %v183_v15  ;;  %v205_v31 = vshrl.u32 %v7667_v18, 16  ;;  %v7700_v46 = vld [vmem:[%s11198_s0 + $0x38] ss:$0 sps:$4 sm:$0x33]   ;;  %v7013_v5 = vld [vmem:[%s11199_s1] ss:$8 sps:$4 sm:$0xff]  }
   0x8   :  { %v413_v29 = vsel %vm406_vm0, %v409_v20, %v412_v21  ;;  %v420_v32 = vrot.slane %v194_v23, 1  ;;  %v421_v36 = vrot.slane %v196_v27, 2  ;;  %v424_v39 = vrot.slane %v201_v30, 2  ;;  %v7014_v10 = vld [vmem:[%s11199_s1 + $0x14] ss:$8 sps:$4 sm:$0xff]   ;;  %998 = vmatpush1.bf16.msra.mxu0 %v7013_v5 }
   0x9   :  { %511 = vrot.lane.b32.xlu0 %v413_v29, %s7596_s15  ;;  %v184_v33 = vsel %vm172_vm1, %v179_v24, %v183_v15  ;;  %v419_v34 = vsel %vm406_vm0, %v412_v21, %v418_v25  ;;  %v192_v35 = vsel %vm172_vm1, %v187_v26, %v191_v22  ;;  %v423_v38 = vrot.slane %v205_v31, 1  ;;  %v7017_v14 = vld [vmem:[%s11199_s1 + $0x10] ss:$8 sps:$4 sm:$0xff]   ;;  %999 = vmatprep.subr.bf16.mxu0 %v7014_v10  ;;  %v7741_v21 = vld [vmem:[%s11198_s0 + $0x4c] ss:$0 sps:$4 sm:$0x33]  }
   0xa   :  { %513 = vrot.lane.b32.xlu1 %v419_v34, %s7596_s15  ;;  %v198_v40 = vrot.slane %v196_v27, 1  ;;  %v203_v41 = vrot.slane %v201_v30, 1  ;;  %v422_v42 = vor.u32 %v421_v36, %v420_v32  ;;  %v209_v43 = vshll.u32 %v7679_v28, 16  ;;  %v7018_v26 = vld [vmem:[%s11199_s1 + $0x24] ss:$8 sps:$4 sm:$0xff]  }
   0xb   :  { %v427_v44 = vshrl.u32 %v7679_v28, 16  ;;  %v214_v45 = vshrl.u32 %v7672_v19, 16  ;;  %v425_v47 = vor.u32 %v424_v39, %v423_v38  ;;  %v216_v49 = vshll.u32 %v7672_v19, 16  ;;  %v7020_v30 = vld [vmem:[%s11199_s1 + $0x20] ss:$8 sps:$4 sm:$0xff]  }
   0xc   :  { %v199_v48 = vor.u32 %v198_v40, %v194_v23  ;;  %v430_v52 = vrot.slane %v209_v43, 2  ;;  %v211_v53 = vrot.slane %v209_v43, 1  ;;  %v221_v54 = vshll.u32 %v7691_v37, 16  ;;  %1000 = vmatpush1.bf16.msra.mxu0 %v7017_v14  ;;  %v7026_v60 = vld [vmem:[%s11199_s1 + $0x44] ss:$8 sps:$4 sm:$0xff]  }
   0xd   :  { %333 = vrot.lane.b32.xlu0 %v184_v33, %s7596_s15  ;;  %v429_v51 = vrot.slane %v427_v44, 1  ;;  %v426_v56 = vsel %vm406_vm0, %v422_v42, %v425_v47  ;;  %v207_v57 = vor.u32 %v205_v31, %v203_v41  ;;  %v225_v58 = vshrl.u32 %v7691_v37, 16  ;;  %1001 = vmatprep.subr.bf16.mxu0 %v7018_v26  ;;  %v7764_v44 = vld [vmem:[%s11198_s0 + $0x50] sm:$0xff]  }
   0xe   :  { %335 = vrot.lane.b32.xlu1 %v192_v35, %s7596_s15  ;;  %v433_v59 = vrot.slane %v214_v45, 1  ;;  %v204_v61 = vsel %vm172_vm1, %v199_v48, %v203_v41  ;;  %v434_v63 = vrot.slane %v216_v49, 2  ;;  %v437_v4 = vrot.slane %v221_v54, 2  ;;  %v7021_v35 = vld [vmem:[%s11199_s1 + $0x34] ss:$8 sps:$4 sm:$0xff]  }
   0xf   :  { %v431_v62 = vor.u32 %v430_v52, %v429_v51  ;;  %v436_v6 = vrot.slane %v225_v58, 1  ;;  %v218_v7 = vrot.slane %v216_v49, 1  ;;  %v223_v8 = vrot.slane %v221_v54, 1  ;;  %v7770_v48 = vld [vmem:[%s11198_s0 + $0x58] sm:$0xff]  }
  0x10   :  { %v229_v9 = vshll.u32 %v7700_v46, 16  ;;  %v435_v11 = vor.u32 %v434_v63, %v433_v59  ;;  %v440_v12 = vshrl.u32 %v7700_v46, 16  ;;  %v234_v13 = vshrl.u32 %v7706_v50, 16  ;;  %v7025_v49 = vld [vmem:[%s11199_s1 + $0x30] ss:$8 sps:$4 sm:$0xff]   ;;  %1002 = vmatpush1.bf16.msra.mxu0 %v7020_v30 }
  0x11   :  { %515 = vrot.lane.b32.xlu0 %v426_v56, %s7596_s15  ;;  %v432_v15 = vsel %vm406_vm0, %v425_v47, %v431_v62  ;;  %v212_v16 = vsel %vm172_vm1, %v207_v57, %v211_v53  ;;  %v438_v17 = vor.u32 %v437_v4, %v436_v6  ;;  %v219_v22 = vor.u32 %v218_v7, %v214_v45  ;;  %v7028_v7 = vld [vmem:[%s11199_s1 + $0x40] ss:$8 sps:$4 sm:$0xff]   ;;  %v7029_v14 = vld [vmem:[%s11199_s1 + $0x54] ss:$8 sps:$4 sm:$0xff]  }
  0x12   :  { %337 = vrot.lane.b32.xlu1 %v204_v61, %s7596_s15  ;;  %v443_v20 = vrot.slane %v229_v9, 2  ;;  %v442_v23 = vrot.slane %v440_v12, 1  ;;  %v236_v24 = vshll.u32 %v7706_v50, 16  ;;  %v241_v25 = vshll.u32 %v7713_v55, 16  ;;  %1003 = vmatprep.subr.bf16.mxu0 %v7021_v35 }
  0x13   :  { %v231_v27 = vrot.slane %v229_v9, 1  ;;  %v245_v29 = vshrl.u32 %v7713_v55, 16  ;;  %v439_v31 = vsel %vm406_vm0, %v435_v11, %v438_v17  ;;  %v446_v33 = vrot.slane %v234_v13, 1  ;;  %v7792_v11 = vld [vmem:[%s11198_s0 + $0x60] ss:$0 sps:$4 sm:$0x33]  }
  0x14   :  { %v444_v32 = vor.u32 %v443_v20, %v442_v23  ;;  %v447_v34 = vrot.slane %v236_v24, 2  ;;  %v450_v38 = vrot.slane %v241_v25, 2  ;;  %v238_v39 = vrot.slane %v236_v24, 1  ;;  %1004 = vmatpush1.bf16.msra.mxu0 %v7025_v49  ;;  %v7032_v20 = vld [vmem:[%s11199_s1 + $0x50] ss:$8 sps:$4 sm:$0xff]  }
  0x15   :  { %517 = vrot.lane.b32.xlu0 %v432_v15, %s7596_s15  ;;  %v449_v36 = vrot.slane %v245_v29, 1  ;;  %v249_v40 = vshll.u32 %v7741_v21, 16  ;;  %v224_v41 = vsel %vm172_vm1, %v219_v22, %v223_v8  ;;  %v227_v42 = vor.u32 %v225_v58, %v223_v8  ;;  %1005 = vmatprep.subr.bf16.mxu0 %v7026_v60  ;;  %v7808_v22 = vld [vmem:[%s11198_s0 + $0x64] sm:$0xff]  }
  0x16   :  { %339 = vrot.lane.b32.xlu1 %v212_v16, %s7596_s15  ;;  %v453_v43 = vshrl.u32 %v7741_v21, 16  ;;  %v445_v45 = vsel %vm406_vm0, %v438_v17, %v444_v32  ;;  %v243_v47 = vrot.slane %v241_v25, 1  ;;  %v254_v53 = vshrl.u32 %v7764_v44, 16 }
  0x17   :  { %v456_v52 = vrot.slane %v249_v40, 2  ;;  %v256_v54 = vshll.u32 %v7764_v44, 16  ;;  %v448_v56 = vor.u32 %v447_v34, %v446_v33  ;;  %v451_v57 = vor.u32 %v450_v38, %v449_v36  ;;  %v7035_v36 = vld [vmem:[%s11199_s1 + $0x60] ss:$8 sps:$4 sm:$0xff]  }
  0x18   :  { %v455_v51 = vrot.slane %v453_v43, 1  ;;  %v261_v58 = vshll.u32 %v7770_v48, 16  ;;  %v265_v59 = vshrl.u32 %v7770_v48, 16  ;;  %v232_v61 = vsel %vm172_vm1, %v227_v42, %v231_v27  ;;  %1006 = vmatpush1.bf16.msra.mxu0 %v7028_v7  ;;  %v7033_v27 = vld [vmem:[%s11199_s1 + $0x64] ss:$8 sps:$4 sm:$0xff]  }
  0x19   :  { %519 = vrot.lane.b32.xlu0 %v439_v31, %s7596_s15  ;;  %v239_v62 = vor.u32 %v238_v39, %v234_v13  ;;  %v251_v63 = vrot.slane %v249_v40, 1  ;;  %v247_v4 = vor.u32 %v245_v29, %v243_v47  ;;  %v459_v5 = vrot.slane %v254_v53, 1  ;;  %v7819_v29 = vld [vmem:[%s11198_s0 + $0x6c] sm:$0xff]   ;;  %1007 = vmatprep.subr.bf16.mxu0 %v7029_v14  ;;  %v7036_v40 = vld [vmem:[%s11199_s1 + $0x74] ss:$8 sps:$4 sm:$0xff]  }
  0x1a   :  { %341 = vrot.lane.b32.xlu1 %v224_v41, %s7596_s15  ;;  %v460_v6 = vrot.slane %v256_v54, 2  ;;  %v457_v8 = vor.u32 %v456_v52, %v455_v51  ;;  %v462_v9 = vrot.slane %v265_v59, 1  ;;  %v463_v10 = vrot.slane %v261_v58, 2  ;;  %v7838_v51 = vld [vmem:[%s11198_s0 + $0x74] ss:$0 sps:$4 sm:$0x33]  }
  0x1b   :  { %v452_v12 = vsel %vm406_vm0, %v448_v56, %v451_v57  ;;  %v258_v13 = vrot.slane %v256_v54, 1  ;;  %v244_v15 = vsel %vm172_vm1, %v239_v62, %v243_v47  ;;  %v269_v16 = vshll.u32 %v7792_v11, 16  ;;  %v7040_v56 = vld [vmem:[%s11199_s1 + $0x70] ss:$8 sps:$4 sm:$0xff]   ;;  %v7043_v14 = vld [vmem:[%s11199_s1 + $0x80] ss:$8 sps:$4 sm:$0xff]  }
  0x1c   :  { %v466_v17 = vshrl.u32 %v7792_v11, 16  ;;  %v252_v23 = vsel %vm172_vm1, %v247_v4, %v251_v63  ;;  %v458_v24 = vsel %vm406_vm0, %v451_v57, %v457_v8  ;;  %v461_v25 = vor.u32 %v460_v6, %v459_v5  ;;  %1008 = vmatpush1.bf16.msra.mxu0 %v7032_v20  ;;  %v7852_v62 = vld [vmem:[%s11198_s0 + $0x78] sm:$0xff]   ;;  %v7860_v8 = vld [vmem:[%s11198_s0 + $0x80] sm:$0xff]  }
  0x1d   :  { %521 = vrot.lane.b32.xlu0 %v445_v45, %s7596_s15  ;;  %v464_v26 = vor.u32 %v463_v10, %v462_v9  ;;  %v469_v31 = vrot.slane %v269_v16, 2  ;;  %v274_v32 = vshrl.u32 %v7808_v22, 16  ;;  %v276_v33 = vshll.u32 %v7808_v22, 16  ;;  %1009 = vmatprep.subr.bf16.mxu0 %v7033_v27 }
  0x1e   :  { %343 = vrot.lane.b32.xlu1 %v232_v61, %s7596_s15  ;;  %v468_v30 = vrot.slane %v466_v17, 1  ;;  %v259_v34 = vor.u32 %v258_v13, %v254_v53  ;;  %v263_v35 = vrot.slane %v261_v58, 1  ;;  %v281_v38 = vshll.u32 %v7819_v29, 16  ;;  %v7041_v58 = vld [vmem:[%s11199_s1 + $0x84] ss:$8 sps:$4 sm:$0xff]  }
  0x1f   :  { %v285_v39 = vshrl.u32 %v7819_v29, 16  ;;  %v472_v41 = vrot.slane %v274_v32, 1  ;;  %v473_v42 = vrot.slane %v276_v33, 2  ;;  %v465_v47 = vsel %vm406_vm0, %v461_v25, %v464_v26 }
  0x20   :  { %v476_v45 = vrot.slane %v281_v38, 2  ;;  %v470_v49 = vor.u32 %v469_v31, %v468_v30  ;;  %v264_v52 = vsel %vm172_vm1, %v259_v34, %v263_v35  ;;  %v267_v53 = vor.u32 %v265_v59, %v263_v35  ;;  %1010 = vmatpush1.bf16.msra.mxu0 %v7035_v36  ;;  %v7880_v34 = vld [vmem:[%s11198_s0 + $0x88] ss:$0 sps:$4 sm:$0x33]   ;;  %v7047_v35 = vld [vmem:[%s11199_s1 + $0x90] ss:$8 sps:$4 sm:$0xff]  }
  0x21   :  { %523 = vrot.lane.b32.xlu0 %v452_v12, %s7596_s15  ;;  %v475_v43 = vrot.slane %v285_v39, 1  ;;  %v271_v54 = vrot.slane %v269_v16, 1  ;;  %v278_v57 = vrot.slane %v276_v33, 1  ;;  %v289_v60 = vshll.u32 %v7838_v51, 16  ;;  %1011 = vmatprep.subr.bf16.mxu0 %v7036_v40 }
  0x22   :  { %345 = vrot.lane.b32.xlu1 %v244_v15, %s7596_s15  ;;  %v479_v61 = vshrl.u32 %v7838_v51, 16  ;;  %v474_v59 = vor.u32 %v473_v42, %v472_v41  ;;  %v471_v4 = vsel %vm406_vm0, %v464_v26, %v470_v49  ;;  %v283_v5 = vrot.slane %v281_v38, 1  ;;  %v7044_v15 = vld [vmem:[%s11199_s1 + $0x94] ss:$8 sps:$4 sm:$0xff]   ;;  %v7048_v38 = vld [vmem:[%s11199_s1 + $0xa4] ss:$8 sps:$4 sm:$0xff]  }
  0x23   :  { %v477_v63 = vor.u32 %v476_v45, %v475_v43  ;;  %v482_v7 = vrot.slane %v289_v60, 2  ;;  %v272_v9 = vsel %vm172_vm1, %v267_v53, %v271_v54  ;;  %v279_v10 = vor.u32 %v278_v57, %v274_v32  ;;  %v7895_v41 = vld [vmem:[%s11198_s0 + $0x8c] sm:$0xff]   ;;  %v7051_v57 = vld [vmem:[%s11199_s1 + $0xb4] ss:$8 sps:$4 sm:$0xff]  }
  0x24   :  { %v481_v6 = vrot.slane %v479_v61, 1  ;;  %v294_v12 = vshrl.u32 %v7852_v62, 16  ;;  %v296_v13 = vshll.u32 %v7852_v62, 16  ;;  %v287_v16 = vor.u32 %v285_v39, %v283_v5  ;;  %1012 = vmatpush1.bf16.msra.mxu0 %v7040_v56  ;;  %v7905_v56 = vld [vmem:[%s11198_s0 + $0x94] sm:$0xff]  }
  0x25   :  { %525 = vrot.lane.b32.xlu0 %v458_v24, %s7596_s15  ;;  %v301_v17 = vshll.u32 %v7860_v8, 16  ;;  %v305_v20 = vshrl.u32 %v7860_v8, 16  ;;  %v291_v25 = vrot.slane %v289_v60, 1  ;;  %1013 = vmatprep.subr.bf16.mxu0 %v7041_v58  ;;  %v284_v33 = vsel %vm172_vm1, %v279_v10, %v283_v5  ;;  %v7918_v5 = vld [vmem:[%s11199_s1 + $0x100] ss:$8 sps:$4 sm:$0xff]  }
  0x26   :  { %347 = vrot.lane.b32.xlu1 %v252_v23, %s7596_s15  ;;  %v478_v23 = vsel %vm406_vm0, %v474_v59, %v477_v63  ;;  %v483_v24 = vor.u32 %v482_v7, %v481_v6  ;;  %v485_v26 = vrot.slane %v294_v12, 1  ;;  %v486_v27 = vrot.slane %v296_v13, 2 }
  0x27   :  { %v488_v30 = vrot.slane %v305_v20, 1  ;;  %v489_v31 = vrot.slane %v301_v17, 2  ;;  %v298_v32 = vrot.slane %v296_v13, 1  ;;  %v292_v36 = vsel %vm172_vm1, %v287_v16, %v291_v25  ;;  %v7056_v25 = vld [vmem:[%s11199_s1 + $0xc4] ss:$8 sps:$4 sm:$0xff]  }
  0x28   :  { %1014 = vmatpush1.bf16.msra.mxu0 %v7043_v14  ;;  %v309_v39 = vshll.u32 %v7880_v34, 16  ;;  %v492_v40 = vshrl.u32 %v7880_v34, 16  ;;  %v484_v42 = vsel %vm406_vm0, %v477_v63, %v483_v24  ;;  %v487_v43 = vor.u32 %v486_v27, %v485_v26  ;;  %v7942_v24 = vld [vmem:[%s11199_s1 + $0x114] ss:$8 sps:$4 sm:$0xff]  }
  0x29   :  { %527 = vrot.lane.b32.xlu0 %v465_v47, %s7596_s15  ;;  %1015 = vmatprep.subr.bf16.mxu0 %v7044_v15  ;;  %v490_v45 = vor.u32 %v489_v31, %v488_v30  ;;  %v7050_v47 = vld [vmem:[%s11199_s1 + $0xa0] ss:$8 sps:$4 sm:$0xff]   ;;  %v299_v49 = vor.u32 %v298_v32, %v294_v12  ;;  %v314_v58 = vshrl.u32 %v7895_v41, 16  ;;  %v316_v60 = vshll.u32 %v7895_v41, 16  ;;  %v7925_v12 = vld [vmem:[%s11199_s1 + $0x104] ss:$8 sps:$4 sm:$0xff]  }
  0x2a   :  { %349 = vrot.lane.b32.xlu1 %v264_v52, %s7596_s15  ;;  %v303_v52 = vrot.slane %v301_v17, 1  ;;  %v494_v53 = vrot.slane %v492_v40, 1  ;;  %v495_v54 = vrot.slane %v309_v39, 2  ;;  %v321_v63 = vshll.u32 %v7905_v56, 16  ;;  %6826 = vmatprep.subr.bf16.mxu1 %v7925_v12  ;;  %v7961_v40 = vld [vmem:[%s11199_s1 + $0x124] ss:$8 sps:$4 sm:$0xff]  }
  0x2b   :  { %v491_v6 = vsel %vm406_vm0, %v487_v43, %v490_v45  ;;  %v311_v7 = vrot.slane %v309_v39, 1  ;;  %v499_v10 = vrot.slane %v316_v60, 2  ;;  %v318_v16 = vrot.slane %v316_v60, 1  ;;  %v7931_v17 = vld [vmem:[%s11198_s0 + $0x9c] ss:$0 sps:$4 sm:$0x33]   ;;  %6830 = vmatpush1.bf16.msra.mxu1 %v7918_v5 }
  0x2c   :  { %1016 = vmatpush1.bf16.msra.mxu0 %v7047_v35  ;;  %v496_v61 = vor.u32 %v495_v54, %v494_v53  ;;  %v307_v59 = vor.u32 %v305_v20, %v303_v52  ;;  %v304_v13 = vsel %vm172_vm1, %v299_v49, %v303_v52  ;;  %v502_v15 = vrot.slane %v321_v63, 2  ;;  %v7055_v20 = vld [vmem:[%s11199_s1 + $0xb0] ss:$8 sps:$4 sm:$0xff]   ;;  %6827 = vmatprep.subr.bf16.mxu1 %v7942_v24  ;;  %v7059_v43 = vld [vmem:[%s11199_s1 + $0xd4] ss:$8 sps:$4 sm:$0xff]  }
  0x2d   :  { %529 = vrot.lane.b32.xlu0 %v471_v4, %s7596_s15  ;;  %v325_v4 = vshrl.u32 %v7905_v56, 16  ;;  %1017 = vmatprep.subr.bf16.mxu0 %v7048_v38  ;;  %v329_v30 = vshll.u32 %v7931_v17, 16  ;;  %v505_v31 = vshrl.u32 %v7931_v17, 16  ;;  %v323_v35 = vrot.slane %v321_v63, 1  ;;  %v7977_v54 = vld [vmem:[%s11199_s1 + $0x120] ss:$8 sps:$4 sm:$0xff]  }
  0x2e   :  { %351 = vrot.lane.b32.xlu1 %v272_v9, %s7596_s15  ;;  %v498_v9 = vrot.slane %v314_v58, 1  ;;  %v312_v32 = vsel %vm172_vm1, %v307_v59, %v311_v7  ;;  %v387_v60 = vrot.slane %v7770_v48, 1  ;;  %v7063_v59 = vld [vmem:[%s11199_s1 + $0xe4] ss:$8 sps:$4 sm:$0xff]   ;;  %v7597_v7 = vmov 0  }
  0x2f   :  { %v501_v14 = vrot.slane %v325_v4, 1  ;;  %v507_v38 = vrot.slane %v505_v31, 1  ;;  %v508_v39 = vrot.slane %v329_v30, 2  ;;  %v327_v52 = vor.u32 %v325_v4, %v323_v35  ;;  %1302 = vmatprep.mubr.bf16.mxu1 %v7597_v7 }
  0x30   :  { %1018 = vmatpush1.bf16.msra.mxu0 %v7050_v47  ;;  %v500_v26 = vor.u32 %v499_v10, %v498_v9  ;;  %v331_v53 = vrot.slane %v329_v30, 1  ;;  %v564_v9 = vrot.slane %v7764_v44, 2  ;;  %v565_v10 = vrot.slane %v7770_v48, 2 }
  0x31   :  { %531 = vrot.lane.b32.xlu0 %v478_v23, %s7596_s15  ;;  %v497_v23 = vsel %vm406_vm0, %v490_v45, %v496_v61  ;;  %1019 = vmatprep.subr.bf16.mxu0 %v7051_v57  ;;  %v503_v27 = vor.u32 %v502_v15, %v501_v14  ;;  %v509_v47 = vor.u32 %v508_v39, %v507_v38  ;;  %v7983_v57 = vld [vmem:[%s11199_s1 + $0x134] ss:$8 sps:$4 sm:$0xff]   ;;  %v389_v61 = vrot.slane %v7792_v11, 1  ;;  %v7065_v14 = vld [vmem:[%s11199_s1 + $0xe0] ss:$8 sps:$4 sm:$0xff]  }
  0x32   :  { %353 = vrot.lane.b32.xlu1 %v284_v33, %s7596_s15  ;;  %v319_v33 = vor.u32 %v318_v16, %v314_v58  ;;  %v7062_v58 = vld [vmem:[%s11199_s1 + $0xd0] ss:$8 sps:$4 sm:$0xff]   ;;  %v332_v4 = vsel %vm172_vm1, %v327_v52, %v331_v53  ;;  %v7066_v15 = vld [vmem:[%s11199_s1 + $0xf4] ss:$8 sps:$4 sm:$0xff]   ;;  %v566_v16 = vsel %vm543_vm3, %v564_v9, %v565_v10  ;;  %vm584_vm4 = vcmask 523264  }
  0x33   :  { %v504_v45 = vsel %vm406_vm0, %v500_v26, %v503_v27  ;;  %v510_v63 = vsel %vm406_vm0, %v503_v27, %v509_v47  ;;  %v392_v26 = vrot.slane %v7819_v29, 1  ;;  %v394_v27 = vrot.slane %v7838_v51, 1 }
  0x34   :  { %1020 = vmatpush1.bf16.msra.mxu0 %v7055_v20  ;;  %v324_v49 = vsel %vm172_vm1, %v319_v33, %v323_v35  ;;  %v7070_v20 = vld [vmem:[%s11199_s1 + $0xf0] ss:$8 sps:$4 sm:$0xff]   ;;  %v569_v30 = vrot.slane %v7808_v22, 2  ;;  %v570_v31 = vrot.slane %v7819_v29, 2  ;;  %v397_v35 = vrot.slane %v7860_v8, 1 }
  0x35   :  { %533 = vrot.lane.b32.xlu0 %v484_v42, %s7596_s15  ;;  %v7058_v42 = vld [vmem:[%s11199_s1 + $0xc0] ss:$8 sps:$4 sm:$0xff]   ;;  %1021 = vmatprep.subr.bf16.mxu0 %v7056_v25  ;;  %v399_v38 = vrot.slane %v7880_v34, 1  ;;  %v574_v39 = vrot.slane %v7852_v62, 2  ;;  %v404_v52 = vrot.slane %v7931_v17, 1  ;;  %v579_v53 = vrot.slane %v7895_v41, 2 }
  0x36   :  { %355 = vrot.lane.b32.xlu1 %v292_v36, %s7596_s15  ;;  %v7954_v36 = vld [vmem:[%s11199_s1 + $0x110] ss:$8 sps:$4 sm:$0xff]   ;;  %vm1689_vm5 = vcmask 1042433   ;;  %vm1690_vm6 = vsmask.f32 2304  ;;  %vm1868_vm7 = vcmask 1043458  }
  0x37   :  { %6831 = vmatpush1.bf16.msra.mxu1 %v7954_v36  ;;  %vm1869_vm8 = vsmask.f32 7946  ;;  %vm2047_vm9 = vcmask 1045508   ;;  %vm2048_vm10 = vsmask.f32 5376  ;;  %vm8321_vm11 = vmand %vm1689_vm5, %vm1690_vm6  ;;  %vm11211_vm12 = vcmask 1046533  }
  0x38   :  { %6828 = vmatprep.subr.bf16.mxu1 %v7961_v40  ;;  %1022 = vmatpush1.bf16.msra.mxu0 %v7058_v42  ;;  %v575_v42 = vrot.slane %v7860_v8, 2  ;;  %vm2227_vm13 = vsmask.f32 7958  ;;  %vm1479_vm14 = vcmask 1040384   ;;  %vm8326_vm15 = vmand %vm1868_vm7, %vm1869_vm8  ;;  %vm2634_vm5 = vsmask.f32 7938 }
  0x39   :  { %535 = vrot.lane.b32.xlu0 %v491_v6, %s7596_s15  ;;  %1023 = vmatprep.subr.bf16.mxu0 %v7059_v43  ;;  %v8001_v6 = vld [vmem:[%s11199_s1 + $0x130] ss:$8 sps:$4 sm:$0xff]   ;;  %v8055_v43 = vsel %vm365_vm2, %v397_v35, %v399_v38  ;;  %vm8332_vm1 = vmand %vm2047_vm9, %vm2048_vm10  ;;  %vm2812_vm6 = vsmask.f32 3328  ;;  %vm2990_vm8 = vcmask 1044483   ;;  %vm2405_vm10 = vcmask 1047559  }
  0x3a   :  { %357 = vrot.lane.b32.xlu1 %v304_v13, %s7596_s15  ;;  %v8009_v13 = vsel %vm365_vm2, %v387_v60, %v389_v61  ;;  %vm2991_vm9 = vsmask.f32 7950 }
  0x3b   :  { %6832 = vmatpush1.bf16.msra.mxu1 %v7977_v54 }
  0x3c   :  { %6829 = vmatprep.subr.bf16.mxu1 %v7983_v57  ;;  %1024 = vmatpush1.bf16.msra.mxu0 %v7062_v58  ;;  %v580_v58 = vrot.slane %v7905_v56, 2 }
  0x3d   :  { %537 = vrot.lane.b32.xlu0 %v497_v23, %s7596_s15  ;;  %1025 = vmatprep.subr.bf16.mxu0 %v7063_v59  ;;  %v567_v23 = vrot.slane %v7792_v11, 2  ;;  %v8039_v11 = vsel %vm365_vm2, %v392_v26, %v394_v27  ;;  %v367_v59 = vrot.slane %v7646_v1, 1  ;;  %v371_v27 = vrot.slane %v7656_v3, 1 }
  0x3e   :  { %359 = vrot.lane.b32.xlu1 %v312_v32, %s7596_s15  ;;  %v572_v32 = vrot.slane %v7838_v51, 2  ;;  %v576_v51 = vsel %vm543_vm3, %v574_v39, %v575_v42 }
  0x3f   :  { %6833 = vmatpush1.bf16.msra.mxu1 %v8001_v6  ;;  %v568_v25 = vsel %vm543_vm3, %v565_v10, %v567_v23 }
  0x40   :  { %1026 = vmatpush1.bf16.msra.mxu0 %v7065_v14  ;;  %v573_v33 = vsel %vm543_vm3, %v570_v31, %v572_v32 }
  0x41   :  { %539 = vrot.lane.b32.xlu0 %v504_v45, %s7596_s15  ;;  %1027 = vmatprep.subr.bf16.mxu0 %v7066_v15  ;;  %v577_v45 = vrot.slane %v7880_v34, 2  ;;  %v366_v34 = vrot.slane %v7641_v0, 1 }
  0x42   :  { %361 = vrot.lane.b32.xlu1 %v324_v49, %s7596_s15  ;;  %6459 = vmatmul.mubr.msk.bf16.vlgmr.msra.gmra.mrb[0].mxu1 %vm584_vm4, %v566_v16  ;;  %v402_v49 = vrot.slane %v7905_v56, 1 }
  0x43   :  { %1312 = vmatprep.mubr.bf16.mxu1 %v7597_v7  ;;  %v578_v47 = vsel %vm543_vm3, %v575_v42, %v577_v45  ;;  %v368_v9 = vsel %vm365_vm2, %v366_v34, %v367_v59  ;;  %v381_v34 = vrot.slane %v7706_v50, 1 }
  0x44   :  { %1028 = vmatpush1.bf16.msra.mxu0 %v7070_v20  ;;  %v8071_v61 = vsel %vm365_vm2, %v402_v49, %v404_v52  ;;  %v582_v20 = vrot.slane %v7931_v17, 2 }
  0x45   :  { %541 = vrot.lane.b32.xlu0 %v510_v63, %s7596_s15  ;;  %1190 = vmatprep.subr.bf16.mxu0 %v7925_v12  ;;  %v571_v12 = vsel %vm543_vm3, %v569_v30, %v570_v31  ;;  %v581_v63 = vsel %vm543_vm3, %v579_v53, %v580_v58  ;;  %v372_v30 = vrot.slane %v7667_v18, 1 }
  0x46   :  { %363 = vrot.lane.b32.xlu1 %v332_v4, %s7596_s15  ;;  %v369_v4 = vrot.slane %v7651_v2, 1  ;;  %v583_v31 = vsel %vm543_vm3, %v580_v58, %v582_v20 }
  0x47   :  { %v373_v32 = vsel %vm365_vm2, %v371_v27, %v372_v30 }
  0x48   :  { %v370_v16 = vsel %vm365_vm2, %v367_v59, %v369_v4  ;;  %v382_v59 = vrot.slane %v7713_v55, 1 }
  0x4a   :  { %6460 = vmatmul.mubr.msk.bf16.gmra.mrb[4].mxu1 %vm584_vm4, %v568_v25 }
  0x4b   :  { %1322 = vmatprep.mubr.bf16.mxu1 %v7597_v7 }
  0x52   :  { %6461 = vmatmul.mubr.msk.bf16.gmra.mrb[8].mxu1 %vm584_vm4, %v571_v12 }
  0x53   :  { %1332 = vmatprep.mubr.bf16.mxu1 %v7597_v7 }
  0x5a   :  { %6462 = vmatmul.mubr.msk.bf16.gmra.mrb[12].mxu1 %vm584_vm4, %v573_v33 }
  0x5b   :  { %1342 = vmatprep.mubr.bf16.mxu1 %v7597_v7 }
  0x62   :  { %6463 = vmatmul.mubr.msk.bf16.gmra.mrb[16].mxu1 %vm584_vm4, %v576_v51 }
  0x63   :  { %1352 = vmatprep.mubr.bf16.mxu1 %v7597_v7 }
  0x6a   :  { %6464 = vmatmul.mubr.msk.bf16.gmra.mrb[20].mxu1 %vm584_vm4, %v578_v47 }
  0x6b   :  { %1362 = vmatprep.mubr.bf16.mxu1 %v7597_v7 }
  0x72   :  { %6465 = vmatmul.mubr.msk.bf16.gmra.mrb[24].mxu1 %vm584_vm4, %v581_v63 }
  0x73   :  { %1372 = vmatprep.mubr.bf16.mxu1 %v7597_v7 }
  0x7a   :  { %6466 = vmatmul.mubr.msk.bf16.gmra.mrb[28].mxu1 %vm584_vm4, %v583_v31 }
  0x7b   :  { %v512_v10 = vpop.permute.xlu0 %511 }
  0x7c   :  { %v635_v14 = vsel %vm584_vm4, %v368_v9, %v512_v10  ;;  %v514_v15 = vpop.permute.xlu1 %513  ;;  %v384_v10 = vrot.slane %v7741_v21, 1 }
  0x7d   :  { %1029 = vmatprep.mubr.bf16.mxu0 %v635_v14  ;;  %v639_v25 = vsel %vm584_vm4, %v370_v16, %v514_v15 }
  0x7e   :  { %v385_v15 = vsel %vm365_vm2, %v382_v59, %v384_v10 }
  0x7f   :  { %v334_v23 = vpop.permute.xlu0 %333 }
  0x80   :  { %v586_v2 = vsel %vm584_vm4, %v7641_v0, %v334_v23  ;;  %v336_v12 = vpop.permute.xlu1 %335  ;;  %v386_v23 = vrot.slane %v7764_v44, 1 }
  0x81   :  { %1030 = vmatmul.mubr.bf16.vlgmr.msra.gmra.mrb[0].mxu0 %v586_v2  ;;  %v589_v0 = vsel %vm584_vm4, %v7646_v1, %v336_v12 }
  0x82   :  { %1191 = vmatpush1.bf16.msra.mxu0 %v7918_v5  ;;  %1039 = vmatprep.mubr.bf16.mxu0 %v639_v25  ;;  %v374_v5 = vrot.slane %v7679_v28, 1  ;;  %v377_v28 = vrot.slane %v7691_v37, 1  ;;  %v388_v21 = vsel %vm365_vm2, %v386_v23, %v387_v60 }
  0x83   :  { %1192 = vmatprep.subr.bf16.mxu0 %v7942_v24  ;;  %v516_v17 = vpop.permute.xlu0 %515 }
  0x84   :  { %v643_v33 = vsel %vm584_vm4, %v373_v32, %v516_v17  ;;  %v338_v24 = vpop.permute.xlu1 %337  ;;  %v375_v39 = vsel %vm365_vm2, %v372_v30, %v374_v5  ;;  %v391_v17 = vrot.slane %v7808_v22, 1 }
  0x85   :  { %v592_v1 = vsel %vm584_vm4, %v7656_v3, %v338_v24  ;;  %v379_v3 = vrot.slane %v7700_v46, 1  ;;  %v383_v46 = vsel %vm365_vm2, %v381_v34, %v382_v59  ;;  %v7587_v34 = vld [vmem:[%s11198_s0 + $0x14] sm:$0xff]  }
  0x86   :  { %1193 = vmatpush1.bf16.msra.mxu0 %v7954_v36  ;;  %v549_v59 = vrot.slane %v7587_v34, 2 }
  0x87   :  { %1194 = vmatprep.subr.bf16.mxu0 %v7961_v40  ;;  %v518_v38 = vpop.permute.xlu0 %517  ;;  %v376_v40 = vrot.slane %v7672_v19, 1  ;;  %v380_v52 = vsel %vm365_vm2, %v377_v28, %v379_v3 }
  0x88   :  { %v647_v36 = vsel %vm584_vm4, %v375_v39, %v518_v38  ;;  %v396_v38 = vrot.slane %v7852_v62, 1 }
  0x89   :  { %1040 = vmatmul.mubr.bf16.gmra.mrb[4].mxu0 %v589_v0 }
  0x8a   :  { %1049 = vmatprep.mubr.bf16.mxu0 %v643_v33  ;;  %1195 = vmatpush1.bf16.msra.mxu0 %v7977_v54  ;;  %v340_v54 = vpop.permute.xlu1 %339 }
  0x8b   :  { %1196 = vmatprep.subr.bf16.mxu0 %v7983_v57  ;;  %v520_v42 = vpop.permute.xlu0 %519  ;;  %v378_v57 = vsel %vm365_vm2, %v376_v40, %v377_v28  ;;  %v595_v51 = vsel %vm584_vm4, %v7667_v18, %v340_v54  ;;  %v401_v54 = vrot.slane %v7895_v41, 1 }
  0x8c   :  { %v651_v45 = vsel %vm584_vm4, %v378_v57, %v520_v42 }
  0x8e   :  { %1197 = vmatpush1.bf16.msra.mxu0 %v8001_v6  ;;  %v342_v6 = vpop.permute.xlu1 %341 }
  0x8f   :  { %v522_v47 = vpop.permute.xlu0 %521  ;;  %v598_v53 = vsel %vm584_vm4, %v7672_v19, %v342_v6 }
  0x90   :  { %v655_v58 = vsel %vm584_vm4, %v380_v52, %v522_v47 }
  0x91   :  { %1050 = vmatmul.mubr.bf16.gmra.mrb[8].mxu0 %v592_v1 }
  0x92   :  { %1059 = vmatprep.mubr.bf16.mxu0 %v647_v36  ;;  %v344_v18 = vpop.permute.xlu1 %343 }
  0x93   :  { %v524_v63 = vpop.permute.xlu0 %523  ;;  %v601_v4 = vsel %vm584_vm4, %v7691_v37, %v344_v18  ;;  %v7588_v18 = vld [vmem:[%s11198_s0 + $0x1c] sm:$0xff]  }
  0x94   :  { %v659_v9 = vsel %vm584_vm4, %v383_v46, %v524_v63  ;;  %v550_v63 = vrot.slane %v7588_v18, 2 }
  0x96   :  { %v346_v19 = vpop.permute.xlu1 %345  ;;  %v551_v46 = vsel %vm543_vm3, %v549_v59, %v550_v63 }
  0x97   :  { %v526_v14 = vpop.permute.xlu0 %525  ;;  %v604_v16 = vsel %vm584_vm4, %v7706_v50, %v346_v19  ;;  %v7590_v19 = vld [vmem:[%s11198_s0 + $0x28] sm:$0xff]  }
  0x98   :  { %v663_v20 = vsel %vm584_vm4, %v385_v15, %v526_v14  ;;  %v554_v14 = vrot.slane %v7590_v19, 2  ;;  %v7591_v15 = vld [vmem:[%s11198_s0 + $0x30] sm:$0xff]  }
  0x99   :  { %1060 = vmatmul.mubr.bf16.gmra.mrb[12].mxu0 %v595_v51 }
  0x9a   :  { %1069 = vmatprep.mubr.bf16.mxu0 %v651_v45  ;;  %v348_v37 = vpop.permute.xlu1 %347 }
  0x9b   :  { %v528_v25 = vpop.permute.xlu0 %527  ;;  %v607_v2 = vsel %vm584_vm4, %v7713_v55, %v348_v37  ;;  %v393_v55 = vsel %vm365_vm2, %v391_v17, %v392_v26  ;;  %v7593_v17 = vld [vmem:[%s11198_s0 + $0x3c] sm:$0xff]  }
  0x9c   :  { %v667_v27 = vsel %vm584_vm4, %v388_v21, %v528_v25 }
  0x9e   :  { %v350_v50 = vpop.permute.xlu1 %349 }
  0x9f   :  { %v530_v30 = vpop.permute.xlu0 %529  ;;  %v610_v31 = vsel %vm584_vm4, %v7764_v44, %v350_v50 }
  0xa0   :  { %v671_v12 = vsel %vm584_vm4, %v8009_v13, %v530_v30 }
  0xa1   :  { %1070 = vmatmul.mubr.bf16.gmra.mrb[16].mxu0 %v598_v53 }
  0xa2   :  { %1079 = vmatprep.mubr.bf16.mxu0 %v655_v58  ;;  %v352_v60 = vpop.permute.xlu1 %351 }
  0xa3   :  { %v532_v32 = vpop.permute.xlu0 %531  ;;  %v613_v0 = vsel %vm584_vm4, %v7770_v48, %v352_v60  ;;  %v398_v48 = vsel %vm365_vm2, %v396_v38, %v397_v35  ;;  %v559_v60 = vrot.slane %v7593_v17, 2 }
  0xa4   :  { %v675_v33 = vsel %vm584_vm4, %v393_v55, %v532_v32  ;;  %v7594_v32 = vld [vmem:[%s11198_s0 + $0x44] sm:$0xff]  }
  0xa5   :  { %v560_v55 = vrot.slane %v7594_v32, 2 }
  0xa6   :  { %v354_v44 = vpop.permute.xlu1 %353 }
  0xa7   :  { %v534_v5 = vpop.permute.xlu0 %533  ;;  %v616_v13 = vsel %vm584_vm4, %v7808_v22, %v354_v44  ;;  %v7595_v44 = vld [vmem:[%s11198_s0 + $0x4c] ss:$0 sps:$4 sm:$0x33]  }
  0xa8   :  { %v679_v24 = vsel %vm584_vm4, %v8039_v11, %v534_v5  ;;  %v562_v5 = vrot.slane %v7595_v44, 2 }
  0xa9   :  { %1080 = vmatmul.mubr.bf16.gmra.mrb[20].mxu0 %v601_v4  ;;  %v7589_v4 = vld [vmem:[%s11198_s0 + $0x24] ss:$0 sps:$4 sm:$0x33]  }
  0xaa   :  { %1089 = vmatprep.mubr.bf16.mxu0 %v659_v9  ;;  %v356_v26 = vpop.permute.xlu1 %355  ;;  %v552_v9 = vrot.slane %v7589_v4, 2 }
  0xab   :  { %v536_v39 = vpop.permute.xlu0 %535  ;;  %v619_v1 = vsel %vm584_vm4, %v7819_v29, %v356_v26  ;;  %v403_v29 = vsel %vm365_vm2, %v401_v54, %v402_v49  ;;  %vm8337_vm2 = vmand %vm11211_vm12, %vm2227_vm13 }
  0xac   :  { %v683_v36 = vsel %vm584_vm4, %v398_v48, %v536_v39  ;;  %v553_v10 = vsel %vm543_vm3, %v550_v63, %v552_v9 }
  0xae   :  { %v358_v22 = vpop.permute.xlu1 %357 }
  0xaf   :  { %v538_v40 = vpop.permute.xlu0 %537  ;;  %v622_v11 = vsel %vm584_vm4, %v7852_v62, %v358_v22 }
  0xb0   :  { %v687_v28 = vsel %vm584_vm4, %v8055_v43, %v538_v40 }
  0xb1   :  { %1090 = vmatmul.mubr.bf16.gmra.mrb[24].mxu0 %v604_v16  ;;  %v555_v16 = vrot.slane %v7591_v15, 2 }
  0xb2   :  { %1099 = vmatprep.mubr.bf16.mxu0 %v663_v20  ;;  %v360_v35 = vpop.permute.xlu1 %359 }
  0xb3   :  { %v540_v42 = vpop.permute.xlu0 %539  ;;  %v625_v57 = vsel %vm584_vm4, %v7860_v8, %v360_v35  ;;  %v7584_v8 = vld [vmem:[%s11198_s0] sm:$0xff]   ;;  %v556_v23 = vsel %vm543_vm3, %v554_v14, %v555_v16 }
  0xb4   :  { %v691_v51 = vsel %vm584_vm4, %v403_v29, %v540_v42  ;;  %v544_v47 = vrot.slane %v7584_v8, 2  ;;  %v739_v8 = vlaneseq }
  0xb6   :  { %v362_v62 = vpop.permute.xlu1 %361 }
  0xb7   :  { %v542_v45 = vpop.permute.xlu0 %541  ;;  %v628_v43 = vsel %vm584_vm4, %v7895_v41, %v362_v62  ;;  %v7585_v41 = vld [vmem:[%s11198_s0 + $0x8] sm:$0xff]  }
  0xb8   :  { %v695_v3 = vsel %vm584_vm4, %v8071_v61, %v542_v45  ;;  %v545_v52 = vrot.slane %v7585_v41, 2 }
  0xb9   :  { %1100 = vmatmul.mubr.bf16.gmra.mrb[28].mxu0 %v607_v2  ;;  %v7592_v2 = vld [vmem:[%s11198_s0 + $0x38] ss:$0 sps:$4 sm:$0x33]  }
  0xba   :  { %1109 = vmatprep.mubr.bf16.mxu0 %v667_v27  ;;  %v364_v6 = vpop.permute.xlu1 %363  ;;  %v546_v61 = vsel %vm543_vm3, %v544_v47, %v545_v52  ;;  %v557_v27 = vrot.slane %v7592_v2, 2  ;;  %v8298_v47 = vshrl.u32 %v739_v8, 7  ;;  %v7206_v2 = vld [vmem:[%s11201_s3 + $0x144] ss:$8 sps:$4 sm:$0xff]  }
  0xbb   :  { %v631_v49 = vsel %vm584_vm4, %v7905_v56, %v364_v6  ;;  %v7586_v56 = vld [vmem:[%s11198_s0 + $0x10] ss:$0 sps:$4 sm:$0x33]  }
  0xbc   :  { %v547_v53 = vrot.slane %v7586_v56, 2  ;;  %v558_v50 = vsel %vm543_vm3, %v555_v16, %v557_v27  ;;  %11389 = vst [vmem:[#allocation4_spill] sm:$0xff] %v8298_v47  ;;  %v11207_v41 = vsub.s32 0, %v8298_v47 }
  0xbe   :  { %v548_v58 = vsel %vm543_vm3, %v545_v52, %v547_v53  ;;  %v737_v52 = vld [vmem:[%s11200_s2] sm:$0x3] }
  0xbf   :  { %v8307_v56 = vrot.slane %v737_v52, %v11207_v41 }
  0xc1   :  { %1110 = vmatmul.mubr.bf16.gmra.mrb[32].mxu0 %v610_v31 }
  0xc2   :  { %1119 = vmatprep.mubr.bf16.mxu0 %v671_v12 }
  0xc9   :  { %1120 = vmatmul.mubr.bf16.gmra.mrb[36].mxu0 %v613_v0 }
  0xca   :  { %1129 = vmatprep.mubr.bf16.mxu0 %v675_v33  ;;  %v561_v33 = vsel %vm543_vm3, %v559_v60, %v560_v55  ;;  %v7222_v60 = vld [vmem:[%s11201_s3 + $0x170] ss:$8 sps:$4 sm:$0xff]  }
  0xd1   :  { %1130 = vmatmul.mubr.bf16.gmra.mrb[40].mxu0 %v616_v13  ;;  %v563_v13 = vsel %vm543_vm3, %v560_v55, %v562_v5  ;;  %vm2409_vm3 = vsmask.f32 256 }
  0xd2   :  { %1139 = vmatprep.mubr.bf16.mxu0 %v679_v24  ;;  %vm8410_vm13 = vmand %vm1479_vm14, %vm2409_vm3 }
  0xd3   :  { %vm8427_vm3 = vmand %vm1868_vm7, %vm2812_vm6  ;;  %vm11417_vm7 = vcmask 1046533   ;;  %vm3384_vm6 = vcmask 1044484  }
  0xd9   :  { %1140 = vmatmul.mubr.bf16.gmra.mrb[44].mxu0 %v619_v1 }
  0xda   :  { %1149 = vmatprep.mubr.bf16.mxu0 %v683_v36 }
  0xe1   :  { %1150 = vmatmul.mubr.bf16.gmra.mrb[48].mxu0 %v622_v11 }
  0xe2   :  { %1159 = vmatprep.mubr.bf16.mxu0 %v687_v28 }
  0xe9   :  { %1160 = vmatmul.mubr.bf16.gmra.mrb[52].mxu0 %v625_v57 }
  0xea   :  { %1169 = vmatprep.mubr.bf16.mxu0 %v691_v51 }
  0xf1   :  { %1170 = vmatmul.mubr.bf16.gmra.mrb[56].mxu0 %v628_v43 }
  0xf2   :  { %1179 = vmatprep.mubr.bf16.mxu0 %v695_v3 }
  0xf9   :  { %1180 = vmatmul.mubr.bf16.gmra.mrb[60].mxu0 %v631_v49 }
  0xfa   :  { %1222 = vmatprep.mubr.bf16.mxu0 %v7597_v7 }
 0x101   :  { %6451 = vmatmul.mubr.msk.bf16.vlgmr.msra.gmra.mrb[0].mxu0 %vm584_vm4, %v546_v61  ;;  %v11206_v61 = vsub.s32 1, %v8298_v47 }
 0x102   :  { %1232 = vmatprep.mubr.bf16.mxu0 %v7597_v7 }
 0x103   :  { %v8311_v53 = vrot.slane %v737_v52, %v11206_v61 }
 0x109   :  { %6452 = vmatmul.mubr.msk.bf16.gmra.mrb[4].mxu0 %vm584_vm4, %v548_v58 }
 0x10a   :  { %1242 = vmatprep.mubr.bf16.mxu0 %v7597_v7 }
 0x111   :  { %6453 = vmatmul.mubr.msk.bf16.gmra.mrb[8].mxu0 %vm584_vm4, %v551_v46 }
 0x112   :  { %1252 = vmatprep.mubr.bf16.mxu0 %v7597_v7 }
 0x115   :  { %v8211_v20 = vpop.f32.mrb[0].mxu1 }
 0x116   :  { %v8214_v37 = vpop.f32.mrb[1].mxu1 }
 0x117   :  { %v8216_v25 = vpop.f32.mrb[2].mxu1 }
 0x118   :  { %v8218_v21 = vpop.f32.mrb[3].mxu1 }
 0x119   :  { %6454 = vmatmul.mubr.msk.bf16.gmra.mrb[12].mxu0 %vm584_vm4, %v553_v10 }
 0x11a   :  { %1262 = vmatprep.mubr.bf16.mxu0 %v7597_v7 }
 0x11d   :  { %v8226_v30 = vpop.f32.mrb[4].mxu1 }
 0x11e   :  { %v8228_v31 = vpop.f32.mrb[5].mxu1 }
 0x11f   :  { %v8231_v12 = vpop.f32.mrb[6].mxu1 }
 0x120   :  { %v8240_v0 = vpop.f32.mrb[7].mxu1 }
 0x121   :  { %6455 = vmatmul.mubr.msk.bf16.gmra.mrb[16].mxu0 %vm584_vm4, %v556_v23 }
 0x122   :  { %1272 = vmatprep.mubr.bf16.mxu0 %v7597_v7 }
 0x125   :  { %v8250_v24 = vpop.f32.mrb[8].mxu1 }
 0x126   :  { %v8252_v38 = vpop.f32.mrb[9].mxu1 }
 0x127   :  { %v8254_v26 = vpop.f32.mrb[10].mxu1 }
 0x128   :  { %v8256_v39 = vpop.f32.mrb[11].mxu1 }
 0x129   :  { %6456 = vmatmul.mubr.msk.bf16.gmra.mrb[20].mxu0 %vm584_vm4, %v558_v50 }
 0x12a   :  { %1282 = vmatprep.mubr.bf16.mxu0 %v7597_v7 }
 0x12d   :  { %v8258_v48 = vpop.f32.mrb[12].mxu1 }
 0x131   :  { %6457 = vmatmul.mubr.msk.bf16.gmra.mrb[24].mxu0 %vm584_vm4, %v561_v33 }
 0x132   :  { %1292 = vmatprep.mubr.bf16.mxu0 %v7597_v7  ;;  %v8260_v7 = vpop.f32.mrb[13].mxu1 }
 0x133   :  { %v8262_v1 = vpop.f32.mrb[14].mxu1 }
 0x134   :  { %v8264_v36 = vpop.f32.mrb[15].mxu1 }
 0x135   :  { %v8266_v22 = vpop.f32.mrb[16].mxu1 }
 0x136   :  { %v8268_v40 = vpop.f32.mrb[17].mxu1 }
 0x137   :  { %v8270_v11 = vpop.f32.mrb[18].mxu1 }
 0x138   :  { %v8272_v28 = vpop.f32.mrb[19].mxu1 }
 0x139   :  { %6458 = vmatmul.mubr.msk.bf16.gmra.mrb[28].mxu0 %vm584_vm4, %v563_v13  ;;  %vm2633_vm4 = vcmask 1041408  }
 0x13a   :  { %vm8418_vm12 = vmand %vm2633_vm4, %vm2634_vm5 }
 0x13b   :  { %vm8437_vm4 = vmand %vm2990_vm8, %vm2991_vm9  ;;  %vm3386_vm8 = vcmask 1045509   ;;  %vm3388_vm9 = vcmask 1046534  }
 0x13c   :  { %vm8455_vm5 = vmand %vm11417_vm7, %vm406_vm0  ;;  %vm3378_vm0 = vcmask 1041409  }
 0x13d   :  { %v8274_v54 = vpop.f32.mrb[20].mxu1 }
 0x13e   :  { %v8276_v35 = vpop.f32.mrb[21].mxu1 }
 0x13f   :  { %v8278_v42 = vpop.f32.mrb[22].mxu1 }
 0x140   :  { %v8280_v29 = vpop.f32.mrb[23].mxu1 }
 0x145   :  { %v8282_v57 = vpop.f32.mrb[24].mxu1 }
 0x146   :  { %v8284_v51 = vpop.f32.mrb[25].mxu1 }
 0x147   :  { %v8286_v62 = vpop.f32.mrb[26].mxu1 }
 0x148   :  { %v8288_v45 = vpop.f32.mrb[27].mxu1 }
 0x14d   :  { %v8290_v43 = vpop.f32.mrb[28].mxu1 }
 0x14e   :  { %v8292_v3 = vpop.f32.mrb[29].mxu1 }
 0x14f   :  { %v8294_v6 = vpop.f32.mrb[30].mxu1 }
 0x150   :  { %11387 = vst [vmem:[#allocation2_spill] sm:$0xff] %v8294_v6  ;;  %v8296_v49 = vpop.f32.mrb[31].mxu1 }
 0x151   :  { %11388 = vst [vmem:[#allocation3_spill] sm:$0xff] %v8296_v49 }
 0x194   :  { %v1111_v58 = vpop.f32.mrb[32].mxu0 }
 0x195   :  { %v1112_v34 = vadd.f32 %v1111_v58, %v8307_v56  ;;  %v1113_v59 = vpop.f32.mrb[33].mxu0 }
 0x196   :  { %v1114_v18 = vadd.f32 %v1113_v59, %v8311_v53  ;;  %v1115_v63 = vpop.f32.mrb[34].mxu0 }
 0x197   :  { %v1116_v46 = vadd.f32 %v1115_v63, %v8307_v56  ;;  %v1305_v4 = vadd.f32 %v8211_v20, %v1112_v34  ;;  %v1117_v9 = vpop.f32.mrb[35].mxu0 }
 0x198   :  { %v1118_v10 = vadd.f32 %v1117_v9, %v8311_v53  ;;  %v1307_v19 = vadd.f32 %v8214_v37, %v1114_v18  ;;  %v11392_v37 = vmov 0 }
 0x199   :  { %v1309_v14 = vadd.f32 %v8216_v25, %v1116_v46  ;;  %v1415_v16 = vmax.f32 %v1305_v4, 0.0  ;;  %v11393_v37 = vsel %vm8326_vm15, 4294967295, %v11392_v37 }
 0x19a   :  { %v1311_v15 = vadd.f32 %v8218_v21, %v1118_v10  ;;  %v1416_v20 = vmax.f32 %v1307_v19, 0.0  ;;  %11394 = vst [vmem:[#allocation5_spill] sm:$0xff] %v11393_v37 }
 0x19b   :  { %v1417_v23 = vmax.f32 %v1309_v14, 0.0 }
 0x19c   :  { %v1418_v25 = vmax.f32 %v1311_v15, 0.0  ;;  %v1121_v27 = vpop.f32.mrb[36].mxu0 }
 0x19d   :  { %v8330_v50 = vpack.c.bf16 %v1417_v23, %v1415_v16  ;;  %v1123_v17 = vpop.f32.mrb[37].mxu0  ;;  %v1122_v15 = vadd.f32 %v1121_v27, %v8307_v56 }
 0x19e   :  { %v8341_v32 = vpack.c.bf16 %v1418_v25, %v1416_v20  ;;  %v1125_v55 = vpop.f32.mrb[38].mxu0  ;;  %v1124_v25 = vadd.f32 %v1123_v17, %v8311_v53 }
 0x19f   :  { %v1586_v33 = vsel %vm1479_vm14, %v8330_v50, 4286644096  ;;  %v1780_v44 = vsel %vm8321_vm11, %v8330_v50, 4286644096  ;;  %v1959_v5 = vsel %vm8326_vm15, %v8330_v50, 4286644096 }
 0x1a0   :  { %v1588_v13 = vunpack.i.l.bf16 %v1586_v33  ;;  %v1589_v8 = vunpack.i.h.bf16 %v1586_v33  ;;  %v1781_v52 = vunpack.i.l.bf16 %v1780_v44  ;;  %v1127_v58 = vpop.f32.mrb[39].mxu0  ;;  %v1782_v34 = vunpack.i.h.bf16 %v1780_v44 }
 0x1a1   :  { %v1960_v59 = vunpack.i.l.bf16 %v1959_v5  ;;  %v2138_v18 = vsel %vm8332_vm1, %v8330_v50, 4286644096  ;;  %v2317_v63 = vsel %vm8337_vm2, %v8330_v50, 4286644096  ;;  %v1961_v4 = vunpack.i.h.bf16 %v1959_v5 }
 0x1a2   :  { %v1590_v46 = vmax.f32 %v1588_v13, %v1589_v8  ;;  %v2139_v9 = vunpack.i.l.bf16 %v2138_v18  ;;  %v2140_v10 = vunpack.i.h.bf16 %v2138_v18  ;;  %v2318_v19 = vunpack.i.l.bf16 %v2317_v63 }
 0x1a3   :  { %v2319_v14 = vunpack.i.h.bf16 %v2317_v63  ;;  %v8360_v20 = vsel %vm1479_vm14, %v8341_v32, 4286644096  ;;  %v8363_v44 = vmax.f32 %v1781_v52, %v1782_v34  ;;  %v8368_v5 = vsel %vm8321_vm11, %v8341_v32, 4286644096 }
 0x1a4   :  { %v1591_v16 = vrot.slane %v1590_v46, 4  ;;  %v2141_v23 = vmax.f32 %v2139_v9, %v2140_v10  ;;  %11399 = vst [vmem:[#allocation6_spill] sm:$0xff] %v8360_v20  ;;  %v1131_v33 = vpop.f32.mrb[40].mxu0  ;;  %11401 = vst [vmem:[#allocation8_spill] sm:$0xff] %v8368_v5  ;;  %v8373_v27 = vsel %vm8326_vm15, %v8341_v32, 4286644096  ;;  %v1126_v13 = vadd.f32 %v1125_v55, %v8307_v56 }
 0x1a5   :  { %11400 = vst [vmem:[#allocation7_spill] sm:$0xff] %v8363_v44  ;;  %11402 = vst [vmem:[#allocation9_spill] sm:$0xff] %v8373_v27  ;;  %v8378_v18 = vmax.f32 %v1960_v59, %v1961_v4  ;;  %v8383_v52 = vsel %vm8332_vm1, %v8341_v32, 4286644096  ;;  %v1133_v34 = vpop.f32.mrb[41].mxu0  ;;  %v8385_v63 = vmax.f32 %v2318_v19, %v2319_v14  ;;  %v1128_v9 = vadd.f32 %v1127_v58, %v8311_v53 }
 0x1a6   :  { %v8376_v8 = vmax.f32 %v1590_v46, %v1591_v16  ;;  %v2142_v17 = vrot.slane %v2141_v23, 4  ;;  %11405 = vst [vmem:[#allocation12_spill] sm:$0xff] %v8383_v52  ;;  %v1135_v55 = vpop.f32.mrb[42].mxu0  ;;  %v8395_v4 = vsel %vm8337_vm2, %v8341_v32, 4286644096  ;;  %v1315_v16 = vadd.f32 %v8226_v30, %v1122_v15 }
 0x1a7   :  { %11404 = vst [vmem:[#allocation11_spill] sm:$0xff] %v8378_v18  ;;  %11406 = vst [vmem:[#allocation13_spill] sm:$0xff] %v8385_v63  ;;  %v1137_v19 = vpop.f32.mrb[43].mxu0  ;;  %v1317_v61 = vadd.f32 %v8228_v31, %v1124_v25  ;;  %v1319_v47 = vadd.f32 %v8231_v12, %v1126_v13  ;;  %v1321_v58 = vadd.f32 %v8240_v0, %v1128_v9 }
 0x1a8   :  { %11403 = vst [vmem:[#allocation10_spill] sm:$0xff] %v8376_v8  ;;  %11407 = vst [vmem:[#allocation14_spill] sm:$0xff] %v8395_v4  ;;  %v8403_v10 = vmax.f32 %v2141_v23, %v2142_v17  ;;  %v1419_v30 = vmax.f32 %v1315_v16, 0.0  ;;  %v1132_v31 = vadd.f32 %v1131_v33, %v8307_v56  ;;  %v1134_v12 = vadd.f32 %v1133_v34, %v8311_v53 }
 0x1a9   :  { %v1421_v25 = vmax.f32 %v1319_v47, 0.0  ;;  %v1136_v13 = vadd.f32 %v1135_v55, %v8307_v56  ;;  %v1138_v17 = vadd.f32 %v1137_v19, %v8311_v53  ;;  %v1420_v14 = vmax.f32 %v1317_v61, 0.0 }
 0x1aa   :  { %11408 = vst [vmem:[#allocation15_spill] sm:$0xff] %v8403_v10  ;;  %v1422_v47 = vmax.f32 %v1321_v58, 0.0  ;;  %v8432_v33 = vadd.f32 %v8250_v24, %v1132_v31  ;;  %v8442_v61 = vadd.f32 %v8252_v38, %v1134_v12 }
 0x1ab   :  { %v1465_v34 = vpack.c.bf16 %v1421_v25, %v1419_v30  ;;  %v8445_v19 = vadd.f32 %v8254_v26, %v1136_v13  ;;  %v8448_v58 = vadd.f32 %v8256_v39, %v1138_v17  ;;  %v2521_v30 = vsel %vm2405_vm10, %v8330_v50, 4286644096 }
 0x1ac   :  { %v1141_v16 = vpop.f32.mrb[44].mxu0  ;;  %v1466_v38 = vpack.c.bf16 %v1422_v47, %v1420_v14  ;;  %v2535_v26 = vsel %vm2405_vm10, %v8341_v32, 4286644096 }
 0x1ad   :  { %v1142_v9 = vadd.f32 %v1141_v16, %v8307_v56  ;;  %v1143_v18 = vpop.f32.mrb[45].mxu0  ;;  %v2523_v39 = vsel %vm8410_vm13, %v1465_v34, 4286644096  ;;  %v2724_v13 = vsel %vm8418_vm12, %v1465_v34, 4286644096 }
 0x1ae   :  { %v1145_v24 = vpop.f32.mrb[46].mxu0  ;;  %v2902_v50 = vsel %vm8427_vm3, %v1465_v34, 4286644096  ;;  %v2524_v16 = vmax.bf16 %v2523_v39, %v2521_v30  ;;  %v2725_v31 = vunpack.i.l.bf16 %v2724_v13  ;;  %v2726_v14 = vunpack.i.h.bf16 %v2724_v13 }
 0x1af   :  { %v8461_v12 = vpop.f32.mrb[47].mxu0  ;;  %v8470_v17 = vadd.f32 %v8258_v48, %v1142_v9  ;;  %v2903_v47 = vunpack.i.l.bf16 %v2902_v50  ;;  %v2904_v46 = vunpack.i.h.bf16 %v2902_v50  ;;  %v3081_v32 = vsel %vm8437_vm4, %v1465_v34, 4286644096 }
 0x1b0   :  { %v3258_v41 = vsel %vm8455_vm5, %v1465_v34, 4286644096  ;;  %v2537_v59 = vsel %vm8410_vm13, %v1466_v38, 4286644096  ;;  %v2525_v27 = vunpack.i.l.bf16 %v2524_v16  ;;  %v2526_v63 = vunpack.i.h.bf16 %v2524_v16 }
 0x1b1   :  { %v2727_v44 = vmax.f32 %v2725_v31, %v2726_v14  ;;  %v3082_v4 = vunpack.i.l.bf16 %v3081_v32  ;;  %v2905_v48 = vmax.f32 %v2903_v47, %v2904_v46  ;;  %v3083_v9 = vunpack.i.h.bf16 %v3081_v32 }
 0x1b2   :  { %v3259_v30 = vunpack.i.l.bf16 %v3258_v41  ;;  %v3260_v39 = vunpack.i.h.bf16 %v3258_v41  ;;  %v2527_v50 = vmax.f32 %v2525_v27, %v2526_v63  ;;  %v8480_v8 = vmax.bf16 %v2537_v59, %v2535_v26 }
 0x1b3   :  { %v2728_v5 = vrot.slane %v2727_v44, 4  ;;  %v2735_v34 = vsel %vm8418_vm12, %v1466_v38, 4286644096  ;;  %v2906_v16 = vrot.slane %v2905_v48, 4  ;;  %v3084_v31 = vmax.f32 %v3082_v4, %v3083_v9 }
 0x1b4   :  { %v8478_v13 = vpop.f32.mrb[48].mxu0  ;;  %v3261_v14 = vmax.f32 %v3259_v30, %v3260_v39  ;;  %v2528_v47 = vrot.slane %v2527_v50, 4  ;;  %v2736_v32 = vunpack.i.l.bf16 %v2735_v34  ;;  %v1423_v27 = vmax.f32 %v8432_v33, 0.0 }
 0x1b5   :  { %v8484_v52 = vpop.f32.mrb[49].mxu0  ;;  %v8489_v41 = vmax.f32 %v2727_v44, %v2728_v5  ;;  %v8494_v59 = vmax.f32 %v2905_v48, %v2906_v16  ;;  %v3085_v26 = vrot.slane %v3084_v31, 4  ;;  %v2737_v6 = vunpack.i.h.bf16 %v2735_v34 }
 0x1b6   :  { %v8487_v46 = vpop.f32.mrb[50].mxu0  ;;  %v3262_v49 = vrot.slane %v3261_v14, 4  ;;  %v2539_v20 = vunpack.i.l.bf16 %v8480_v8  ;;  %v2913_v4 = vsel %vm8427_vm3, %v1466_v38, 4286644096  ;;  %v1144_v9 = vadd.f32 %v1143_v18, %v8311_v53 }
 0x1b7   :  { %11420 = vst [vmem:[#allocation16_spill] sm:$0xff] %v8489_v41  ;;  %v8492_v63 = vpop.f32.mrb[51].mxu0  ;;  %11421 = vst [vmem:[#allocation17_spill] sm:$0xff] %v8494_v59  ;;  %v1146_v44 = vadd.f32 %v1145_v24, %v8307_v56  ;;  %v8501_v5 = vmax.f32 %v2527_v50, %v2528_v47  ;;  %v8503_v30 = vmax.f32 %v3084_v31, %v3085_v26  ;;  %v2540_v48 = vunpack.i.h.bf16 %v8480_v8 }
 0x1b8   :  { %v8505_v33 = vmax.f32 %v3261_v14, %v3262_v49  ;;  %v2914_v39 = vunpack.i.l.bf16 %v2913_v4  ;;  %v2915_v16 = vunpack.i.h.bf16 %v2913_v4  ;;  %v3092_v34 = vsel %vm8437_vm4, %v1466_v38, 4286644096 }
 0x1b9   :  { %11422 = vst [vmem:[#allocation18_spill] sm:$0xff] %v8501_v5  ;;  %11423 = vst [vmem:[#allocation19_spill] sm:$0xff] %v8503_v30  ;;  %v3269_v10 = vsel %vm8455_vm5, %v1466_v38, 4286644096  ;;  %v8514_v50 = vmax.f32 %v2736_v32, %v2737_v6  ;;  %v3093_v31 = vunpack.i.l.bf16 %v3092_v34  ;;  %v3094_v8 = vunpack.i.h.bf16 %v3092_v34  ;;  %v7089_v30 = vld [vmem:[%s11201_s3 + $0x304] ss:$8 sps:$4 sm:$0xff]  }
 0x1ba   :  { %11424 = vst [vmem:[#allocation20_spill] sm:$0xff] %v8505_v33  ;;  %v8518_v49 = vmax.f32 %v2914_v39, %v2915_v16  ;;  %v3270_v14 = vunpack.i.l.bf16 %v3269_v10  ;;  %v3271_v26 = vunpack.i.h.bf16 %v3269_v10  ;;  %v1424_v38 = vmax.f32 %v8442_v61, 0.0  ;;  %5907 = vmatprep.subr.bf16.mxu1 %v7089_v30  ;;  %v7095_v30 = vld [vmem:[%s11201_s3 + $0x314] ss:$8 sps:$4 sm:$0xff]  }
 0x1bb   :  { %11425 = vst [vmem:[#allocation21_spill] sm:$0xff] %v8514_v50  ;;  %v1425_v18 = vmax.f32 %v8445_v19, 0.0  ;;  %v1426_v24 = vmax.f32 %v8448_v58, 0.0  ;;  %v8529_v59 = vmax.f32 %v3093_v31, %v3094_v8  ;;  %v1148_v10 = vadd.f32 %v8461_v12, %v8311_v53  ;;  %v7086_v31 = vld [vmem:[%s11201_s3 + $0x4] ss:$8 sps:$4 sm:$0xff]  }
 0x1bc   :  { %v8516_v47 = vpop.f32.mrb[52].mxu0  ;;  %11426 = vst [vmem:[#allocation22_spill] sm:$0xff] %v8518_v49  ;;  %v8531_v39 = vmax.f32 %v3270_v14, %v3271_v26  ;;  %v8542_v19 = vadd.f32 %v8260_v7, %v1144_v9  ;;  %v8545_v58 = vadd.f32 %v8262_v1, %v1146_v44  ;;  %v8562_v9 = vmax.f32 %v2539_v20, %v2540_v48  ;;  %v7084_v26 = vld [vmem:[%s11201_s3] ss:$8 sps:$4 sm:$0xff]  }
 0x1bd   :  { %v8520_v4 = vpop.f32.mrb[53].mxu0  ;;  %11427 = vst [vmem:[#allocation23_spill] sm:$0xff] %v8529_v59  ;;  %v8537_v34 = vpack.c.bf16 %v1425_v18, %v1423_v27  ;;  %v8539_v61 = vpack.c.bf16 %v1426_v24, %v1424_v38  ;;  %v8551_v12 = vadd.f32 %v8264_v36, %v1148_v10  ;;  %v1152_v48 = vadd.f32 %v8478_v13, %v8307_v56  ;;  %v7087_v13 = vld [vmem:[%s11201_s3 + $0x300] ss:$8 sps:$4 sm:$0xff]  }
 0x1be   :  { %v8526_v6 = vpop.f32.mrb[54].mxu0  ;;  %11428 = vst [vmem:[#allocation24_spill] sm:$0xff] %v8531_v39  ;;  %11430 = vst [vmem:[#allocation26_spill] sm:$0xff] %v8562_v9  ;;  %v1154_v10 = vadd.f32 %v8484_v52, %v8311_v53  ;;  %5784 = vmatprep.subr.bf16.mxu0 %v7086_v31  ;;  %5908 = vmatpush1.bf16.msra.mxu1 %v7087_v13  ;;  %v1429_v13 = vmax.f32 %v8545_v58, 0.0  ;;  %v1428_v50 = vmax.f32 %v8542_v19, 0.0 }
 0x1bf   :  { %v8535_v16 = vpop.f32.mrb[55].mxu0  ;;  %v1612_v7 = vsel %vm1479_vm14, %v8537_v34, 4286644096  ;;  %v8560_v1 = vsel %vm8321_vm11, %v8537_v34, 4286644096  ;;  %5785 = vmatpush1.bf16.msra.mxu0 %v7084_v26  ;;  %v1156_v49 = vadd.f32 %v8487_v46, %v8307_v56  ;;  %v8663_v9 = vadd.f32 %v8266_v22, %v1152_v48  ;;  %5909 = vmatprep.subr.bf16.mxu1 %v7095_v30 }
 0x1c0   :  { %11429 = vst [vmem:[#allocation25_spill] sm:$0xff] %v8560_v1  ;;  %v1614_v44 = vunpack.i.l.bf16 %v1612_v7  ;;  %v1615_v24 = vunpack.i.h.bf16 %v1612_v7  ;;  %v8567_v36 = vsel %vm8326_vm15, %v8537_v34, 4286644096  ;;  %v2160_v38 = vsel %vm8332_vm1, %v8537_v34, 4286644096 }
 0x1c1   :  { %11431 = vst [vmem:[#allocation27_spill] sm:$0xff] %v8567_v36  ;;  %v8578_v20 = vsel %vm8337_vm2, %v8537_v34, 4286644096  ;;  %v2161_v5 = vunpack.i.l.bf16 %v2160_v38  ;;  %v2162_v27 = vunpack.i.h.bf16 %v2160_v38  ;;  %v8598_v52 = vsel %vm1479_vm14, %v8539_v61, 4286644096 }
 0x1c2   :  { %11432 = vst [vmem:[#allocation28_spill] sm:$0xff] %v8578_v20  ;;  %v1616_v32 = vmax.f32 %v1614_v44, %v1615_v24  ;;  %11433 = vst [vmem:[#allocation29_spill] sm:$0xff] %v8598_v52  ;;  %v8603_v44 = vsel %vm8321_vm11, %v8539_v61, 4286644096  ;;  %v8608_v24 = vsel %vm8326_vm15, %v8539_v61, 4286644096  ;;  %v1158_v19 = vadd.f32 %v8492_v63, %v8311_v53 }
 0x1c3   :  { %11434 = vst [vmem:[#allocation30_spill] sm:$0xff] %v8603_v44  ;;  %11435 = vst [vmem:[#allocation31_spill] sm:$0xff] %v8608_v24  ;;  %v8612_v14 = vmax.f32 %v2161_v5, %v2162_v27  ;;  %v7092_v5 = vld [vmem:[%s11201_s3 + $0x14] ss:$8 sps:$4 sm:$0xff]   ;;  %v8633_v33 = vsel %vm8332_vm1, %v8539_v61, 4286644096 }
 0x1c4   :  { %v8584_v7 = vpop.f32.mrb[56].mxu0  ;;  %v1617_v38 = vrot.slane %v1616_v32, 4  ;;  %11436 = vst [vmem:[#allocation32_spill] sm:$0xff] %v8633_v33  ;;  %v8638_v59 = vsel %vm8337_vm2, %v8539_v61, 4286644096  ;;  %5786 = vmatprep.subr.bf16.mxu0 %v7092_v5  ;;  %v1430_v5 = vmax.f32 %v8551_v12, 0.0  ;;  %v8674_v12 = vadd.f32 %v8268_v40, %v1154_v10 }
 0x1c5   :  { %v8587_v8 = vpop.f32.mrb[57].mxu0  ;;  %v2164_v31 = vrot.slane %v8612_v14, 4  ;;  %11437 = vst [vmem:[#allocation33_spill] sm:$0xff] %v8638_v59  ;;  %v7090_v27 = vld [vmem:[%s11201_s3 + $0x10] ss:$8 sps:$4 sm:$0xff]  }
 0x1c6   :  { %v8614_v39 = vpop.f32.mrb[58].mxu0  ;;  %v8640_v26 = vmax.f32 %v1616_v32, %v1617_v38  ;;  %v7093_v36 = vld [vmem:[%s11201_s3 + $0x310] ss:$8 sps:$4 sm:$0xff]   ;;  %5787 = vmatpush1.bf16.msra.mxu0 %v7090_v27  ;;  %v11439_v32 = vmax.f32 %v8470_v17, 0.0  ;;  %v2549_v58 = vsel %vm2405_vm10, %v8537_v34, 4286644096  ;;  %v1470_v48 = vpack.c.bf16 %v1430_v5, %v1428_v50 }
 0x1c7   :  { %v8623_v18 = vpop.f32.mrb[59].mxu0  ;;  %v2563_v27 = vsel %vm2405_vm10, %v8539_v61, 4286644096  ;;  %v8682_v17 = vadd.f32 %v8270_v11, %v1156_v49  ;;  %5910 = vmatpush1.bf16.msra.mxu1 %v7093_v36  ;;  %v8693_v50 = vadd.f32 %v8272_v28, %v1158_v19  ;;  %v8712_v33 = vmax.f32 %v8612_v14, %v2164_v31 }
 0x1c8   :  { %11438 = vst [vmem:[#allocation34_spill] sm:$0xff] %v8640_v26  ;;  %v1469_v38 = vpack.c.bf16 %v1429_v13, %v11439_v32  ;;  %v2565_v41 = vsel %vm8410_vm13, %v1470_v48, 4286644096  ;;  %v2757_v26 = vsel %vm8418_vm12, %v1470_v48, 4286644096 }
 0x1c9   :  { %v8705_v44 = vmax.bf16 %v2565_v41, %v2563_v27  ;;  %11442 = vst [vmem:[#allocation37_spill] sm:$0xff] %v8712_v33  ;;  %v1162_v41 = vadd.f32 %v8516_v47, %v8307_v56  ;;  %v3114_v47 = vsel %vm8437_vm4, %v1470_v48, 4286644096 }
 0x1ca   :  { %v2551_v63 = vsel %vm8410_vm13, %v1469_v38, 4286644096  ;;  %v2746_v40 = vsel %vm8418_vm12, %v1469_v38, 4286644096  ;;  %v2924_v34 = vsel %vm8427_vm3, %v1469_v38, 4286644096 }
 0x1cb   :  { %v2552_v10 = vmax.bf16 %v2551_v63, %v2549_v58  ;;  %v2747_v61 = vunpack.i.l.bf16 %v2746_v40  ;;  %v2748_v32 = vunpack.i.h.bf16 %v2746_v40  ;;  %v2925_v11 = vunpack.i.l.bf16 %v2924_v34  ;;  %11441 = vst [vmem:[#allocation36_spill] sm:$0xff] %v8705_v44 }
 0x1cc   :  { %v8665_v24 = vpop.f32.mrb[60].mxu0  ;;  %v2926_v13 = vunpack.i.h.bf16 %v2924_v34  ;;  %v3103_v36 = vsel %vm8437_vm4, %v1469_v38, 4286644096  ;;  %v3280_v5 = vsel %vm8455_vm5, %v1469_v38, 4286644096 }
 0x1cd   :  { %v8676_v46 = vpop.f32.mrb[61].mxu0  ;;  %v2553_v22 = vunpack.i.l.bf16 %v2552_v10  ;;  %v2554_v20 = vunpack.i.h.bf16 %v2552_v10  ;;  %v2749_v28 = vmax.f32 %v2747_v61, %v2748_v32  ;;  %v3104_v19 = vunpack.i.l.bf16 %v3103_v36 }
 0x1ce   :  { %v8684_v30 = vpop.f32.mrb[62].mxu0  ;;  %v2927_v58 = vmax.f32 %v2925_v11, %v2926_v13  ;;  %v3105_v63 = vunpack.i.h.bf16 %v3103_v36  ;;  %v3281_v40 = vunpack.i.l.bf16 %v3280_v5  ;;  %v3282_v1 = vunpack.i.h.bf16 %v3280_v5 }
 0x1cf   :  { %v8695_v49 = vpop.f32.mrb[63].mxu0  ;;  %v8703_v59 = vmax.f32 %v2553_v22, %v2554_v20  ;;  %v2750_v34 = vrot.slane %v2749_v28, 4  ;;  %v1431_v20 = vmax.f32 %v8663_v9, 0.0  ;;  %v1164_v22 = vadd.f32 %v8520_v4, %v8311_v53 }
 0x1d0   :  { %v2928_v10 = vrot.slane %v2927_v58, 4  ;;  %v3106_v61 = vmax.f32 %v3104_v19, %v3105_v63  ;;  %v3283_v32 = vmax.f32 %v3281_v40, %v3282_v1  ;;  %v2758_v5 = vunpack.i.l.bf16 %v2757_v26 }
 0x1d1   :  { %11440 = vst [vmem:[#allocation35_spill] sm:$0xff] %v8703_v59  ;;  %v8724_v36 = vmax.f32 %v2749_v28, %v2750_v34  ;;  %v2935_v9 = vsel %vm8427_vm3, %v1470_v48, 4286644096  ;;  %v2759_v40 = vunpack.i.h.bf16 %v2757_v26  ;;  %v3291_v28 = vsel %vm8455_vm5, %v1470_v48, 4286644096 }
 0x1d2   :  { %v3107_v14 = vrot.slane %v3106_v61, 4  ;;  %v3284_v31 = vrot.slane %v3283_v32, 4  ;;  %v8728_v19 = vmax.f32 %v2927_v58, %v2928_v10  ;;  %v1166_v34 = vadd.f32 %v8526_v6, %v8307_v56 }
 0x1d3   :  { %11443 = vst [vmem:[#allocation38_spill] sm:$0xff] %v8724_v36  ;;  %v2936_v58 = vunpack.i.l.bf16 %v2935_v9  ;;  %v2937_v10 = vunpack.i.h.bf16 %v2935_v9  ;;  %v3115_v63 = vunpack.i.l.bf16 %v3114_v47  ;;  %v1432_v36 = vmax.f32 %v8674_v12, 0.0  ;;  %v7101_v12 = vld [vmem:[%s11201_s3 + $0x324] ss:$8 sps:$4 sm:$0xff]   ;;  %v7099_v9 = vld [vmem:[%s11201_s3 + $0x320] ss:$8 sps:$4 sm:$0xff]  }
 0x1d4   :  { %v8709_v38 = vpop.f32.mrb[0].mxu0  ;;  %11444 = vst [vmem:[#allocation39_spill] sm:$0xff] %v8728_v19  ;;  %v8735_v4 = vmax.f32 %v3106_v61, %v3107_v14  ;;  %v8741_v13 = vmax.f32 %v3283_v32, %v3284_v31  ;;  %v3116_v19 = vunpack.i.h.bf16 %v3114_v47  ;;  %v1433_v59 = vmax.f32 %v8682_v17, 0.0  ;;  %v7098_v32 = vld [vmem:[%s11201_s3 + $0x24] ss:$8 sps:$4 sm:$0xff]   ;;  %5911 = vmatprep.subr.bf16.mxu1 %v7101_v12 }
 0x1d5   :  { %v8714_v11 = vpop.f32.mrb[1].mxu0  ;;  %v1434_v61 = vmax.f32 %v8693_v50, 0.0  ;;  %v3292_v14 = vunpack.i.l.bf16 %v3291_v28  ;;  %v3293_v26 = vunpack.i.h.bf16 %v3291_v28  ;;  %v1168_v48 = vadd.f32 %v8535_v16, %v8311_v53  ;;  %v7096_v16 = vld [vmem:[%s11201_s3 + $0x20] ss:$8 sps:$4 sm:$0xff]   ;;  %5788 = vmatprep.subr.bf16.mxu0 %v7098_v32  ;;  %5912 = vmatpush1.bf16.msra.mxu1 %v7099_v9 }
 0x1d6   :  { %v8722_v27 = vpop.f32.mrb[2].mxu0  ;;  %11445 = vst [vmem:[#allocation40_spill] sm:$0xff] %v8735_v4  ;;  %11446 = vst [vmem:[#allocation41_spill] sm:$0xff] %v8741_v13  ;;  %v1355_v4 = vadd.f32 %v8274_v54, %v1162_v41  ;;  %v8757_v17 = vmax.f32 %v2758_v5, %v2759_v40  ;;  %v1471_v50 = vpack.c.bf16 %v1433_v59, %v1431_v20  ;;  %5789 = vmatpush1.bf16.msra.mxu0 %v7096_v16 }
 0x1d7   :  { %v8726_v1 = vpop.f32.mrb[3].mxu0  ;;  %v8759_v31 = vpack.c.bf16 %v1434_v61, %v1432_v36  ;;  %v1357_v54 = vadd.f32 %v8276_v35, %v1164_v22  ;;  %v8771_v28 = vmax.f32 %v2936_v58, %v2937_v10  ;;  %v1359_v59 = vadd.f32 %v8278_v42, %v1166_v34 }
 0x1d8   :  { %11447 = vst [vmem:[#allocation42_spill] sm:$0xff] %v8757_v17  ;;  %v1361_v20 = vadd.f32 %v8280_v29, %v1168_v48  ;;  %v8777_v35 = vmax.f32 %v3115_v63, %v3116_v19  ;;  %v1638_v22 = vsel %vm1479_vm14, %v1471_v50, 4286644096  ;;  %v8782_v5 = vsel %vm8321_vm11, %v1471_v50, 4286644096 }
 0x1d9   :  { %11448 = vst [vmem:[#allocation43_spill] sm:$0xff] %v8759_v31  ;;  %11449 = vst [vmem:[#allocation44_spill] sm:$0xff] %v8771_v28  ;;  %v8786_v40 = vsel %vm8326_vm15, %v1471_v50, 4286644096  ;;  %v8788_v42 = vmax.f32 %v3292_v14, %v3293_v26  ;;  %v1640_v29 = vunpack.i.l.bf16 %v1638_v22  ;;  %v1641_v34 = vunpack.i.h.bf16 %v1638_v22  ;;  %v7104_v26 = vld [vmem:[%s11201_s3 + $0x34] ss:$8 sps:$4 sm:$0xff]  }
 0x1da   :  { %11450 = vst [vmem:[#allocation45_spill] sm:$0xff] %v8777_v35  ;;  %11451 = vst [vmem:[#allocation46_spill] sm:$0xff] %v8782_v5  ;;  %v1435_v58 = vmax.f32 %v1355_v4, 0.0  ;;  %v2182_v63 = vsel %vm8332_vm1, %v1471_v50, 4286644096  ;;  %v1172_v61 = vadd.f32 %v8584_v7, %v8307_v56  ;;  %v1174_v48 = vadd.f32 %v8587_v8, %v8311_v53  ;;  %5790 = vmatprep.subr.bf16.mxu0 %v7104_v26 }
 0x1db   :  { %11452 = vst [vmem:[#allocation47_spill] sm:$0xff] %v8786_v40  ;;  %11453 = vst [vmem:[#allocation48_spill] sm:$0xff] %v8788_v42  ;;  %v8804_v4 = vsel %vm8337_vm2, %v1471_v50, 4286644096  ;;  %v8806_v12 = vmax.f32 %v1640_v29, %v1641_v34  ;;  %v1436_v16 = vmax.f32 %v1357_v54, 0.0  ;;  %v1437_v9 = vmax.f32 %v1359_v59, 0.0 }
 0x1dc   :  { %v8749_v6 = vpop.f32.mrb[4].mxu0  ;;  %11454 = vst [vmem:[#allocation49_spill] sm:$0xff] %v8804_v4  ;;  %v2577_v22 = vsel %vm2405_vm10, %v1471_v50, 4286644096  ;;  %v2183_v7 = vunpack.i.l.bf16 %v2182_v63  ;;  %v1438_v47 = vmax.f32 %v1361_v20, 0.0  ;;  %v1176_v14 = vadd.f32 %v8614_v39, %v8307_v56 }
 0x1dd   :  { %v8762_v41 = vpop.f32.mrb[5].mxu0  ;;  %11455 = vst [vmem:[#allocation50_spill] sm:$0xff] %v8806_v12  ;;  %v2591_v8 = vsel %vm2405_vm10, %v8759_v31, 4286644096  ;;  %v1473_v29 = vpack.c.bf16 %v1437_v9, %v1435_v58  ;;  %v8819_v54 = vadd.f32 %v8282_v57, %v1172_v61  ;;  %v1178_v50 = vadd.f32 %v8623_v18, %v8311_v53  ;;  %v7102_v39 = vld [vmem:[%s11201_s3 + $0x30] ss:$8 sps:$4 sm:$0xff]  }
 0x1de   :  { %v8775_v36 = vpop.f32.mrb[6].mxu0  ;;  %v8824_v59 = vadd.f32 %v8284_v51, %v1174_v48  ;;  %v7105_v34 = vld [vmem:[%s11201_s3 + $0x330] ss:$8 sps:$4 sm:$0xff]   ;;  %v2184_v58 = vunpack.i.h.bf16 %v2182_v63  ;;  %v1474_v61 = vpack.c.bf16 %v1438_v47, %v1436_v16  ;;  %v8836_v9 = vadd.f32 %v8286_v62, %v1176_v14  ;;  %v7107_v51 = vld [vmem:[%s11201_s3 + $0x334] ss:$8 sps:$4 sm:$0xff]   ;;  %5791 = vmatpush1.bf16.msra.mxu0 %v7102_v39 }
 0x1df   :  { %v8790_v10 = vpop.f32.mrb[7].mxu0  ;;  %v2579_v48 = vsel %vm8410_vm13, %v1473_v29, 4286644096  ;;  %v2768_v32 = vsel %vm8418_vm12, %v1473_v29, 4286644096  ;;  %v8850_v47 = vadd.f32 %v8288_v45, %v1178_v50  ;;  %5913 = vmatprep.subr.bf16.mxu1 %v7107_v51 }
 0x1e0   :  { %v2946_v63 = vsel %vm8427_vm3, %v1473_v29, 4286644096  ;;  %v2580_v62 = vmax.bf16 %v2579_v48, %v2577_v22  ;;  %v2769_v14 = vunpack.i.l.bf16 %v2768_v32  ;;  %v2770_v26 = vunpack.i.h.bf16 %v2768_v32  ;;  %5914 = vmatpush1.bf16.msra.mxu1 %v7105_v34 }
 0x1e1   :  { %v2947_v16 = vunpack.i.l.bf16 %v2946_v63  ;;  %v2948_v13 = vunpack.i.h.bf16 %v2946_v63  ;;  %v3125_v42 = vsel %vm8437_vm4, %v1473_v29, 4286644096  ;;  %v3302_v35 = vsel %vm8455_vm5, %v1473_v29, 4286644096 }
 0x1e2   :  { %v2593_v28 = vsel %vm8410_vm13, %v1474_v61, 4286644096  ;;  %v2581_v45 = vunpack.i.l.bf16 %v2580_v62  ;;  %v2582_v50 = vunpack.i.h.bf16 %v2580_v62  ;;  %v8860_v22 = vmax.f32 %v2769_v14, %v2770_v26  ;;  %v7111_v62 = vld [vmem:[%s11201_s3 + $0x340] ss:$8 sps:$4 sm:$0xff]  }
 0x1e3   :  { %v3126_v32 = vunpack.i.l.bf16 %v3125_v42  ;;  %v8862_v39 = vmax.f32 %v2947_v16, %v2948_v13  ;;  %v3127_v48 = vunpack.i.h.bf16 %v3125_v42  ;;  %v3303_v51 = vunpack.i.l.bf16 %v3302_v35 }
 0x1e4   :  { %v8813_v19 = vpop.f32.mrb[8].mxu0  ;;  %11456 = vst [vmem:[#allocation51_spill] sm:$0xff] %v8860_v22  ;;  %v3304_v63 = vunpack.i.h.bf16 %v3302_v35  ;;  %v8864_v17 = vmax.f32 %v2183_v7, %v2184_v58  ;;  %v8867_v44 = vmax.bf16 %v2593_v28, %v2591_v8  ;;  %v8871_v29 = vsel %vm8418_vm12, %v1474_v61, 4286644096 }
 0x1e5   :  { %v8826_v20 = vpop.f32.mrb[9].mxu0  ;;  %11457 = vst [vmem:[#allocation52_spill] sm:$0xff] %v8862_v39  ;;  %11460 = vst [vmem:[#allocation55_spill] sm:$0xff] %v8871_v29  ;;  %v8877_v14 = vmax.f32 %v3126_v32, %v3127_v48  ;;  %v8883_v7 = vmax.f32 %v2581_v45, %v2582_v50  ;;  %v8887_v28 = vsel %vm8427_vm3, %v1474_v61, 4286644096  ;;  %v1182_v8 = vadd.f32 %v8665_v24, %v8307_v56 }
 0x1e6   :  { %v8838_v18 = vpop.f32.mrb[10].mxu0  ;;  %11458 = vst [vmem:[#allocation53_spill] sm:$0xff] %v8864_v17  ;;  %11459 = vst [vmem:[#allocation54_spill] sm:$0xff] %v8867_v44  ;;  %v8879_v42 = vmax.f32 %v3303_v51, %v3304_v63  ;;  %v1184_v58 = vadd.f32 %v8676_v46, %v8311_v53  ;;  %v8904_v24 = vsel %vm8437_vm4, %v1474_v61, 4286644096  ;;  %v1439_v63 = vmax.f32 %v8819_v54, 0.0 }
 0x1e7   :  { %v8852_v57 = vpop.f32.mrb[11].mxu0  ;;  %11461 = vst [vmem:[#allocation56_spill] sm:$0xff] %v8877_v14  ;;  %11463 = vst [vmem:[#allocation58_spill] sm:$0xff] %v8883_v7  ;;  %v8908_v46 = vsel %vm8455_vm5, %v1474_v61, 4286644096  ;;  %v1440_v45 = vmax.f32 %v8824_v59, 0.0  ;;  %v1186_v16 = vadd.f32 %v8684_v30, %v8307_v56  ;;  %v1375_v13 = vadd.f32 %v8290_v43, %v1182_v8 }
 0x1e8   :  { %11462 = vst [vmem:[#allocation57_spill] sm:$0xff] %v8879_v42  ;;  %11464 = vst [vmem:[#allocation59_spill] sm:$0xff] %v8887_v28  ;;  %v7110_v51 = vld [vmem:[%s11201_s3 + $0x44] ss:$8 sps:$4 sm:$0xff]   ;;  %v1441_v61 = vmax.f32 %v8836_v9, 0.0  ;;  %v1442_v54 = vmax.f32 %v8850_v47, 0.0  ;;  %v1188_v48 = vadd.f32 %v8695_v49, %v8311_v53  ;;  %v1377_v9 = vadd.f32 %v8292_v3, %v1184_v58 }
 0x1e9   :  { %11465 = vst [vmem:[#allocation60_spill] sm:$0xff] %v8904_v24  ;;  %11466 = vst [vmem:[#allocation61_spill] sm:$0xff] %v8908_v46  ;;  %v7113_v32 = vld [vmem:[%s11201_s3 + $0x344] ss:$8 sps:$4 sm:$0xff]   ;;  %v7108_v59 = vld [vmem:[%s11201_s3 + $0x40] ss:$8 sps:$4 sm:$0xff]   ;;  %v6834_v47 = vadd.f32 %v8709_v38, %v8307_v56  ;;  %v8939_v30 = vadd.f32 %v8714_v11, %v8311_v53  ;;  %5792 = vmatprep.subr.bf16.mxu0 %v7110_v51 }
 0x1ea   :  { %v1475_v8 = vpack.c.bf16 %v1441_v61, %v1439_v63  ;;  %v8942_v40 = vpack.c.bf16 %v1442_v54, %v1440_v45  ;;  %v11468_v42 = vld [vmem:[#allocation2_spill] sm:$0xff]  ;;  %5915 = vmatprep.subr.bf16.mxu1 %v7113_v32  ;;  %5793 = vmatpush1.bf16.msra.mxu0 %v7108_v59  ;;  %v1443_v3 = vmax.f32 %v1375_v13, 0.0  ;;  %v1444_v49 = vmax.f32 %v1377_v9, 0.0  ;;  %v11469_v58 = vld [vmem:[#allocation3_spill] sm:$0xff]  ;;  %v7116_v9 = vld [vmem:[%s11201_s3 + $0x54] ss:$8 sps:$4 sm:$0xff]  }
 0x1eb   :  { %v1379_v14 = vadd.f32 %v11468_v42, %v1186_v16  ;;  %v1381_v38 = vadd.f32 %v11469_v58, %v1188_v48  ;;  %v1383_v28 = vmax.f32 %v6834_v47, 0.0  ;;  %5916 = vmatpush1.bf16.msra.mxu1 %v7111_v62  ;;  %v6836_v16 = vadd.f32 %v8722_v27, %v8307_v56  ;;  %v7114_v43 = vld [vmem:[%s11201_s3 + $0x50] ss:$8 sps:$4 sm:$0xff]   ;;  %5794 = vmatprep.subr.bf16.mxu0 %v7116_v9 }
 0x1ec   :  { %v8873_v34 = vpop.f32.mrb[12].mxu0  ;;  %11467 = vst [vmem:[#allocation62_spill] sm:$0xff] %v8942_v40  ;;  %v8951_v11 = vsel %vm1479_vm14, %v1475_v8, 4286644096  ;;  %v8955_v45 = vsel %vm8321_vm11, %v1475_v8, 4286644096  ;;  %v6837_v63 = vadd.f32 %v8726_v1, %v8311_v53 }
 0x1ed   :  { %v8881_v35 = vpop.f32.mrb[13].mxu0  ;;  %11470 = vst [vmem:[#allocation2_spill] sm:$0xff] %v8951_v11  ;;  %11471 = vst [vmem:[#allocation3_spill] sm:$0xff] %v8955_v45  ;;  %v8964_v48 = vsel %vm8326_vm15, %v1475_v8, 4286644096  ;;  %v1445_v54 = vmax.f32 %v1379_v14, 0.0  ;;  %v9004_v14 = vadd.f32 %v8749_v6, %v8307_v56 }
 0x1ee   :  { %v8893_v26 = vpop.f32.mrb[14].mxu0  ;;  %11472 = vst [vmem:[#allocation63_spill] sm:$0xff] %v8964_v48  ;;  %v8968_v62 = vsel %vm8332_vm1, %v1475_v8, 4286644096  ;;  %v8976_v27 = vsel %vm8337_vm2, %v1475_v8, 4286644096  ;;  %5795 = vmatpush1.bf16.msra.mxu0 %v7114_v43 }
 0x1ef   :  { %v8899_v50 = vpop.f32.mrb[15].mxu0  ;;  %11473 = vst [vmem:[#allocation64_spill] sm:$0xff] %v8968_v62  ;;  %11474 = vst [vmem:[#allocation65_spill] sm:$0xff] %v8976_v27  ;;  %v2605_v47 = vsel %vm2405_vm10, %v1475_v8, 4286644096  ;;  %v1446_v58 = vmax.f32 %v1381_v38, 0.0  ;;  %v1477_v42 = vpack.c.bf16 %v1445_v54, %v1443_v3 }
 0x1f0   :  { %v1385_v32 = vmax.f32 %v6836_v16, 0.0  ;;  %v7117_v8 = vld [vmem:[%s11201_s3 + $0x350] ss:$8 sps:$4 sm:$0xff]   ;;  %v7119_v1 = vld [vmem:[%s11201_s3 + $0x354] ss:$8 sps:$4 sm:$0xff]   ;;  %v1387_v52 = vmax.f32 %v9004_v14, 0.0 }
 0x1f1   :  { %v1478_v38 = vpack.c.bf16 %v1446_v58, %v1444_v49  ;;  %v2619_v16 = vsel %vm2405_vm10, %v8942_v40, 4286644096  ;;  %v2607_v3 = vsel %vm8410_vm13, %v1477_v42, 4286644096  ;;  %v2790_v54 = vsel %vm8418_vm12, %v1477_v42, 4286644096  ;;  %5917 = vmatprep.subr.bf16.mxu1 %v7119_v1 }
 0x1f2   :  { %v9000_v46 = vpack.c.bf16 %v1385_v32, %v1383_v28  ;;  %v2968_v9 = vsel %vm8427_vm3, %v1477_v42, 4286644096  ;;  %v9014_v49 = vadd.f32 %v8762_v41, %v8311_v53  ;;  %v9016_v28 = vmax.bf16 %v2607_v3, %v2605_v47  ;;  %5918 = vmatpush1.bf16.msra.mxu1 %v7117_v8 }
 0x1f3   :  { %v2791_v32 = vunpack.i.l.bf16 %v2790_v54  ;;  %v2792_v6 = vunpack.i.h.bf16 %v2790_v54  ;;  %v1386_v58 = vmax.f32 %v6837_v63, 0.0  ;;  %v2969_v61 = vunpack.i.l.bf16 %v2968_v9 }
 0x1f4   :  { %v8945_v39 = vpop.f32.mrb[16].mxu0  ;;  %11475 = vst [vmem:[#allocation66_spill] sm:$0xff] %v9016_v28  ;;  %v2970_v13 = vunpack.i.h.bf16 %v2968_v9  ;;  %v3147_v24 = vsel %vm8437_vm4, %v1477_v42, 4286644096  ;;  %v3324_v29 = vsel %vm8455_vm5, %v1477_v42, 4286644096  ;;  %v9028_v47 = vadd.f32 %v8775_v36, %v8307_v56 }
 0x1f5   :  { %v8948_v22 = vpop.f32.mrb[17].mxu0  ;;  %v3148_v7 = vunpack.i.l.bf16 %v3147_v24  ;;  %v2621_v41 = vsel %vm8410_vm13, %v1478_v38, 4286644096  ;;  %v9032_v63 = vadd.f32 %v8790_v10, %v8311_v53  ;;  %v3149_v1 = vunpack.i.h.bf16 %v3147_v24 }
 0x1f6   :  { %v8970_v51 = vpop.f32.mrb[18].mxu0  ;;  %v3325_v3 = vunpack.i.l.bf16 %v3324_v29  ;;  %v3326_v54 = vunpack.i.h.bf16 %v3324_v29  ;;  %v9038_v42 = vadd.f32 %v8813_v19, %v8307_v56  ;;  %v9046_v44 = vsel %vm8418_vm12, %v1478_v38, 4286644096 }
 0x1f7   :  { %v8978_v59 = vpop.f32.mrb[19].mxu0  ;;  %11476 = vst [vmem:[#allocation67_spill] sm:$0xff] %v9046_v44  ;;  %v9050_v10 = vsel %vm8427_vm3, %v1478_v38, 4286644096  ;;  %v9052_v24 = vmax.f32 %v2791_v32, %v2792_v6  ;;  %v9054_v29 = vmax.f32 %v2969_v61, %v2970_v13  ;;  %v9056_v19 = vmax.bf16 %v2621_v41, %v2619_v16 }
 0x1f8   :  { %11477 = vst [vmem:[#allocation68_spill] sm:$0xff] %v9050_v10  ;;  %v9060_v27 = vsel %vm8437_vm4, %v1478_v38, 4286644096  ;;  %v9064_v36 = vmax.f32 %v3148_v7, %v3149_v1  ;;  %v9066_v28 = vmax.f32 %v3325_v3, %v3326_v54  ;;  %v1482_v13 = vsel %vm1479_vm14, %v9000_v46, 4286644096 }
 0x1f9   :  { %11478 = vst [vmem:[#allocation69_spill] sm:$0xff] %v9052_v24  ;;  %11479 = vst [vmem:[#allocation70_spill] sm:$0xff] %v9054_v29  ;;  %v1692_v61 = vsel %vm8321_vm11, %v9000_v46, 4286644096  ;;  %v11484_v16 = vmax.f32 %v8939_v30, 0.0  ;;  %v1484_v1 = vunpack.i.l.bf16 %v1482_v13  ;;  %v1485_v3 = vunpack.i.h.bf16 %v1482_v13 }
 0x1fa   :  { %11480 = vst [vmem:[#allocation71_spill] sm:$0xff] %v9056_v19  ;;  %11481 = vst [vmem:[#allocation72_spill] sm:$0xff] %v9060_v27  ;;  %v9083_v41 = vsel %vm8455_vm5, %v1478_v38, 4286644096  ;;  %v1693_v54 = vunpack.i.l.bf16 %v1692_v61  ;;  %v1694_v32 = vunpack.i.h.bf16 %v1692_v61  ;;  %v1871_v4 = vsel %vm8326_vm15, %v9000_v46, 4286644096 }
 0x1fb   :  { %11482 = vst [vmem:[#allocation73_spill] sm:$0xff] %v9064_v36  ;;  %11483 = vst [vmem:[#allocation74_spill] sm:$0xff] %v9066_v28  ;;  %v9078_v6 = vpack.c.bf16 %v1386_v58, %v11484_v16  ;;  %v2050_v30 = vsel %vm8332_vm1, %v9000_v46, 4286644096  ;;  %v7122_v58 = vld [vmem:[%s11201_s3 + $0x64] ss:$8 sps:$4 sm:$0xff]   ;;  %v1486_v16 = vmax.f32 %v1484_v1, %v1485_v3  ;;  %v1872_v7 = vunpack.i.l.bf16 %v1871_v4 }
 0x1fc   :  { %v9018_v43 = vpop.f32.mrb[20].mxu0  ;;  %11485 = vst [vmem:[#allocation75_spill] sm:$0xff] %v9083_v41  ;;  %v1873_v38 = vunpack.i.h.bf16 %v1871_v4  ;;  %v2051_v45 = vunpack.i.l.bf16 %v2050_v30  ;;  %v7120_v13 = vld [vmem:[%s11201_s3 + $0x60] ss:$8 sps:$4 sm:$0xff]   ;;  %v7125_v28 = vld [vmem:[%s11201_s3 + $0x364] ss:$8 sps:$4 sm:$0xff]   ;;  %v1695_v36 = vmax.f32 %v1693_v54, %v1694_v32  ;;  %v2052_v29 = vunpack.i.h.bf16 %v2050_v30  ;;  %5796 = vmatprep.subr.bf16.mxu0 %v7122_v58 }
 0x1fd   :  { %v9034_v8 = vpop.f32.mrb[21].mxu0  ;;  %v7123_v61 = vld [vmem:[%s11201_s3 + $0x360] ss:$8 sps:$4 sm:$0xff]   ;;  %v2229_v1 = vsel %vm8337_vm2, %v9000_v46, 4286644096  ;;  %v1487_v3 = vrot.slane %v1486_v16, 4  ;;  %5919 = vmatprep.subr.bf16.mxu1 %v7125_v28  ;;  %5797 = vmatpush1.bf16.msra.mxu0 %v7120_v13 }
 0x1fe   :  { %v9040_v9 = vpop.f32.mrb[22].mxu0  ;;  %v1495_v4 = vsel %vm1479_vm14, %v9078_v6, 4286644096  ;;  %v1874_v10 = vmax.f32 %v1872_v7, %v1873_v38  ;;  %v2230_v24 = vunpack.i.l.bf16 %v2229_v1  ;;  %v2231_v44 = vunpack.i.h.bf16 %v2229_v1  ;;  %5920 = vmatpush1.bf16.msra.mxu1 %v7123_v61 }
 0x1ff   :  { %v9062_v48 = vpop.f32.mrb[23].mxu0  ;;  %v1696_v19 = vrot.slane %v1695_v36, 4  ;;  %v2053_v5 = vmax.f32 %v2051_v45, %v2052_v29  ;;  %v1497_v62 = vunpack.i.l.bf16 %v1495_v4  ;;  %v1498_v17 = vunpack.i.h.bf16 %v1495_v4 }
 0x200   :  { %v1488_v54 = vmax.f32 %v1486_v16, %v1487_v3  ;;  %v1875_v30 = vrot.slane %v1874_v10, 4  ;;  %v2232_v33 = vmax.f32 %v2230_v24, %v2231_v44  ;;  %v1703_v58 = vsel %vm8321_vm11, %v9078_v6, 4286644096 }
 0x201   :  { %v1697_v7 = vmax.f32 %v1695_v36, %v1696_v19  ;;  %v2054_v38 = vrot.slane %v2053_v5, 4  ;;  %v1499_v28 = vmax.f32 %v1497_v62, %v1498_v17  ;;  %v1704_v13 = vunpack.i.l.bf16 %v1703_v58  ;;  %v7128_v17 = vld [vmem:[%s11201_s3 + $0x74] ss:$8 sps:$4 sm:$0xff]  }
 0x202   :  { %v1489_v45 = vrot.slane %v1488_v54, 2  ;;  %v1876_v29 = vmax.f32 %v1874_v10, %v1875_v30  ;;  %v2233_v61 = vrot.slane %v2232_v33, 4  ;;  %v1705_v4 = vunpack.i.h.bf16 %v1703_v58  ;;  %v7131_v62 = vld [vmem:[%s11201_s3 + $0x374] ss:$8 sps:$4 sm:$0xff]   ;;  %5798 = vmatprep.subr.bf16.mxu0 %v7128_v17 }
 0x203   :  { %v1698_v3 = vrot.slane %v1697_v7, 2  ;;  %v2055_v44 = vmax.f32 %v2053_v5, %v2054_v38  ;;  %v1882_v24 = vsel %vm8326_vm15, %v9078_v6, 4286644096  ;;  %v1500_v36 = vrot.slane %v1499_v28, 4  ;;  %5921 = vmatprep.subr.bf16.mxu1 %v7131_v62 }
 0x204   :  { %v9108_v32 = vpop.f32.mrb[24].mxu0  ;;  %v1490_v12 = vmax.f32 %v1488_v54, %v1489_v45  ;;  %v2234_v40 = vmax.f32 %v2232_v33, %v2233_v61  ;;  %v1706_v19 = vmax.f32 %v1704_v13, %v1705_v4  ;;  %v1883_v58 = vunpack.i.l.bf16 %v1882_v24  ;;  %v7126_v33 = vld [vmem:[%s11201_s3 + $0x70] ss:$8 sps:$4 sm:$0xff]  }
 0x205   :  { %v9113_v11 = vpop.f32.mrb[25].mxu0  ;;  %v2056_v30 = vrot.slane %v2055_v44, 2  ;;  %v7129_v54 = vld [vmem:[%s11201_s3 + $0x370] ss:$8 sps:$4 sm:$0xff]   ;;  %v9136_v45 = vmax.f32 %v1697_v7, %v1698_v3  ;;  %v1877_v61 = vrot.slane %v1876_v29, 2  ;;  %v1884_v5 = vunpack.i.h.bf16 %v1882_v24  ;;  %5799 = vmatpush1.bf16.msra.mxu0 %v7126_v33 }
 0x206   :  { %v9115_v1 = vpop.f32.mrb[26].mxu0  ;;  %v1491_v13 = vrot.slane %v1490_v12, 1  ;;  %v2061_v16 = vsel %vm8332_vm1, %v9078_v6, 4286644096  ;;  %v2240_v10 = vsel %vm8337_vm2, %v9078_v6, 4286644096  ;;  %5922 = vmatpush1.bf16.msra.mxu1 %v7129_v54  ;;  %v9146_v7 = vmax.f32 %v1499_v28, %v1500_v36 }
 0x207   :  { %11486 = vst [vmem:[#allocation76_spill] sm:$0xff] %v9115_v1  ;;  %11487 = vst [vmem:[#allocation77_spill] sm:$0xff] %v9136_v45  ;;  %v2057_v4 = vmax.f32 %v2055_v44, %v2056_v30  ;;  %v9144_v27 = vpop.f32.mrb[27].mxu0  ;;  %v2235_v38 = vrot.slane %v2234_v40, 2  ;;  %v1707_v3 = vrot.slane %v1706_v19, 4  ;;  %v2062_v17 = vunpack.i.l.bf16 %v2061_v16 }
 0x208   :  { %11488 = vst [vmem:[#allocation78_spill] sm:$0xff] %v9144_v27  ;;  %11489 = vst [vmem:[#allocation79_spill] sm:$0xff] %v9146_v7  ;;  %v1885_v44 = vmax.f32 %v1883_v58, %v1884_v5  ;;  %v2063_v24 = vunpack.i.h.bf16 %v2061_v16  ;;  %v2241_v30 = vunpack.i.l.bf16 %v2240_v10  ;;  %v9148_v41 = vmax.f32 %v1490_v12, %v1491_v13 }
 0x209   :  { %v2058_v62 = vrot.slane %v2057_v4, 1  ;;  %v9150_v45 = vmax.f32 %v1876_v29, %v1877_v61  ;;  %v2242_v31 = vunpack.i.h.bf16 %v2240_v10  ;;  %v1388_v28 = vmax.f32 %v9014_v49, 0.0  ;;  %v7132_v61 = vld [vmem:[%s11201_s3 + $0x80] ss:$8 sps:$4 sm:$0xff]  }
 0x20a   :  { %11490 = vst [vmem:[#allocation80_spill] sm:$0xff] %v9148_v41  ;;  %v9155_v33 = vmax.f32 %v2062_v17, %v2063_v24  ;;  %v1389_v36 = vmax.f32 %v9028_v47, 0.0  ;;  %v1886_v54 = vrot.slane %v1885_v44, 4  ;;  %v2406_v12 = vsel %vm2405_vm10, %v9000_v46, 4286644096 }
 0x20b   :  { %11491 = vst [vmem:[#allocation81_spill] sm:$0xff] %v9150_v45  ;;  %v9153_v1 = vmax.f32 %v2057_v4, %v2058_v62  ;;  %v9159_v7 = vmax.f32 %v2241_v30, %v2242_v31  ;;  %v1390_v29 = vmax.f32 %v9032_v63, 0.0  ;;  %v9164_v16 = vmax.f32 %v2234_v40, %v2235_v38  ;;  %v7134_v4 = vld [vmem:[%s11201_s3 + $0x84] ss:$8 sps:$4 sm:$0xff]  }
 0x20c   :  { %v9166_v10 = vmax.f32 %v1706_v19, %v1707_v3  ;;  %v1449_v14 = vpack.c.bf16 %v1389_v36, %v1387_v52  ;;  %v2423_v5 = vsel %vm2405_vm10, %v9078_v6, 4286644096  ;;  %v9184_v6 = vmax.f32 %v1885_v44, %v1886_v54  ;;  %v7135_v3 = vld [vmem:[%s11201_s3 + $0x380] ss:$8 sps:$4 sm:$0xff]   ;;  %v7137_v30 = vld [vmem:[%s11201_s3 + $0x384] ss:$8 sps:$4 sm:$0xff]   ;;  %5800 = vmatprep.subr.bf16.mxu0 %v7134_v4 }
 0x20d   :  { %11492 = vst [vmem:[#allocation82_spill] sm:$0xff] %v9153_v1  ;;  %11493 = vst [vmem:[#allocation83_spill] sm:$0xff] %v9164_v16  ;;  %v9174_v58 = vpack.c.bf16 %v1390_v29, %v1388_v28  ;;  %5923 = vmatprep.subr.bf16.mxu1 %v7137_v30  ;;  %5801 = vmatpush1.bf16.msra.mxu0 %v7132_v61 }
 0x20e   :  { %11494 = vst [vmem:[#allocation84_spill] sm:$0xff] %v9166_v10  ;;  %v2411_v40 = vsel %vm8410_vm13, %v1449_v14, 4286644096  ;;  %v2636_v52 = vsel %vm8418_vm12, %v1449_v14, 4286644096  ;;  %11495 = vst [vmem:[#allocation85_spill] sm:$0xff] %v9184_v6  ;;  %5924 = vmatpush1.bf16.msra.mxu1 %v7135_v3 }
 0x20f   :  { %v2814_v63 = vsel %vm8427_vm3, %v1449_v14, 4286644096  ;;  %v2412_v19 = vmax.bf16 %v2411_v40, %v2406_v12  ;;  %v2637_v38 = vunpack.i.l.bf16 %v2636_v52  ;;  %v2638_v13 = vunpack.i.h.bf16 %v2636_v52  ;;  %v7143_v3 = vld [vmem:[%s11201_s3 + $0x394] ss:$8 sps:$4 sm:$0xff]  }
 0x210   :  { %v2815_v17 = vunpack.i.l.bf16 %v2814_v63  ;;  %v2816_v62 = vunpack.i.h.bf16 %v2814_v63  ;;  %v2993_v44 = vsel %vm8437_vm4, %v1449_v14, 4286644096  ;;  %v3170_v24 = vsel %vm8455_vm5, %v1449_v14, 4286644096  ;;  %v9202_v63 = vpop.f32.mrb[28].mxu0  ;;  %5925 = vmatprep.subr.bf16.mxu1 %v7143_v3 }
 0x211   :  { %v2413_v28 = vunpack.i.l.bf16 %v2412_v19  ;;  %v2414_v36 = vunpack.i.h.bf16 %v2412_v19  ;;  %v2639_v54 = vmax.f32 %v2637_v38, %v2638_v13  ;;  %v2994_v12 = vunpack.i.l.bf16 %v2993_v44  ;;  %11496 = vst [vmem:[#allocation86_spill] sm:$0xff] %v9202_v63  ;;  %v9210_v38 = vpop.f32.mrb[29].mxu0 }
 0x212   :  { %v2817_v29 = vmax.f32 %v2815_v17, %v2816_v62  ;;  %v2995_v40 = vunpack.i.h.bf16 %v2993_v44  ;;  %v3171_v52 = vunpack.i.l.bf16 %v3170_v24  ;;  %v3172_v46 = vunpack.i.h.bf16 %v3170_v24  ;;  %11497 = vst [vmem:[#allocation87_spill] sm:$0xff] %v9210_v38  ;;  %v9212_v61 = vpop.f32.mrb[30].mxu0 }
 0x213   :  { %v2415_v49 = vmax.f32 %v2413_v28, %v2414_v36  ;;  %v2640_v31 = vrot.slane %v2639_v54, 4  ;;  %v2425_v14 = vsel %vm8410_vm13, %v9174_v58, 4286644096  ;;  %v2647_v19 = vsel %vm8418_vm12, %v9174_v58, 4286644096  ;;  %11498 = vst [vmem:[#allocation88_spill] sm:$0xff] %v9212_v61 }
 0x214   :  { %v2818_v13 = vrot.slane %v2817_v29, 4  ;;  %v2996_v4 = vmax.f32 %v2994_v12, %v2995_v40  ;;  %v3173_v17 = vmax.f32 %v3171_v52, %v3172_v46  ;;  %v2426_v62 = vmax.bf16 %v2425_v14, %v2423_v5  ;;  %v7140_v36 = vld [vmem:[%s11201_s3 + $0x94] ss:$8 sps:$4 sm:$0xff]   ;;  %v7138_v5 = vld [vmem:[%s11201_s3 + $0x90] ss:$8 sps:$4 sm:$0xff]   ;;  %v9229_v16 = vpop.f32.mrb[31].mxu0 }
 0x215   :  { %v2416_v44 = vrot.slane %v2415_v49, 4  ;;  %v2641_v24 = vmax.f32 %v2639_v54, %v2640_v31  ;;  %v2648_v30 = vunpack.i.l.bf16 %v2647_v19  ;;  %v2649_v28 = vunpack.i.h.bf16 %v2647_v19  ;;  %v7141_v31 = vld [vmem:[%s11201_s3 + $0x390] ss:$8 sps:$4 sm:$0xff]   ;;  %5802 = vmatprep.subr.bf16.mxu0 %v7140_v36  ;;  %11499 = vst [vmem:[#allocation89_spill] sm:$0xff] %v9229_v16 }
 0x216   :  { %v2819_v47 = vmax.f32 %v2817_v29, %v2818_v13  ;;  %v2997_v45 = vrot.slane %v2996_v4, 4  ;;  %v3174_v6 = vrot.slane %v3173_v17, 4  ;;  %v2427_v12 = vunpack.i.l.bf16 %v2426_v62  ;;  %5803 = vmatpush1.bf16.msra.mxu0 %v7138_v5  ;;  %5926 = vmatpush1.bf16.msra.mxu1 %v7141_v31 }
 0x217   :  { %v2417_v46 = vmax.f32 %v2415_v49, %v2416_v44  ;;  %v2642_v54 = vrot.slane %v2641_v24, 2  ;;  %v2428_v40 = vunpack.i.h.bf16 %v2426_v62  ;;  %v2650_v52 = vmax.f32 %v2648_v30, %v2649_v28 }
 0x218   :  { %v2820_v14 = vrot.slane %v2819_v47, 2  ;;  %v2998_v19 = vmax.f32 %v2996_v4, %v2997_v45  ;;  %v3175_v29 = vmax.f32 %v3173_v17, %v3174_v6  ;;  %v2825_v13 = vsel %vm8427_vm3, %v9174_v58, 4286644096 }
 0x219   :  { %v2418_v10 = vrot.slane %v2417_v46, 2  ;;  %v2643_v1 = vmax.f32 %v2641_v24, %v2642_v54  ;;  %v2429_v41 = vmax.f32 %v2427_v12, %v2428_v40  ;;  %v2651_v49 = vrot.slane %v2650_v52, 4 }
 0x21a   :  { %v2821_v44 = vmax.f32 %v2819_v47, %v2820_v14  ;;  %v2999_v62 = vrot.slane %v2998_v19, 2  ;;  %v3176_v30 = vrot.slane %v3175_v29, 2  ;;  %v2826_v28 = vunpack.i.l.bf16 %v2825_v13 }
 0x21b   :  { %v2419_v36 = vmax.f32 %v2417_v46, %v2418_v10  ;;  %v2644_v3 = vrot.slane %v2643_v1, 1  ;;  %v2430_v45 = vrot.slane %v2429_v41, 4  ;;  %v2652_v6 = vmax.f32 %v2650_v52, %v2651_v49 }
 0x21c   :  { %v2822_v4 = vrot.slane %v2821_v44, 1  ;;  %v3000_v17 = vmax.f32 %v2998_v19, %v2999_v62  ;;  %v3177_v38 = vmax.f32 %v3175_v29, %v3176_v30  ;;  %v2827_v61 = vunpack.i.h.bf16 %v2825_v13 }
 0x21d   :  { %v2420_v63 = vrot.slane %v2419_v36, 1  ;;  %v2645_v16 = vmax.f32 %v2643_v1, %v2644_v3  ;;  %v2431_v5 = vmax.f32 %v2429_v41, %v2430_v45  ;;  %v2653_v31 = vrot.slane %v2652_v6, 2 }
 0x21e   :  { %v2823_v27 = vmax.f32 %v2821_v44, %v2822_v4  ;;  %v3001_v24 = vrot.slane %v3000_v17, 1  ;;  %v3178_v12 = vrot.slane %v3177_v38, 1  ;;  %v2828_v54 = vmax.f32 %v2826_v28, %v2827_v61  ;;  %v7146_v44 = vld [vmem:[%s11201_s3 + $0xa4] ss:$8 sps:$4 sm:$0xff]   ;;  %v7144_v28 = vld [vmem:[%s11201_s3 + $0xa0] ss:$8 sps:$4 sm:$0xff]  }
 0x21f   :  { %v2646_v47 = vpack.i.bf16 %v2645_v16, %v2645_v16  ;;  %v2432_v40 = vrot.slane %v2431_v5, 2  ;;  %v1391_v14 = vmax.f32 %v9038_v42, 0.0  ;;  %v6843_v10 = vadd.f32 %v8826_v20, %v8311_v53  ;;  %5804 = vmatprep.subr.bf16.mxu0 %v7146_v44  ;;  %v7147_v4 = vld [vmem:[%s11201_s3 + $0x3a0] ss:$8 sps:$4 sm:$0xff]  }
 0x220   :  { %v11500_v46 = vrot.slane %v9155_v33, 4  ;;  %v3002_v19 = vmax.f32 %v3000_v17, %v3001_v24  ;;  %v3179_v1 = vmax.f32 %v3177_v38, %v3178_v12  ;;  %v2829_v41 = vrot.slane %v2828_v54, 4  ;;  %5805 = vmatpush1.bf16.msra.mxu0 %v7144_v28  ;;  %v7158_v28 = vld [vmem:[%s11201_s3 + $0xc4] ss:$8 sps:$4 sm:$0xff]  }
 0x221   :  { %v11501_v29 = vrot.slane %v9159_v7, 4  ;;  %v9244_v16 = vmax.f32 %v2419_v36, %v2420_v63  ;;  %v9246_v61 = vmax.f32 %v2652_v6, %v2653_v31  ;;  %v3004_v20 = vsel %vm8437_vm4, %v9174_v58, 4286644096 }
 0x222   :  { %v9237_v52 = vmax.f32 %v9155_v33, %v11500_v46  ;;  %v2824_v42 = vpack.i.bf16 %v2823_v27, %v2823_v27  ;;  %v9251_v49 = vunpack.c.l.b16 %v2646_v47  ;;  %v9253_v33 = vmax.f32 %v2431_v5, %v2432_v40 }
 0x223   :  { %v9242_v13 = vmax.f32 %v9159_v7, %v11501_v29  ;;  %11502 = vst [vmem:[#allocation90_spill] sm:$0xff] %v9244_v16  ;;  %11503 = vst [vmem:[#allocation91_spill] sm:$0xff] %v9246_v61  ;;  %v2830_v38 = vmax.f32 %v2828_v54, %v2829_v41  ;;  %v7149_v7 = vld [vmem:[%s11201_s3 + $0x3a4] ss:$8 sps:$4 sm:$0xff]   ;;  %v3003_v63 = vpack.i.bf16 %v3002_v19, %v3002_v19  ;;  %v3005_v62 = vunpack.i.l.bf16 %v3004_v20  ;;  %v7153_v29 = vld [vmem:[%s11201_s3 + $0x3b0] ss:$8 sps:$4 sm:$0xff]  }
 0x224   :  { %11504 = vst [vmem:[#allocation92_spill] sm:$0xff] %v9251_v49  ;;  %11505 = vst [vmem:[#allocation93_spill] sm:$0xff] %v9253_v33  ;;  %v3006_v30 = vunpack.i.h.bf16 %v3004_v20  ;;  %v3181_v27 = vsel %vm8455_vm5, %v9174_v58, 4286644096  ;;  %v3180_v36 = vpack.i.bf16 %v3179_v1, %v3179_v1  ;;  %v1392_v6 = vmax.f32 %v6843_v10, 0.0  ;;  %5927 = vmatprep.subr.bf16.mxu1 %v7149_v7 }
 0x225   :  { %v2831_v3 = vrot.slane %v2830_v38, 2  ;;  %v3182_v45 = vunpack.i.l.bf16 %v3181_v27  ;;  %v3183_v5 = vunpack.i.h.bf16 %v3181_v27  ;;  %v6844_v31 = vadd.f32 %v8838_v18, %v8307_v56  ;;  %5928 = vmatpush1.bf16.msra.mxu1 %v7147_v4  ;;  %v7152_v18 = vld [vmem:[%s11201_s3 + $0xb4] ss:$8 sps:$4 sm:$0xff]  }
 0x226   :  { %v3007_v17 = vmax.f32 %v3005_v62, %v3006_v30  ;;  %v6845_v58 = vadd.f32 %v8852_v57, %v8311_v53  ;;  %v6846_v12 = vadd.f32 %v8873_v34, %v8307_v56  ;;  %v9280_v54 = vadd.f32 %v8881_v35, %v8311_v53  ;;  %v7155_v57 = vld [vmem:[%s11201_s3 + $0x3b4] ss:$8 sps:$4 sm:$0xff]   ;;  %v7150_v35 = vld [vmem:[%s11201_s3 + $0xb0] ss:$8 sps:$4 sm:$0xff]   ;;  %5806 = vmatprep.subr.bf16.mxu0 %v7152_v18 }
 0x227   :  { %v9274_v24 = vmax.f32 %v2830_v38, %v2831_v3  ;;  %v6848_v47 = vadd.f32 %v8893_v26, %v8307_v56  ;;  %v3184_v10 = vmax.f32 %v3182_v45, %v3183_v5  ;;  %v1393_v46 = vmax.f32 %v6844_v31, 0.0  ;;  %5929 = vmatprep.subr.bf16.mxu1 %v7155_v57  ;;  %5807 = vmatpush1.bf16.msra.mxu0 %v7150_v35  ;;  %v7167_v35 = vld [vmem:[%s11201_s3 + $0x3d4] ss:$8 sps:$4 sm:$0xff]  }
 0x228   :  { %v3008_v40 = vrot.slane %v3007_v17, 4  ;;  %v1394_v34 = vmax.f32 %v6845_v58, 0.0  ;;  %v9293_v19 = vunpack.c.l.b16 %v2824_v42  ;;  %v1395_v1 = vmax.f32 %v6846_v12, 0.0  ;;  %v7156_v58 = vld [vmem:[%s11201_s3 + $0xc0] ss:$8 sps:$4 sm:$0xff]   ;;  %5808 = vmatprep.subr.bf16.mxu0 %v7158_v28 }
 0x229   :  { %11506 = vst [vmem:[#allocation94_spill] sm:$0xff] %v9274_v24  ;;  %v1397_v41 = vmax.f32 %v6848_v47, 0.0  ;;  %v3185_v38 = vrot.slane %v3184_v10, 4  ;;  %v9300_v44 = vpack.c.bf16 %v1393_v46, %v1391_v14  ;;  %v9304_v42 = vunpack.c.l.b16 %v3003_v63  ;;  %5930 = vmatpush1.bf16.msra.mxu1 %v7153_v29  ;;  %v7161_v14 = vld [vmem:[%s11201_s3 + $0x3c4] ss:$8 sps:$4 sm:$0xff]  }
 0x22a   :  { %11507 = vst [vmem:[#allocation95_spill] sm:$0xff] %v9293_v19  ;;  %v9302_v7 = vpack.c.bf16 %v1394_v34, %v1392_v6  ;;  %v9306_v62 = vunpack.c.l.b16 %v3180_v36  ;;  %v3009_v3 = vmax.f32 %v3007_v17, %v3008_v40  ;;  %v9324_v45 = vadd.f32 %v8899_v50, %v8311_v53  ;;  %v7159_v17 = vld [vmem:[%s11201_s3 + $0x3c0] ss:$8 sps:$4 sm:$0xff]   ;;  %5931 = vmatprep.subr.bf16.mxu1 %v7161_v14  ;;  %v7165_v28 = vld [vmem:[%s11201_s3 + $0x3d0] ss:$8 sps:$4 sm:$0xff]  }
 0x22b   :  { %11508 = vst [vmem:[#allocation96_spill] sm:$0xff] %v9304_v42  ;;  %v9309_v27 = vpack.c.bf16 %v1397_v41, %v1395_v1  ;;  %v1508_v63 = vsel %vm1479_vm14, %v9300_v44, 4286644096  ;;  %v1714_v36 = vsel %vm8321_vm11, %v9300_v44, 4286644096  ;;  %v3186_v12 = vmax.f32 %v3184_v10, %v3185_v38  ;;  %5809 = vmatpush1.bf16.msra.mxu0 %v7156_v58 }
 0x22c   :  { %11509 = vst [vmem:[#allocation97_spill] sm:$0xff] %v9306_v62  ;;  %v1510_v6 = vunpack.i.l.bf16 %v1508_v63  ;;  %v1511_v4 = vunpack.i.h.bf16 %v1508_v63  ;;  %v1715_v5 = vunpack.i.l.bf16 %v1714_v36  ;;  %v1716_v31 = vunpack.i.h.bf16 %v1714_v36  ;;  %v7164_v10 = vld [vmem:[%s11201_s3 + $0xd4] ss:$8 sps:$4 sm:$0xff]   ;;  %v7162_v38 = vld [vmem:[%s11201_s3 + $0xd0] ss:$8 sps:$4 sm:$0xff]  }
 0x22d   :  { %v1893_v50 = vsel %vm8326_vm15, %v9300_v44, 4286644096  ;;  %v2072_v47 = vsel %vm8332_vm1, %v9300_v44, 4286644096  ;;  %v9340_v18 = vadd.f32 %v8945_v39, %v8307_v56  ;;  %5932 = vmatpush1.bf16.msra.mxu1 %v7159_v17  ;;  %v3010_v1 = vrot.slane %v3009_v3, 2  ;;  %5810 = vmatprep.subr.bf16.mxu0 %v7164_v10 }
 0x22e   :  { %v1512_v57 = vmax.f32 %v1510_v6, %v1511_v4  ;;  %v1717_v40 = vmax.f32 %v1715_v5, %v1716_v31  ;;  %v1894_v46 = vunpack.i.l.bf16 %v1893_v50  ;;  %v1895_v34 = vunpack.i.h.bf16 %v1893_v50  ;;  %5933 = vmatprep.subr.bf16.mxu1 %v7167_v35  ;;  %v7168_v58 = vld [vmem:[%s11201_s3 + $0xe0] ss:$8 sps:$4 sm:$0xff]   ;;  %v7170_v17 = vld [vmem:[%s11201_s3 + $0xe4] ss:$8 sps:$4 sm:$0xff]  }
 0x22f   :  { %v2073_v41 = vunpack.i.l.bf16 %v2072_v47  ;;  %v2074_v29 = vunpack.i.h.bf16 %v2072_v47  ;;  %v9350_v39 = vadd.f32 %v8948_v22, %v8311_v53  ;;  %v2251_v6 = vsel %vm8337_vm2, %v9300_v44, 4286644096  ;;  %5811 = vmatpush1.bf16.msra.mxu0 %v7162_v38  ;;  %v7171_v10 = vld [vmem:[%s11201_s3 + $0x3e0] ss:$8 sps:$4 sm:$0xff]  }
 0x230   :  { %v1513_v14 = vrot.slane %v1512_v57, 4  ;;  %v1718_v63 = vrot.slane %v1717_v40, 4  ;;  %v1896_v36 = vmax.f32 %v1894_v46, %v1895_v34  ;;  %v3187_v4 = vrot.slane %v3186_v12, 2  ;;  %5812 = vmatprep.subr.bf16.mxu0 %v7170_v17 }
 0x231   :  { %v2075_v22 = vmax.f32 %v2073_v41, %v2074_v29  ;;  %v2252_v5 = vunpack.i.l.bf16 %v2251_v6  ;;  %v2253_v31 = vunpack.i.h.bf16 %v2251_v6  ;;  %v1521_v34 = vsel %vm1479_vm14, %v9302_v7, 4286644096  ;;  %5934 = vmatpush1.bf16.msra.mxu1 %v7165_v28  ;;  %v7174_v28 = vld [vmem:[%s11201_s3 + $0xf0] ss:$8 sps:$4 sm:$0xff]  }
 0x232   :  { %v1514_v50 = vmax.f32 %v1512_v57, %v1513_v14  ;;  %v1719_v47 = vmax.f32 %v1717_v40, %v1718_v63  ;;  %v1897_v46 = vrot.slane %v1896_v36, 4  ;;  %v1523_v29 = vunpack.i.l.bf16 %v1521_v34  ;;  %v7173_v57 = vld [vmem:[%s11201_s3 + $0x3e4] ss:$8 sps:$4 sm:$0xff]  }
 0x233   :  { %v2076_v35 = vrot.slane %v2075_v22, 4  ;;  %v2254_v41 = vmax.f32 %v2252_v5, %v2253_v31  ;;  %v1524_v6 = vunpack.i.h.bf16 %v1521_v34  ;;  %v9375_v40 = vmax.f32 %v3009_v3, %v3010_v1  ;;  %v7176_v5 = vld [vmem:[%s11201_s3 + $0xf4] ss:$8 sps:$4 sm:$0xff]   ;;  %5935 = vmatprep.subr.bf16.mxu1 %v7173_v57  ;;  %v7177_v3 = vld [vmem:[%s11201_s3 + $0x3f0] ss:$8 sps:$4 sm:$0xff]   ;;  %5813 = vmatpush1.bf16.msra.mxu0 %v7168_v58 }
 0x234   :  { %v1515_v14 = vrot.slane %v1514_v50, 2  ;;  %v1898_v63 = vmax.f32 %v1896_v36, %v1897_v46  ;;  %v1725_v38 = vsel %vm8321_vm11, %v9302_v7, 4286644096  ;;  %v7179_v1 = vld [vmem:[%s11201_s3 + $0x3f4] ss:$8 sps:$4 sm:$0xff]   ;;  %v9392_v36 = vmax.f32 %v3186_v12, %v3187_v4  ;;  %5814 = vmatprep.subr.bf16.mxu0 %v7176_v5 }
 0x235   :  { %11510 = vst [vmem:[#allocation98_spill] sm:$0xff] %v9375_v40  ;;  %v2077_v31 = vmax.f32 %v2075_v22, %v2076_v35  ;;  %v2255_v17 = vrot.slane %v2254_v41, 4  ;;  %v1525_v34 = vmax.f32 %v1523_v29, %v1524_v6  ;;  %v1726_v20 = vunpack.i.l.bf16 %v1725_v38  ;;  %5936 = vmatpush1.bf16.msra.mxu1 %v7171_v10 }
 0x236   :  { %11511 = vst [vmem:[#allocation99_spill] sm:$0xff] %v9392_v36  ;;  %v1516_v46 = vmax.f32 %v1514_v50, %v1515_v14  ;;  %v1720_v26 = vrot.slane %v1719_v47, 2  ;;  %v1727_v30 = vunpack.i.h.bf16 %v1725_v38  ;;  %v1899_v22 = vrot.slane %v1898_v63, 2  ;;  %5937 = vmatprep.subr.bf16.mxu1 %v7179_v1 }
 0x237   :  { %v2078_v35 = vrot.slane %v2077_v31, 2  ;;  %v2256_v29 = vmax.f32 %v2254_v41, %v2255_v17  ;;  %v1904_v6 = vsel %vm8326_vm15, %v9302_v7, 4286644096  ;;  %v1526_v62 = vrot.slane %v1525_v34, 4  ;;  %5815 = vmatpush1.bf16.msra.mxu0 %v7174_v28 }
 0x238   :  { %v1517_v57 = vrot.slane %v1516_v46, 1  ;;  %v1728_v42 = vmax.f32 %v1726_v20, %v1727_v30  ;;  %v1905_v19 = vunpack.i.l.bf16 %v1904_v6  ;;  %v1906_v14 = vunpack.i.h.bf16 %v1904_v6 }
 0x239   :  { %v2079_v4 = vmax.f32 %v2077_v31, %v2078_v35  ;;  %v2257_v50 = vrot.slane %v2256_v29, 2  ;;  %v9399_v10 = vmax.f32 %v1719_v47, %v1720_v26  ;;  %v2083_v41 = vsel %vm8332_vm1, %v9302_v7, 4286644096  ;;  %5938 = vmatpush1.bf16.msra.mxu1 %v7177_v3 }
 0x23a   :  { %v2262_v38 = vsel %vm8337_vm2, %v9302_v7, 4286644096  ;;  %v9407_v20 = vmax.f32 %v1516_v46, %v1517_v57  ;;  %v1729_v5 = vrot.slane %v1728_v42, 4  ;;  %v2084_v31 = vunpack.i.l.bf16 %v2083_v41 }
 0x23b   :  { %v2080_v30 = vrot.slane %v2079_v4, 1  ;;  %v9409_v17 = vmax.f32 %v1898_v63, %v1899_v22  ;;  %v9411_v1 = vmax.f32 %v1525_v34, %v1526_v62  ;;  %v1907_v26 = vmax.f32 %v1905_v19, %v1906_v14 }
 0x23c   :  { %v2085_v47 = vunpack.i.h.bf16 %v2083_v41  ;;  %v9415_v6 = vmax.f32 %v2256_v29, %v2257_v50  ;;  %v2263_v58 = vunpack.i.l.bf16 %v2262_v38  ;;  %v2437_v28 = vsel %vm2405_vm10, %v9300_v44, 4286644096 }
 0x23d   :  { %11512 = vst [vmem:[#allocation100_spill] sm:$0xff] %v9409_v17  ;;  %v9413_v35 = vmax.f32 %v2079_v4, %v2080_v30  ;;  %v2264_v3 = vunpack.i.h.bf16 %v2262_v38  ;;  %v2439_v46 = vsel %vm8410_vm13, %v9309_v27, 4286644096  ;;  %v2658_v62 = vsel %vm8418_vm12, %v9309_v27, 4286644096 }
 0x23e   :  { %v2836_v19 = vsel %vm8427_vm3, %v9309_v27, 4286644096  ;;  %v9430_v34 = vmax.f32 %v1728_v42, %v1729_v5  ;;  %v2086_v22 = vmax.f32 %v2084_v31, %v2085_v47  ;;  %v2440_v44 = vmax.bf16 %v2439_v46, %v2437_v28 }
 0x23f   :  { %v1908_v29 = vrot.slane %v1907_v26, 4  ;;  %v2659_v57 = vunpack.i.l.bf16 %v2658_v62  ;;  %v2660_v4 = vunpack.i.h.bf16 %v2658_v62  ;;  %v2837_v50 = vunpack.i.l.bf16 %v2836_v19 }
 0x240   :  { %v2441_v41 = vunpack.i.l.bf16 %v2440_v44  ;;  %v2442_v38 = vunpack.i.h.bf16 %v2440_v44  ;;  %v2838_v30 = vunpack.i.h.bf16 %v2836_v19  ;;  %v2265_v12 = vmax.f32 %v2263_v58, %v2264_v3 }
 0x241   :  { %v2661_v36 = vmax.f32 %v2659_v57, %v2660_v4  ;;  %v3015_v63 = vsel %vm8437_vm4, %v9309_v27, 4286644096  ;;  %v3192_v42 = vsel %vm8455_vm5, %v9309_v27, 4286644096  ;;  %v2087_v5 = vrot.slane %v2086_v22, 4 }
 0x242   :  { %v2443_v31 = vmax.f32 %v2441_v41, %v2442_v38  ;;  %v2839_v47 = vmax.f32 %v2837_v50, %v2838_v30  ;;  %v3016_v28 = vunpack.i.l.bf16 %v3015_v63  ;;  %v3017_v62 = vunpack.i.h.bf16 %v3015_v63 }
 0x243   :  { %v2662_v46 = vrot.slane %v2661_v36, 4  ;;  %v3193_v14 = vunpack.i.l.bf16 %v3192_v42  ;;  %v3194_v40 = vunpack.i.h.bf16 %v3192_v42  ;;  %v9440_v44 = vmax.f32 %v1907_v26, %v1908_v29 }
 0x244   :  { %v2444_v58 = vrot.slane %v2443_v31, 4  ;;  %v2840_v3 = vrot.slane %v2839_v47, 4  ;;  %v1398_v19 = vmax.f32 %v9324_v45, 0.0  ;;  %v2266_v57 = vrot.slane %v2265_v12, 4 }
 0x245   :  { %11513 = vst [vmem:[#allocation101_spill] sm:$0xff] %v9440_v44  ;;  %v2663_v4 = vmax.f32 %v2661_v36, %v2662_v46  ;;  %v3018_v24 = vmax.f32 %v3016_v28, %v3017_v62  ;;  %v3195_v49 = vmax.f32 %v3193_v14, %v3194_v40  ;;  %v11514_v41 = vmax.f32 %v9280_v54, 0.0 }
 0x246   :  { %v2445_v61 = vmax.f32 %v2443_v31, %v2444_v58  ;;  %v2841_v27 = vmax.f32 %v2839_v47, %v2840_v3  ;;  %v2451_v63 = vsel %vm2405_vm10, %v9302_v7, 4286644096  ;;  %v9447_v38 = vmax.f32 %v2086_v22, %v2087_v5  ;;  %v7182_v7 = vld [vmem:[%s11201_s3 + $0x104] ss:$8 sps:$4 sm:$0xff]  }
 0x247   :  { %v1454_v50 = vpack.c.bf16 %v1398_v19, %v11514_v41  ;;  %v2664_v26 = vrot.slane %v2663_v4, 2  ;;  %v3019_v29 = vrot.slane %v3018_v24, 4  ;;  %v3196_v30 = vrot.slane %v3195_v49, 4  ;;  %5825 = vmatprep.subr.bf16.mxu0 %v7182_v7 }
 0x248   :  { %v2446_v42 = vrot.slane %v2445_v61, 2  ;;  %v2842_v16 = vrot.slane %v2841_v27, 2  ;;  %v9456_v19 = vmax.f32 %v2265_v12, %v2266_v57  ;;  %v11556_v55 = vrot.slane %v9411_v1, 2 }
 0x249   :  { %v2453_v45 = vsel %vm8410_vm13, %v1454_v50, 4286644096  ;;  %v2669_v40 = vsel %vm8418_vm12, %v1454_v50, 4286644096  ;;  %v2665_v36 = vmax.f32 %v2663_v4, %v2664_v26  ;;  %v3020_v14 = vmax.f32 %v3018_v24, %v3019_v29 }
 0x24a   :  { %v3197_v54 = vmax.f32 %v3195_v49, %v3196_v30  ;;  %v2454_v31 = vmax.bf16 %v2453_v45, %v2451_v63  ;;  %v2447_v22 = vmax.f32 %v2445_v61, %v2446_v42  ;;  %v2843_v5 = vmax.f32 %v2841_v27, %v2842_v16 }
 0x24b   :  { %v2670_v47 = vunpack.i.l.bf16 %v2669_v40  ;;  %v2671_v28 = vunpack.i.h.bf16 %v2669_v40  ;;  %v2666_v46 = vrot.slane %v2665_v36, 1  ;;  %v3021_v62 = vrot.slane %v3020_v14, 2 }
 0x24c   :  { %v3198_v58 = vrot.slane %v3197_v54, 2  ;;  %v2455_v3 = vunpack.i.l.bf16 %v2454_v31  ;;  %v2844_v41 = vrot.slane %v2843_v5, 1  ;;  %v2456_v4 = vunpack.i.h.bf16 %v2454_v31 }
 0x24d   :  { %v2672_v24 = vmax.f32 %v2670_v47, %v2671_v28  ;;  %v2667_v49 = vmax.f32 %v2665_v36, %v2666_v46  ;;  %v3022_v63 = vmax.f32 %v3020_v14, %v3021_v62  ;;  %v2847_v29 = vsel %vm8427_vm3, %v1454_v50, 4286644096 }
 0x24e   :  { %v3199_v26 = vmax.f32 %v3197_v54, %v3198_v58  ;;  %v2845_v61 = vmax.f32 %v2843_v5, %v2844_v41  ;;  %v2457_v16 = vmax.f32 %v2455_v3, %v2456_v4  ;;  %v1399_v30 = vmax.f32 %v9340_v18, 0.0 }
 0x24f   :  { %v2673_v27 = vrot.slane %v2672_v24, 4  ;;  %v2448_v42 = vrot.slane %v2447_v22, 1  ;;  %v3023_v45 = vrot.slane %v3022_v63, 1  ;;  %v2848_v7 = vunpack.i.l.bf16 %v2847_v29 }
 0x250   :  { %v3200_v40 = vrot.slane %v3199_v26, 1  ;;  %v2668_v12 = vpack.i.bf16 %v2667_v49, %v2667_v49  ;;  %v2458_v57 = vrot.slane %v2457_v16, 4  ;;  %v2849_v31 = vunpack.i.h.bf16 %v2847_v29 }
 0x251   :  { %v2674_v17 = vmax.f32 %v2672_v24, %v2673_v27  ;;  %v2846_v47 = vpack.i.bf16 %v2845_v61, %v2845_v61  ;;  %v3024_v36 = vmax.f32 %v3022_v63, %v3023_v45  ;;  %v3026_v54 = vsel %vm8437_vm4, %v1454_v50, 4286644096 }
 0x252   :  { %v9461_v14 = vmax.f32 %v3199_v26, %v3200_v40  ;;  %v9465_v5 = vmax.f32 %v2457_v16, %v2458_v57  ;;  %v2850_v46 = vmax.f32 %v2848_v7, %v2849_v31  ;;  %v1400_v18 = vmax.f32 %v9350_v39, 0.0 }
 0x253   :  { %v2675_v28 = vrot.slane %v2674_v17, 2  ;;  %v9468_v62 = vmax.f32 %v2447_v22, %v2448_v42  ;;  %v3027_v58 = vunpack.i.l.bf16 %v3026_v54  ;;  %v3028_v3 = vunpack.i.h.bf16 %v3026_v54 }
 0x254   :  { %11515 = vst [vmem:[#allocation102_spill] sm:$0xff] %v9461_v14  ;;  %v6852_v41 = vadd.f32 %v8970_v51, %v8307_v56  ;;  %v3025_v4 = vpack.i.bf16 %v3024_v36, %v3024_v36  ;;  %v9472_v24 = vunpack.c.l.b16 %v2668_v12  ;;  %v2851_v49 = vrot.slane %v2850_v46, 4 }
 0x255   :  { %11516 = vst [vmem:[#allocation103_spill] sm:$0xff] %v9468_v62  ;;  %v3203_v63 = vsel %vm8455_vm5, %v1454_v50, 4286644096  ;;  %v9478_v29 = vunpack.c.l.b16 %v2846_v47  ;;  %v3029_v39 = vmax.f32 %v3027_v58, %v3028_v3  ;;  %v9481_v16 = vmax.f32 %v2674_v17, %v2675_v28 }
 0x256   :  { %11517 = vst [vmem:[#allocation104_spill] sm:$0xff] %v9472_v24  ;;  %v3204_v22 = vunpack.i.l.bf16 %v3203_v63  ;;  %v2852_v27 = vmax.f32 %v2850_v46, %v2851_v49  ;;  %v3205_v51 = vunpack.i.h.bf16 %v3203_v63  ;;  %v1401_v45 = vmax.f32 %v6852_v41, 0.0 }
 0x257   :  { %11518 = vst [vmem:[#allocation105_spill] sm:$0xff] %v9478_v29  ;;  %11519 = vst [vmem:[#allocation106_spill] sm:$0xff] %v9481_v16  ;;  %v3030_v42 = vrot.slane %v3029_v39, 4  ;;  %v6853_v40 = vadd.f32 %v8978_v59, %v8311_v53  ;;  %v9487_v50 = vadd.f32 %v9018_v43, %v8307_v56  ;;  %v9489_v7 = vunpack.c.l.b16 %v3025_v4 }
 0x258   :  { %v2853_v12 = vrot.slane %v2852_v27, 2  ;;  %v3206_v57 = vmax.f32 %v3204_v22, %v3205_v51  ;;  %v9493_v31 = vadd.f32 %v9034_v8, %v8311_v53  ;;  %v9495_v47 = vpack.c.bf16 %v1401_v45, %v1399_v30 }
 0x259   :  { %11520 = vst [vmem:[#allocation107_spill] sm:$0xff] %v9489_v7  ;;  %v3031_v17 = vmax.f32 %v3029_v39, %v3030_v42  ;;  %v1402_v36 = vmax.f32 %v6853_v40, 0.0  ;;  %v9499_v54 = vadd.f32 %v9040_v9, %v8307_v56 }
 0x25a   :  { %v9502_v43 = vmax.f32 %v2852_v27, %v2853_v12  ;;  %v3207_v28 = vrot.slane %v3206_v57, 4  ;;  %v1534_v58 = vsel %vm1479_vm14, %v9495_v47, 4286644096  ;;  %v1736_v8 = vsel %vm8321_vm11, %v9495_v47, 4286644096 }
 0x25b   :  { %v9510_v30 = vpack.c.bf16 %v1402_v36, %v1400_v18  ;;  %v3032_v9 = vrot.slane %v3031_v17, 2  ;;  %v1536_v4 = vunpack.i.l.bf16 %v1534_v58  ;;  %v1537_v49 = vunpack.i.h.bf16 %v1534_v58  ;;  %v7185_v18 = vld [vmem:[%s11201_s3 + $0x404] ss:$8 sps:$4 sm:$0xff]  }
 0x25c   :  { %11521 = vst [vmem:[#allocation108_spill] sm:$0xff] %v9502_v43  ;;  %v3208_v41 = vmax.f32 %v3206_v57, %v3207_v28  ;;  %v1737_v63 = vunpack.i.l.bf16 %v1736_v8  ;;  %v1738_v39 = vunpack.i.h.bf16 %v1736_v8  ;;  %v1915_v22 = vsel %vm8326_vm15, %v9495_v47, 4286644096  ;;  %5948 = vmatprep.subr.bf16.mxu1 %v7185_v18 }
 0x25d   :  { %v1405_v27 = vmax.f32 %v9499_v54, 0.0  ;;  %v1538_v42 = vmax.f32 %v1536_v4, %v1537_v49  ;;  %v1916_v45 = vunpack.i.l.bf16 %v1915_v22  ;;  %v1917_v40 = vunpack.i.h.bf16 %v1915_v22 }
 0x25e   :  { %v3209_v51 = vrot.slane %v3208_v41, 2  ;;  %v1739_v57 = vmax.f32 %v1737_v63, %v1738_v39  ;;  %v2094_v36 = vsel %vm8332_vm1, %v9495_v47, 4286644096  ;;  %v2273_v28 = vsel %vm8337_vm2, %v9495_v47, 4286644096 }
 0x25f   :  { %v9527_v54 = vmax.f32 %v3031_v17, %v3032_v9  ;;  %v1539_v58 = vrot.slane %v1538_v42, 4  ;;  %v1918_v8 = vmax.f32 %v1916_v45, %v1917_v40  ;;  %v2095_v4 = vunpack.i.l.bf16 %v2094_v36 }
 0x260   :  { %v1740_v49 = vrot.slane %v1739_v57, 4  ;;  %v2096_v22 = vunpack.i.h.bf16 %v2094_v36  ;;  %v2274_v26 = vunpack.i.l.bf16 %v2273_v28  ;;  %v2275_v59 = vunpack.i.h.bf16 %v2273_v28 }
 0x261   :  { %11522 = vst [vmem:[#allocation109_spill] sm:$0xff] %v9527_v54  ;;  %v9529_v12 = vmax.f32 %v3208_v41, %v3209_v51  ;;  %v1540_v63 = vmax.f32 %v1538_v42, %v1539_v58  ;;  %v1919_v39 = vrot.slane %v1918_v8, 4  ;;  %v1547_v3 = vsel %vm1479_vm14, %v9510_v30, 4286644096 }
 0x262   :  { %v9533_v61 = vmax.f32 %v1739_v57, %v1740_v49  ;;  %v2097_v46 = vmax.f32 %v2095_v4, %v2096_v22  ;;  %v2276_v17 = vmax.f32 %v2274_v26, %v2275_v59  ;;  %v1549_v9 = vunpack.i.l.bf16 %v1547_v3 }
 0x263   :  { %11523 = vst [vmem:[#allocation110_spill] sm:$0xff] %v9529_v12  ;;  %v1541_v14 = vrot.slane %v1540_v63, 2  ;;  %v9535_v45 = vmax.f32 %v1918_v8, %v1919_v39  ;;  %v1550_v40 = vunpack.i.h.bf16 %v1547_v3  ;;  %v1747_v18 = vsel %vm8321_vm11, %v9510_v30, 4286644096 }
 0x264   :  { %v2098_v51 = vrot.slane %v2097_v46, 4  ;;  %v2277_v42 = vrot.slane %v2276_v17, 4  ;;  %v1748_v36 = vunpack.i.l.bf16 %v1747_v18  ;;  %v1749_v26 = vunpack.i.h.bf16 %v1747_v18 }
 0x265   :  { %11524 = vst [vmem:[#allocation111_spill] sm:$0xff] %v9535_v45  ;;  %v9542_v57 = vmax.f32 %v1540_v63, %v1541_v14  ;;  %v9544_v58 = vmax.f32 %v1549_v9, %v1550_v40  ;;  %v1926_v3 = vsel %vm8326_vm15, %v9510_v30, 4286644096  ;;  %v2105_v4 = vsel %vm8332_vm1, %v9510_v30, 4286644096 }
 0x266   :  { %v2099_v59 = vmax.f32 %v2097_v46, %v2098_v51  ;;  %v9546_v8 = vmax.f32 %v2276_v17, %v2277_v42  ;;  %v9556_v14 = vmax.f32 %v1748_v36, %v1749_v26  ;;  %v1927_v63 = vunpack.i.l.bf16 %v1926_v3 }
 0x267   :  { %v1928_v17 = vunpack.i.h.bf16 %v1926_v3  ;;  %v2106_v9 = vunpack.i.l.bf16 %v2105_v4  ;;  %v2107_v18 = vunpack.i.h.bf16 %v2105_v4  ;;  %v2284_v51 = vsel %vm8337_vm2, %v9510_v30, 4286644096 }
 0x268   :  { %v2100_v46 = vrot.slane %v2099_v59, 2  ;;  %v11525_v42 = vmax.f32 %v9487_v50, 0.0  ;;  %v11527_v3 = vrot.slane %v9465_v5, 2  ;;  %v2465_v4 = vsel %vm2405_vm10, %v9495_v47, 4286644096 }
 0x269   :  { %v9569_v22 = vmax.f32 %v1927_v63, %v1928_v17  ;;  %v6857_v47 = vadd.f32 %v9062_v48, %v8311_v53 }
 0x26a   :  { %v1457_v28 = vpack.c.bf16 %v1405_v27, %v11525_v42  ;;  %v9565_v41 = vmax.f32 %v2099_v59, %v2100_v46  ;;  %v9574_v49 = vmax.f32 %v9465_v5, %v11527_v3  ;;  %v9582_v59 = vmax.f32 %v2106_v9, %v2107_v18 }
 0x26b   :  { %11526 = vst [vmem:[#allocation112_spill] sm:$0xff] %v9569_v22  ;;  %v2285_v46 = vunpack.i.l.bf16 %v2284_v51  ;;  %v2286_v42 = vunpack.i.h.bf16 %v2284_v51 }
 0x26c   :  { %11528 = vst [vmem:[#allocation113_spill] sm:$0xff] %v9574_v49  ;;  %v2467_v50 = vsel %vm8410_vm13, %v1457_v28, 4286644096  ;;  %v2680_v27 = vsel %vm8418_vm12, %v1457_v28, 4286644096 }
 0x26d   :  { %v2468_v63 = vmax.bf16 %v2467_v50, %v2465_v4  ;;  %v2681_v36 = vunpack.i.l.bf16 %v2680_v27  ;;  %v2682_v26 = vunpack.i.h.bf16 %v2680_v27  ;;  %v2858_v5 = vsel %vm8427_vm3, %v1457_v28, 4286644096 }
 0x26e   :  { %v2859_v40 = vunpack.i.l.bf16 %v2858_v5  ;;  %v2860_v7 = vunpack.i.h.bf16 %v2858_v5  ;;  %v3037_v9 = vsel %vm8437_vm4, %v1457_v28, 4286644096  ;;  %v3214_v18 = vsel %vm8455_vm5, %v1457_v28, 4286644096 }
 0x26f   :  { %v2469_v3 = vunpack.i.l.bf16 %v2468_v63  ;;  %v2470_v39 = vunpack.i.h.bf16 %v2468_v63  ;;  %v2683_v12 = vmax.f32 %v2681_v36, %v2682_v26  ;;  %v3038_v4 = vunpack.i.l.bf16 %v3037_v9 }
 0x270   :  { %v3039_v50 = vunpack.i.h.bf16 %v3037_v9  ;;  %v3215_v27 = vunpack.i.l.bf16 %v3214_v18  ;;  %v2861_v54 = vmax.f32 %v2859_v40, %v2860_v7  ;;  %v3216_v29 = vunpack.i.h.bf16 %v3214_v18 }
 0x271   :  { %v2471_v51 = vmax.f32 %v2469_v3, %v2470_v39  ;;  %v2684_v17 = vrot.slane %v2683_v12, 4  ;;  %v9595_v36 = vmax.f32 %v2285_v46, %v2286_v42  ;;  %v1406_v28 = vmax.f32 %v6857_v47, 0.0 }
 0x272   :  { %v3040_v5 = vmax.f32 %v3038_v4, %v3039_v50  ;;  %v2862_v24 = vrot.slane %v2861_v54, 4  ;;  %v3217_v16 = vmax.f32 %v3215_v27, %v3216_v29  ;;  %v6858_v9 = vadd.f32 %v9108_v32, %v8307_v56 }
 0x273   :  { %v2472_v26 = vrot.slane %v2471_v51, 4  ;;  %v2685_v43 = vmax.f32 %v2683_v12, %v2684_v17  ;;  %v9601_v7 = vadd.f32 %v9113_v11, %v8311_v53  ;;  %v11529_v46 = vmax.f32 %v9493_v31, 0.0 }
 0x274   :  { %v3041_v3 = vrot.slane %v3040_v5, 4  ;;  %v2863_v40 = vmax.f32 %v2861_v54, %v2862_v24  ;;  %v3218_v18 = vrot.slane %v3217_v16, 4  ;;  %v2479_v47 = vsel %vm2405_vm10, %v9510_v30, 4286644096 }
 0x275   :  { %v2473_v39 = vmax.f32 %v2471_v51, %v2472_v26  ;;  %v2686_v48 = vrot.slane %v2685_v43, 2  ;;  %v1458_v42 = vpack.c.bf16 %v1406_v28, %v11529_v46  ;;  %v1407_v54 = vmax.f32 %v6858_v9, 0.0  ;;  %v11531_v28 = vld [vmem:[#allocation76_spill] sm:$0xff] }
 0x276   :  { %v3042_v29 = vmax.f32 %v3040_v5, %v3041_v3  ;;  %v2864_v32 = vrot.slane %v2863_v40, 2  ;;  %v3219_v4 = vmax.f32 %v3217_v16, %v3218_v18  ;;  %v6860_v30 = vadd.f32 %v11531_v28, %v8307_v56 }
 0x277   :  { %v2474_v17 = vrot.slane %v2473_v39, 2  ;;  %v9608_v51 = vmax.f32 %v2685_v43, %v2686_v48  ;;  %v2481_v11 = vsel %vm8410_vm13, %v1458_v42, 4286644096  ;;  %v2691_v31 = vsel %vm8418_vm12, %v1458_v42, 4286644096 }
 0x278   :  { %v3043_v50 = vrot.slane %v3042_v29, 2  ;;  %v2482_v24 = vmax.bf16 %v2481_v11, %v2479_v47  ;;  %v3220_v27 = vrot.slane %v3219_v4, 2  ;;  %v2692_v26 = vunpack.i.l.bf16 %v2691_v31 }
 0x279   :  { %11530 = vst [vmem:[#allocation114_spill] sm:$0xff] %v9608_v51  ;;  %v9617_v43 = vmax.f32 %v2473_v39, %v2474_v17  ;;  %v2693_v48 = vunpack.i.h.bf16 %v2691_v31  ;;  %v9620_v46 = vmax.f32 %v2863_v40, %v2864_v32  ;;  %v2869_v47 = vsel %vm8427_vm3, %v1458_v42, 4286644096 }
 0x27a   :  { %v2483_v3 = vunpack.i.l.bf16 %v2482_v24  ;;  %v2484_v16 = vunpack.i.h.bf16 %v2482_v24  ;;  %v3048_v9 = vsel %vm8437_vm4, %v1458_v42, 4286644096  ;;  %v9626_v11 = vmax.f32 %v3042_v29, %v3043_v50 }
 0x27b   :  { %11532 = vst [vmem:[#allocation76_spill] sm:$0xff] %v9617_v43  ;;  %11533 = vst [vmem:[#allocation115_spill] sm:$0xff] %v9620_v46  ;;  %v2694_v63 = vmax.f32 %v2692_v26, %v2693_v48  ;;  %v2870_v28 = vunpack.i.l.bf16 %v2869_v47  ;;  %v9628_v39 = vmax.f32 %v3219_v4, %v3220_v27  ;;  %v2871_v17 = vunpack.i.h.bf16 %v2869_v47 }
 0x27c   :  { %11534 = vst [vmem:[#allocation116_spill] sm:$0xff] %v9626_v11  ;;  %v2485_v12 = vmax.f32 %v2483_v3, %v2484_v16  ;;  %v3049_v24 = vunpack.i.l.bf16 %v3048_v9  ;;  %v3050_v31 = vunpack.i.h.bf16 %v3048_v9  ;;  %v3225_v40 = vsel %vm8455_vm5, %v1458_v42, 4286644096  ;;  %v11537_v9 = vld [vmem:[#allocation78_spill] sm:$0xff] }
 0x27d   :  { %11535 = vst [vmem:[#allocation117_spill] sm:$0xff] %v9628_v39  ;;  %v2695_v18 = vrot.slane %v2694_v63, 4  ;;  %v1409_v32 = vmax.f32 %v6860_v30, 0.0  ;;  %v2872_v51 = vmax.f32 %v2870_v28, %v2871_v17  ;;  %v3226_v43 = vunpack.i.l.bf16 %v3225_v40 }
 0x27e   :  { %v2486_v5 = vrot.slane %v2485_v12, 4  ;;  %v3051_v62 = vmax.f32 %v3049_v24, %v3050_v31  ;;  %v3227_v45 = vunpack.i.h.bf16 %v3225_v40  ;;  %v6861_v28 = vadd.f32 %v11537_v9, %v8311_v53 }
 0x27f   :  { %v2696_v26 = vmax.f32 %v2694_v63, %v2695_v18  ;;  %v9634_v4 = vpack.c.bf16 %v1409_v32, %v1407_v54  ;;  %v2873_v3 = vrot.slane %v2872_v51, 4 }
 0x280   :  { %v3052_v16 = vrot.slane %v3051_v62, 4  ;;  %v3228_v48 = vmax.f32 %v3226_v43, %v3227_v45  ;;  %v9637_v47 = vmax.f32 %v2485_v12, %v2486_v5 }
 0x281   :  { %v1560_v42 = vsel %vm1479_vm14, %v9634_v4, 4286644096  ;;  %v1758_v30 = vsel %vm8321_vm11, %v9634_v4, 4286644096  ;;  %v2874_v63 = vmax.f32 %v2872_v51, %v2873_v3  ;;  %v2697_v24 = vrot.slane %v2696_v26, 2 }
 0x282   :  { %11536 = vst [vmem:[#allocation118_spill] sm:$0xff] %v9637_v47  ;;  %v3053_v54 = vmax.f32 %v3051_v62, %v3052_v16  ;;  %v3229_v18 = vrot.slane %v3228_v48, 4  ;;  %v1562_v17 = vunpack.i.l.bf16 %v1560_v42  ;;  %v1563_v31 = vunpack.i.h.bf16 %v1560_v42  ;;  %v11538_v16 = vld [vmem:[#allocation86_spill] sm:$0xff] }
 0x283   :  { %v1759_v40 = vunpack.i.l.bf16 %v1758_v30  ;;  %v1760_v45 = vunpack.i.h.bf16 %v1758_v30  ;;  %v2875_v12 = vrot.slane %v2874_v63, 2  ;;  %v1937_v32 = vsel %vm8326_vm15, %v9634_v4, 4286644096 }
 0x284   :  { %v3054_v5 = vrot.slane %v3053_v54, 2  ;;  %v3230_v43 = vmax.f32 %v3228_v48, %v3229_v18  ;;  %v1564_v27 = vmax.f32 %v1562_v17, %v1563_v31  ;;  %v1938_v29 = vunpack.i.l.bf16 %v1937_v32 }
 0x285   :  { %v1761_v50 = vmax.f32 %v1759_v40, %v1760_v45  ;;  %v1939_v39 = vunpack.i.h.bf16 %v1937_v32  ;;  %v2116_v3 = vsel %vm8332_vm1, %v9634_v4, 4286644096  ;;  %v6862_v42 = vadd.f32 %v11538_v16, %v8307_v56 }
 0x286   :  { %v3231_v62 = vrot.slane %v3230_v43, 2  ;;  %v1565_v30 = vrot.slane %v1564_v27, 4  ;;  %v2117_v18 = vunpack.i.l.bf16 %v2116_v3  ;;  %v9655_v11 = vmax.f32 %v2696_v26, %v2697_v24 }
 0x287   :  { %v1762_v48 = vrot.slane %v1761_v50, 4  ;;  %v1940_v9 = vmax.f32 %v1938_v29, %v1939_v39  ;;  %v2118_v17 = vunpack.i.h.bf16 %v2116_v3  ;;  %v2295_v31 = vsel %vm8337_vm2, %v9634_v4, 4286644096 }
 0x288   :  { %11539 = vst [vmem:[#allocation78_spill] sm:$0xff] %v9655_v11  ;;  %v1410_v40 = vmax.f32 %v6861_v28, 0.0  ;;  %v9660_v45 = vmax.f32 %v2874_v63, %v2875_v12  ;;  %v9662_v32 = vmax.f32 %v3053_v54, %v3054_v5  ;;  %v1566_v51 = vmax.f32 %v1564_v27, %v1565_v30 }
 0x289   :  { %v2296_v46 = vunpack.i.l.bf16 %v2295_v31  ;;  %v9664_v47 = vmax.f32 %v3230_v43, %v3231_v62  ;;  %v2119_v16 = vmax.f32 %v2117_v18, %v2118_v17  ;;  %v2297_v49 = vunpack.i.h.bf16 %v2295_v31  ;;  %v11544_v43 = vld [vmem:[#allocation88_spill] sm:$0xff] }
 0x28a   :  { %11540 = vst [vmem:[#allocation86_spill] sm:$0xff] %v9660_v45  ;;  %11541 = vst [vmem:[#allocation119_spill] sm:$0xff] %v9662_v32  ;;  %v11543_v39 = vmax.f32 %v9601_v7, 0.0  ;;  %v1567_v26 = vrot.slane %v1566_v51, 2  ;;  %v9668_v24 = vmax.f32 %v1761_v50, %v1762_v48  ;;  %v1941_v3 = vrot.slane %v1940_v9, 4 }
 0x28b   :  { %11542 = vst [vmem:[#allocation120_spill] sm:$0xff] %v9664_v47  ;;  %v1411_v11 = vmax.f32 %v6862_v42, 0.0  ;;  %v2120_v33 = vrot.slane %v2119_v16, 4  ;;  %v2298_v28 = vmax.f32 %v2296_v46, %v2297_v49  ;;  %v6864_v62 = vadd.f32 %v11544_v43, %v8307_v56  ;;  %v11545_v46 = vld [vmem:[#allocation87_spill] sm:$0xff] }
 0x28c   :  { %v1460_v29 = vpack.c.bf16 %v1410_v40, %v11543_v39  ;;  %v6863_v17 = vadd.f32 %v11545_v46, %v8311_v53  ;;  %v9681_v31 = vmax.f32 %v1566_v51, %v1567_v26  ;;  %v9683_v40 = vmax.f32 %v1940_v9, %v1941_v3  ;;  %v11549_v26 = vld [vmem:[#allocation89_spill] sm:$0xff] }
 0x28d   :  { %v2121_v7 = vmax.f32 %v2119_v16, %v2120_v33  ;;  %v2299_v30 = vrot.slane %v2298_v28, 4  ;;  %v1413_v32 = vmax.f32 %v6864_v62, 0.0  ;;  %v6865_v3 = vadd.f32 %v11549_v26, %v8311_v53  ;;  %v11550_v62 = vld [vmem:[#allocation79_spill] sm:$0xff] }
 0x28e   :  { %v1573_v63 = vsel %vm1479_vm14, %v1460_v29, 4286644096  ;;  %v1769_v27 = vsel %vm8321_vm11, %v1460_v29, 4286644096  ;;  %v1948_v50 = vsel %vm8326_vm15, %v1460_v29, 4286644096 }
 0x28f   :  { %v1575_v54 = vunpack.i.l.bf16 %v1573_v63  ;;  %v1576_v12 = vunpack.i.h.bf16 %v1573_v63  ;;  %v1770_v5 = vunpack.i.l.bf16 %v1769_v27  ;;  %v1771_v18 = vunpack.i.h.bf16 %v1769_v27  ;;  %11546 = vst [vmem:[#allocation88_spill] sm:$0xff] %v9683_v40 }
 0x290   :  { %v1949_v42 = vunpack.i.l.bf16 %v1948_v50  ;;  %v1950_v48 = vunpack.i.h.bf16 %v1948_v50  ;;  %v2127_v49 = vsel %vm8332_vm1, %v1460_v29, 4286644096  ;;  %v2122_v39 = vrot.slane %v2121_v7, 2 }
 0x291   :  { %v2128_v56 = vunpack.i.l.bf16 %v2127_v49  ;;  %v9685_v33 = vmax.f32 %v2298_v28, %v2299_v30  ;;  %v9687_v16 = vmax.f32 %v1575_v54, %v1576_v12  ;;  %v2129_v63 = vunpack.i.h.bf16 %v2127_v49 }
 0x292   :  { %v2306_v27 = vsel %vm8337_vm2, %v1460_v29, 4286644096  ;;  %v9691_v43 = vmax.f32 %v1770_v5, %v1771_v18  ;;  %v9693_v46 = vmax.f32 %v2121_v7, %v2122_v39  ;;  %v9695_v51 = vmax.f32 %v1949_v42, %v1950_v48 }
 0x293   :  { %11547 = vst [vmem:[#allocation87_spill] sm:$0xff] %v9685_v33  ;;  %v2307_v50 = vunpack.i.l.bf16 %v2306_v27  ;;  %v2308_v47 = vunpack.i.h.bf16 %v2306_v27  ;;  %v1412_v9 = vmax.f32 %v6863_v17, 0.0  ;;  %v9699_v28 = vmax.f32 %v2128_v56, %v2129_v63 }
 0x294   :  { %11548 = vst [vmem:[#allocation121_spill] sm:$0xff] %v9695_v51  ;;  %v1461_v54 = vpack.c.bf16 %v1413_v32, %v1411_v11  ;;  %v2493_v12 = vsel %vm2405_vm10, %v9634_v4, 4286644096  ;;  %v2507_v5 = vsel %vm2405_vm10, %v1460_v29, 4286644096  ;;  %v1414_v18 = vmax.f32 %v6865_v3, 0.0 }
 0x295   :  { %v9704_v30 = vmax.f32 %v2307_v50, %v2308_v47  ;;  %v1502_v7 = vrot.slane %v11550_v62, 2  ;;  %v11551_v4 = vrot.slane %v9544_v58, 4 }
 0x296   :  { %v2495_v48 = vsel %vm8410_vm13, %v1461_v54, 4286644096  ;;  %v2702_v53 = vsel %vm8418_vm12, %v1461_v54, 4286644096  ;;  %v2880_v11 = vsel %vm8427_vm3, %v1461_v54, 4286644096  ;;  %v1462_v27 = vpack.c.bf16 %v1414_v18, %v1412_v9 }
 0x297   :  { %v9717_v32 = vmax.f32 %v9544_v58, %v11551_v4  ;;  %v2496_v47 = vmax.bf16 %v2495_v48, %v2493_v12  ;;  %v2703_v29 = vunpack.i.l.bf16 %v2702_v53  ;;  %v2704_v49 = vunpack.i.h.bf16 %v2702_v53 }
 0x298   :  { %v2881_v17 = vunpack.i.l.bf16 %v2880_v11  ;;  %v2882_v39 = vunpack.i.h.bf16 %v2880_v11  ;;  %v3059_v56 = vsel %vm8437_vm4, %v1461_v54, 4286644096  ;;  %v3236_v63 = vsel %vm8455_vm5, %v1461_v54, 4286644096 }
 0x299   :  { %v2497_v50 = vunpack.i.l.bf16 %v2496_v47  ;;  %v2498_v26 = vunpack.i.h.bf16 %v2496_v47  ;;  %v2705_v3 = vmax.f32 %v2703_v29, %v2704_v49  ;;  %v3060_v42 = vunpack.i.l.bf16 %v3059_v56 }
 0x29a   :  { %v2883_v45 = vmax.f32 %v2881_v17, %v2882_v39  ;;  %v3061_v40 = vunpack.i.h.bf16 %v3059_v56  ;;  %v3237_v58 = vunpack.i.l.bf16 %v3236_v63  ;;  %v3238_v4 = vunpack.i.h.bf16 %v3236_v63 }
 0x29b   :  { %v2499_v12 = vmax.f32 %v2497_v50, %v2498_v26  ;;  %v2706_v48 = vrot.slane %v2705_v3, 4  ;;  %v2509_v53 = vsel %vm8410_vm13, %v1462_v27, 4286644096  ;;  %v2713_v11 = vsel %vm8418_vm12, %v1462_v27, 4286644096 }
 0x29c   :  { %v2884_v37 = vrot.slane %v2883_v45, 4  ;;  %v3062_v51 = vmax.f32 %v3060_v42, %v3061_v40  ;;  %v3239_v54 = vmax.f32 %v3237_v58, %v3238_v4  ;;  %v2510_v9 = vmax.bf16 %v2509_v53, %v2507_v5  ;;  %v11552_v58 = vld [vmem:[#allocation6_spill] sm:$0xff] }
 0x29d   :  { %v2500_v18 = vrot.slane %v2499_v12, 4  ;;  %v2707_v47 = vmax.f32 %v2705_v3, %v2706_v48  ;;  %v2714_v29 = vunpack.i.l.bf16 %v2713_v11  ;;  %v2715_v49 = vunpack.i.h.bf16 %v2713_v11 }
 0x29e   :  { %v2885_v17 = vmax.f32 %v2883_v45, %v2884_v37  ;;  %v3063_v39 = vrot.slane %v3062_v51, 4  ;;  %v3240_v56 = vrot.slane %v3239_v54, 4  ;;  %v2511_v63 = vunpack.i.l.bf16 %v2510_v9 }
 0x29f   :  { %v9727_v50 = vmax.f32 %v2499_v12, %v2500_v18  ;;  %v2708_v26 = vrot.slane %v2707_v47, 2  ;;  %v2512_v15 = vunpack.i.h.bf16 %v2510_v9  ;;  %v2716_v22 = vmax.f32 %v2714_v29, %v2715_v49 }
 0x2a0   :  { %v2886_v44 = vrot.slane %v2885_v17, 2  ;;  %v3064_v23 = vmax.f32 %v3062_v51, %v3063_v39  ;;  %v3241_v33 = vmax.f32 %v3239_v54, %v3240_v56  ;;  %v2891_v40 = vsel %vm8427_vm3, %v1462_v27, 4286644096 }
 0x2a1   :  { %v2513_v5 = vmax.f32 %v2511_v63, %v2512_v15  ;;  %v2717_v42 = vrot.slane %v2716_v22, 4  ;;  %v1578_v3 = vrot.slane %v9687_v16, 4  ;;  %v11553_v37 = vunpack.i.h.bf16 %v11552_v58 }
 0x2a2   :  { %v11554_v45 = vunpack.i.l.bf16 %v11552_v58  ;;  %v3065_v48 = vrot.slane %v3064_v23, 2  ;;  %v2892_v53 = vunpack.i.l.bf16 %v2891_v40  ;;  %v1503_v11 = vmax.f32 %v11550_v62, %v1502_v7 }
 0x2a3   :  { %v9738_v51 = vmax.f32 %v2707_v47, %v2708_v26  ;;  %v9740_v54 = vmax.f32 %v2885_v17, %v2886_v44  ;;  %v2893_v0 = vunpack.i.h.bf16 %v2891_v40  ;;  %v3070_v9 = vsel %vm8437_vm4, %v1462_v27, 4286644096 }
 0x2a4   :  { %v1603_v4 = vmax.f32 %v11554_v45, %v11553_v37  ;;  %v3242_v18 = vrot.slane %v3241_v33, 2  ;;  %v2514_v29 = vrot.slane %v2513_v5, 4  ;;  %v3071_v49 = vunpack.i.l.bf16 %v3070_v9 }
 0x2a5   :  { %v3072_v39 = vunpack.i.h.bf16 %v3070_v9  ;;  %v9744_v56 = vmax.f32 %v3064_v23, %v3065_v48  ;;  %v9746_v63 = vmax.f32 %v2716_v22, %v2717_v42  ;;  %v2894_v15 = vmax.f32 %v2892_v53, %v2893_v0 }
 0x2a6   :  { %v3247_v62 = vsel %vm8455_vm5, %v1462_v27, 4286644096  ;;  %v1504_v17 = vrot.slane %v1503_v11, 1  ;;  %v1529_v40 = vmax.f32 %v9411_v1, %v11556_v55  ;;  %v1554_v58 = vrot.slane %v9717_v32, 2 }
 0x2a7   :  { %11555 = vst [vmem:[#allocation89_spill] sm:$0xff] %v9744_v56  ;;  %v3073_v7 = vmax.f32 %v3071_v49, %v3072_v39  ;;  %v3248_v47 = vunpack.i.l.bf16 %v3247_v62  ;;  %v3249_v44 = vunpack.i.h.bf16 %v3247_v62  ;;  %v2895_v26 = vrot.slane %v2894_v15, 4 }
 0x2a8   :  { %v1579_v23 = vmax.f32 %v9687_v16, %v1578_v3  ;;  %v1505_v42 = vmax.f32 %v1503_v11, %v1504_v17  ;;  %v1604_v45 = vrot.slane %v1603_v4, 4  ;;  %v1530_v27 = vrot.slane %v1529_v40, 1 }
 0x2a9   :  { %v3074_v37 = vrot.slane %v3073_v7, 4  ;;  %v9755_v22 = vmax.f32 %v3248_v47, %v3249_v44  ;;  %v9757_v25 = vmax.f32 %v2894_v15, %v2895_v26  ;;  %v1555_v48 = vmax.f32 %v9717_v32, %v1554_v58  ;;  %v11558_v44 = vld [vmem:[#allocation29_spill] sm:$0xff]  ;;  %v11561_v26 = vld [vmem:[#allocation43_spill] sm:$0xff] }
 0x2aa   :  { %v1580_v53 = vrot.slane %v1579_v23, 2  ;;  %v9760_v0 = vmax.f32 %v3241_v33, %v3242_v18  ;;  %v9762_v9 = vmax.f32 %v2513_v5, %v2514_v29  ;;  %v1605_v49 = vmax.f32 %v1603_v4, %v1604_v45  ;;  %v11562_v45 = vld [vmem:[#allocation62_spill] sm:$0xff] }
 0x2ab   :  { %v9765_v39 = vmax.f32 %v3073_v7, %v3074_v37  ;;  %v1531_v16 = vmax.f32 %v1529_v40, %v1530_v27  ;;  %v1556_v3 = vrot.slane %v1555_v48, 1  ;;  %v1506_v15 = vpack.i.bf16 %v1505_v42, %v1505_v42 }
 0x2ac   :  { %11557 = vst [vmem:[#allocation79_spill] sm:$0xff] %v9760_v0  ;;  %v1581_v62 = vmax.f32 %v1579_v23, %v1580_v53  ;;  %v1606_v47 = vrot.slane %v1605_v49, 2  ;;  %v11559_v17 = vunpack.i.h.bf16 %v11558_v44  ;;  %v11560_v32 = vunpack.i.l.bf16 %v11558_v44 }
 0x2ad   :  { %v1557_v18 = vmax.f32 %v1555_v48, %v1556_v3  ;;  %v1651_v4 = vsel %vm1479_vm14, %v11561_v26, 4286644096  ;;  %v1532_v7 = vpack.i.bf16 %v1531_v16, %v1531_v16  ;;  %v1677_v27 = vsel %vm1479_vm14, %v11562_v45, 4286644096 }
 0x2ae   :  { %v1629_v33 = vmax.f32 %v11560_v32, %v11559_v17  ;;  %v1582_v29 = vrot.slane %v1581_v62, 1  ;;  %v1607_v55 = vmax.f32 %v1605_v49, %v1606_v47  ;;  %v1653_v58 = vunpack.i.l.bf16 %v1651_v4 }
 0x2af   :  { %v1558_v23 = vpack.i.bf16 %v1557_v18, %v1557_v18  ;;  %v1654_v42 = vunpack.i.h.bf16 %v1651_v4  ;;  %v1679_v17 = vunpack.i.l.bf16 %v1677_v27  ;;  %v1680_v32 = vunpack.i.h.bf16 %v1677_v27 }
 0x2b0   :  { %v1630_v40 = vrot.slane %v1629_v33, 4  ;;  %v1583_v37 = vmax.f32 %v1581_v62, %v1582_v29  ;;  %v1608_v53 = vrot.slane %v1607_v55, 1  ;;  %v3363_v5 = vunpack.c.l.b16 %v1506_v15 }
 0x2b1   :  { %v1655_v11 = vmax.f32 %v1653_v58, %v1654_v42  ;;  %v1681_v49 = vmax.f32 %v1679_v17, %v1680_v32  ;;  %v3365_v47 = vunpack.c.l.b16 %v1532_v7  ;;  %v3367_v18 = vunpack.c.l.b16 %v1558_v23 }
 0x2b2   :  { %v1631_v44 = vmax.f32 %v1629_v33, %v1630_v40  ;;  %v1584_v3 = vpack.i.bf16 %v1583_v37, %v1583_v37  ;;  %v1609_v1 = vmax.f32 %v1607_v55, %v1608_v53  ;;  %vm3380_vm12 = vcmask 1042434  }
 0x2b3   :  { %v1656_v12 = vrot.slane %v1655_v11, 4  ;;  %v1682_v0 = vrot.slane %v1681_v49, 4  ;;  %vm3382_vm14 = vcmask 1043459   ;;  %v3391_v15 = vsel %vm3378_vm0, %v3365_v47, %v3363_v5 }
 0x2b4   :  { %v1632_v16 = vrot.slane %v1631_v44, 2  ;;  %v3369_v62 = vunpack.c.l.b16 %v1584_v3  ;;  %v1610_v29 = vpack.i.bf16 %v1609_v1, %v1609_v1  ;;  %v3392_v7 = vsel %vm3380_vm12, %v3367_v18, %v3391_v15 }
 0x2b5   :  { %v1657_v33 = vmax.f32 %v1655_v11, %v1656_v12  ;;  %v1683_v37 = vmax.f32 %v1681_v49, %v1682_v0  ;;  %v2067_v23 = vrot.slane %v9237_v52, 2  ;;  %v2089_v42 = vrot.slane %v9447_v38, 2 }
 0x2b6   :  { %v1633_v4 = vmax.f32 %v1631_v44, %v1632_v16  ;;  %v3371_v58 = vunpack.c.l.b16 %v1610_v29  ;;  %v3393_v12 = vsel %vm3382_vm14, %v3369_v62, %v3392_v7  ;;  %v11563_v11 = vrot.slane %v9582_v59, 4  ;;  %v11564_v62 = vld [vmem:[#allocation12_spill] sm:$0xff] }
 0x2b7   :  { %v1658_v55 = vrot.slane %v1657_v33, 2  ;;  %v1684_v27 = vrot.slane %v1683_v37, 2  ;;  %v2068_v5 = vmax.f32 %v9237_v52, %v2067_v23  ;;  %v2090_v17 = vmax.f32 %v9447_v38, %v2089_v42 }
 0x2b8   :  { %v1634_v40 = vrot.slane %v1633_v4, 1  ;;  %v2110_v53 = vmax.f32 %v9582_v59, %v11563_v11  ;;  %v3394_v44 = vsel %vm3384_vm6, %v3371_v58, %v3393_v12  ;;  %v2131_v49 = vrot.slane %v9699_v28, 4 }
 0x2b9   :  { %v1659_v0 = vmax.f32 %v1657_v33, %v1658_v55  ;;  %v1685_v3 = vmax.f32 %v1683_v37, %v1684_v27  ;;  %v2069_v18 = vrot.slane %v2068_v5, 1  ;;  %v2091_v29 = vrot.slane %v2090_v17, 1 }
 0x2ba   :  { %v1635_v1 = vmax.f32 %v1633_v4, %v1634_v40  ;;  %v2111_v16 = vrot.slane %v2110_v53, 2  ;;  %v11565_v4 = vunpack.i.h.bf16 %v11564_v62  ;;  %v11566_v40 = vunpack.i.l.bf16 %v11564_v62 }
 0x2bb   :  { %v1660_v47 = vrot.slane %v1659_v0, 1  ;;  %v1686_v33 = vrot.slane %v1685_v3, 1  ;;  %v2132_v52 = vmax.f32 %v9699_v28, %v2131_v49  ;;  %v2070_v38 = vmax.f32 %v2068_v5, %v2069_v18 }
 0x2bc   :  { %v1636_v32 = vpack.i.bf16 %v1635_v1, %v1635_v1  ;;  %v2152_v59 = vmax.f32 %v11566_v40, %v11565_v4  ;;  %v2112_v58 = vmax.f32 %v2110_v53, %v2111_v16  ;;  %v2092_v7 = vmax.f32 %v2090_v17, %v2091_v29 }
 0x2bd   :  { %v1661_v55 = vmax.f32 %v1659_v0, %v1660_v47  ;;  %v1687_v23 = vmax.f32 %v1685_v3, %v1686_v33  ;;  %v2133_v27 = vrot.slane %v2132_v52, 2  ;;  %v2071_v11 = vpack.i.bf16 %v2070_v38, %v2070_v38 }
 0x2be   :  { %v3373_v15 = vunpack.c.l.b16 %v1636_v32  ;;  %v2153_v37 = vrot.slane %v2152_v59, 4  ;;  %v2113_v1 = vrot.slane %v2112_v58, 1  ;;  %v2093_v48 = vpack.i.bf16 %v2092_v7, %v2092_v7  ;;  %v11567_v32 = vld [vmem:[#allocation32_spill] sm:$0xff] }
 0x2bf   :  { %v1662_v12 = vpack.i.bf16 %v1661_v55, %v1661_v55  ;;  %v1688_v62 = vpack.i.bf16 %v1687_v23, %v1687_v23  ;;  %v2134_v40 = vmax.f32 %v2132_v52, %v2133_v27  ;;  %v11568_v53 = vunpack.i.h.bf16 %v11567_v32 }
 0x2c0   :  { %v3395_v42 = vsel %vm3386_vm8, %v3373_v15, %v3394_v44  ;;  %v2154_v56 = vmax.f32 %v2152_v59, %v2153_v37  ;;  %v2114_v4 = vmax.f32 %v2112_v58, %v2113_v1  ;;  %v11569_v28 = vunpack.i.l.bf16 %v11567_v32 }
 0x2c1   :  { %v3375_v5 = vunpack.c.l.b16 %v1662_v12  ;;  %v2193_v44 = vsel %vm8332_vm1, %v11561_v26, 4286644096  ;;  %v2215_v3 = vsel %vm8332_vm1, %v11562_v45, 4286644096  ;;  %v3377_v16 = vunpack.c.l.b16 %v1688_v62 }
 0x2c2   :  { %v2174_v0 = vmax.f32 %v11569_v28, %v11568_v53  ;;  %v2155_v17 = vrot.slane %v2154_v56, 2  ;;  %v2115_v49 = vpack.i.bf16 %v2114_v4, %v2114_v4  ;;  %v2135_v47 = vrot.slane %v2134_v40, 1 }
 0x2c3   :  { %v3396_v29 = vsel %vm3388_vm9, %v3375_v5, %v3395_v42  ;;  %v2194_v33 = vunpack.i.l.bf16 %v2193_v44  ;;  %v2195_v15 = vunpack.i.h.bf16 %v2193_v44  ;;  %v2216_v38 = vunpack.i.l.bf16 %v2215_v3 }
 0x2c4   :  { %v2175_v18 = vrot.slane %v2174_v0, 4  ;;  %v2156_v59 = vmax.f32 %v2154_v56, %v2155_v17  ;;  %v3397_v58 = vsel %vm2405_vm10, %v3377_v16, %v3396_v29  ;;  %v2136_v52 = vmax.f32 %v2134_v40, %v2135_v47 }
 0x2c5   :  { %v3399_v7 = vpack.c.b16 %v3397_v58, %v3397_v58  ;;  %v2196_v23 = vmax.f32 %v2194_v33, %v2195_v15  ;;  %v2217_v1 = vunpack.i.h.bf16 %v2215_v3  ;;  %v3519_v12 = vunpack.c.l.b16 %v2071_v11  ;;  %v11571_v33 = vld [vmem:[#allocation10_spill] sm:$0xff] }
 0x2c6   :  { %v2176_v55 = vmax.f32 %v2174_v0, %v2175_v18  ;;  %v2157_v37 = vrot.slane %v2156_v59, 1  ;;  %v2137_v21 = vpack.i.bf16 %v2136_v52, %v2136_v52  ;;  %v3521_v62 = vunpack.c.l.b16 %v2093_v48 }
 0x2c7   :  { %5816 = vmatprep.mubr.bf16.mxu0 %v3399_v7  ;;  %v2197_v32 = vrot.slane %v2196_v23, 4  ;;  %v2218_v42 = vmax.f32 %v2216_v38, %v2217_v1  ;;  %v3523_v56 = vunpack.c.l.b16 %v2115_v49  ;;  %v11570_v40 = vrot.slane %v9542_v57, 1  ;;  %v11574_v7 = vld [vmem:[#allocation50_spill] sm:$0xff] }
 0x2c8   :  { %v2177_v27 = vrot.slane %v2176_v55, 2  ;;  %v2158_v4 = vmax.f32 %v2156_v59, %v2157_v37  ;;  %v3525_v28 = vunpack.c.l.b16 %v2137_v21  ;;  %v3541_v5 = vsel %vm3378_vm0, %v3521_v62, %v3519_v12 }
 0x2c9   :  { %v1544_v0 = vmax.f32 %v9542_v57, %v11570_v40  ;;  %v2198_v44 = vmax.f32 %v2196_v23, %v2197_v32  ;;  %v2219_v3 = vrot.slane %v2218_v42, 4  ;;  %v3542_v16 = vsel %vm3380_vm12, %v3523_v56, %v3541_v5 }
 0x2ca   :  { %v2178_v53 = vmax.f32 %v2176_v55, %v2177_v27  ;;  %v2159_v17 = vpack.i.bf16 %v2158_v4, %v2158_v4  ;;  %v3543_v48 = vsel %vm3382_vm14, %v3525_v28, %v3542_v16  ;;  %v1569_v18 = vrot.slane %v9681_v31, 1  ;;  %v11573_v55 = vld [vmem:[#allocation34_spill] sm:$0xff] }
 0x2cb   :  { %v1545_v47 = vpack.i.bf16 %v1544_v0, %v1544_v0  ;;  %v2199_v49 = vrot.slane %v2198_v44, 2  ;;  %v2220_v29 = vmax.f32 %v2218_v42, %v2219_v3  ;;  %v11572_v15 = vrot.slane %v11571_v33, 2  ;;  %v11575_v28 = vld [vmem:[#allocation2_spill] sm:$0xff]  ;;  %v11578_v3 = vld [vmem:[#allocation80_spill] sm:$0xff] }
 0x2cc   :  { %v2179_v11 = vrot.slane %v2178_v53, 1  ;;  %v3527_v59 = vunpack.c.l.b16 %v2159_v17  ;;  %v1570_v57 = vmax.f32 %v9681_v31, %v1569_v18  ;;  %v1619_v38 = vrot.slane %v11573_v55, 2 }
 0x2cd   :  { %v1594_v58 = vmax.f32 %v11571_v33, %v11572_v15  ;;  %v1643_v37 = vrot.slane %v11574_v7, 4  ;;  %v2200_v23 = vmax.f32 %v2198_v44, %v2199_v49  ;;  %v2221_v1 = vrot.slane %v2220_v29, 2 }
 0x2ce   :  { %v2180_v52 = vmax.f32 %v2178_v53, %v2179_v11  ;;  %v3544_v21 = vsel %vm3384_vm6, %v3527_v59, %v3543_v48  ;;  %v1571_v62 = vpack.i.bf16 %v1570_v57, %v1570_v57  ;;  %v1620_v4 = vmax.f32 %v11573_v55, %v1619_v38 }
 0x2cf   :  { %v1595_v27 = vrot.slane %v1594_v58, 1  ;;  %v1644_v32 = vmax.f32 %v11574_v7, %v1643_v37  ;;  %v2201_v42 = vrot.slane %v2200_v23, 1  ;;  %v2222_v56 = vmax.f32 %v2220_v29, %v2221_v1 }
 0x2d0   :  { %v2181_v12 = vpack.i.bf16 %v2180_v52, %v2180_v52  ;;  %v11576_v31 = vunpack.i.h.bf16 %v11575_v28  ;;  %v11577_v5 = vunpack.i.l.bf16 %v11575_v28  ;;  %v1621_v17 = vrot.slane %v1620_v4, 1 }
 0x2d1   :  { %v1596_v53 = vmax.f32 %v1594_v58, %v1595_v27  ;;  %v1645_v44 = vrot.slane %v1644_v32, 2  ;;  %v11579_v16 = vpack.i.bf16 %v11578_v3, %v11578_v3  ;;  %v2202_v48 = vmax.f32 %v2200_v23, %v2201_v42 }
 0x2d2   :  { %v1668_v40 = vmax.f32 %v11577_v5, %v11576_v31  ;;  %v3529_v0 = vunpack.c.l.b16 %v2181_v12  ;;  %v2223_v18 = vrot.slane %v2222_v56, 1  ;;  %v1622_v29 = vmax.f32 %v1620_v4, %v1621_v17 }
 0x2d3   :  { %v3362_v11 = vunpack.c.l.b16 %v11579_v16  ;;  %v1597_v49 = vpack.i.bf16 %v1596_v53, %v1596_v53  ;;  %v1646_v15 = vmax.f32 %v1644_v32, %v1645_v44  ;;  %v11580_v58 = vpack.i.bf16 %v9407_v20, %v9407_v20 }
 0x2d4   :  { %v1669_v59 = vrot.slane %v1668_v40, 4  ;;  %v3545_v33 = vsel %vm3386_vm8, %v3529_v0, %v3544_v21  ;;  %v2203_v57 = vpack.i.bf16 %v2202_v48, %v2202_v48  ;;  %v2224_v55 = vmax.f32 %v2222_v56, %v2223_v18  ;;  %v11582_v48 = vld [vmem:[#allocation15_spill] sm:$0xff] }
 0x2d5   :  { %v3364_v52 = vunpack.c.l.b16 %v11580_v58  ;;  %v3366_v7 = vunpack.c.l.b16 %v1545_v47  ;;  %v1623_v37 = vpack.i.bf16 %v1622_v29, %v1622_v29  ;;  %v1647_v1 = vrot.slane %v1646_v15, 1  ;;  %v11584_v29 = vld [vmem:[#allocation37_spill] sm:$0xff] }
 0x2d6   :  { %v1670_v38 = vmax.f32 %v1668_v40, %v1669_v59  ;;  %v3368_v27 = vunpack.c.l.b16 %v1571_v62  ;;  %v3370_v12 = vunpack.c.l.b16 %v1597_v49  ;;  %v2225_v23 = vpack.i.bf16 %v2224_v55, %v2224_v55 }
 0x2d7   :  { %v3531_v42 = vunpack.c.l.b16 %v2203_v57  ;;  %v3379_v28 = vsel %vm3378_vm0, %v3364_v52, %v3362_v11  ;;  %v1648_v21 = vmax.f32 %v1646_v15, %v1647_v1  ;;  %v3372_v4 = vunpack.c.l.b16 %v1623_v37  ;;  %v11585_v57 = vld [vmem:[#allocation53_spill] sm:$0xff] }
 0x2d8   :  { %v1671_v53 = vrot.slane %v1670_v38, 2  ;;  %v3381_v32 = vsel %vm3380_vm12, %v3366_v7, %v3379_v28  ;;  %v11581_v20 = vrot.slane %v9565_v41, 1  ;;  %v3533_v56 = vunpack.c.l.b16 %v2225_v23 }
 0x2d9   :  { %v3546_v47 = vsel %vm3388_vm9, %v3531_v42, %v3545_v33  ;;  %v3383_v62 = vsel %vm3382_vm14, %v3368_v27, %v3381_v32  ;;  %v1649_v40 = vpack.i.bf16 %v1648_v21, %v1648_v21  ;;  %v2124_v44 = vrot.slane %v9693_v46, 1  ;;  %v11589_v42 = vld [vmem:[#allocation82_spill] sm:$0xff] }
 0x2da   :  { %v2103_v31 = vmax.f32 %v9565_v41, %v11581_v20  ;;  %v1672_v5 = vmax.f32 %v1670_v38, %v1671_v53  ;;  %v3385_v0 = vsel %vm3384_vm6, %v3370_v12, %v3383_v62  ;;  %v3547_v3 = vsel %vm2405_vm10, %v3533_v56, %v3546_v47  ;;  %v11586_v38 = vld [vmem:[#allocation64_spill] sm:$0xff] }
 0x2db   :  { %v3387_v11 = vsel %vm3386_vm8, %v3372_v4, %v3385_v0  ;;  %v11583_v18 = vrot.slane %v11582_v48, 2  ;;  %v3549_v49 = vpack.c.b16 %v3547_v3, %v3547_v3  ;;  %v3374_v59 = vunpack.c.l.b16 %v1649_v40 }
 0x2dc   :  { %v2104_v17 = vpack.i.bf16 %v2103_v31, %v2103_v31  ;;  %v1673_v16 = vrot.slane %v1672_v5, 1  ;;  %v2125_v33 = vmax.f32 %v9693_v46, %v2124_v44  ;;  %v2166_v15 = vrot.slane %v11584_v29, 2 }
 0x2dd   :  { %v2145_v41 = vmax.f32 %v11582_v48, %v11583_v18  ;;  %v2186_v55 = vrot.slane %v11585_v57, 4  ;;  %v11587_v7 = vunpack.i.h.bf16 %v11586_v38  ;;  %v11588_v37 = vunpack.i.l.bf16 %v11586_v38  ;;  %5939 = vmatprep.mubr.bf16.mxu1 %v3549_v49 }
 0x2de   :  { %v1674_v58 = vmax.f32 %v1672_v5, %v1673_v16  ;;  %v3389_v27 = vsel %vm3388_vm9, %v3374_v59, %v3387_v11  ;;  %v2126_v12 = vpack.i.bf16 %v2125_v33, %v2125_v33  ;;  %v2167_v23 = vmax.f32 %v11584_v29, %v2166_v15  ;;  %v11592_v11 = vld [vmem:[#allocation84_spill] sm:$0xff] }
 0x2df   :  { %v2146_v52 = vrot.slane %v2145_v41, 1  ;;  %v2207_v1 = vmax.f32 %v11588_v37, %v11587_v7  ;;  %v11590_v46 = vpack.i.bf16 %v11589_v42, %v11589_v42  ;;  %v2187_v4 = vmax.f32 %v11585_v57, %v2186_v55 }
 0x2e0   :  { %v1675_v28 = vpack.i.bf16 %v1674_v58, %v1674_v58  ;;  %v2168_v20 = vrot.slane %v2167_v23, 1  ;;  %v11591_v31 = vpack.i.bf16 %v9413_v35, %v9413_v35  ;;  %v3522_v47 = vunpack.c.l.b16 %v2104_v17 }
 0x2e1   :  { %v3518_v53 = vunpack.c.l.b16 %v11590_v46  ;;  %v2147_v21 = vmax.f32 %v2145_v41, %v2146_v52  ;;  %v2208_v32 = vrot.slane %v2207_v1, 4  ;;  %v3524_v5 = vunpack.c.l.b16 %v2126_v12  ;;  %v7180_v41 = vld [vmem:[%s11201_s3 + $0x100] ss:$8 sps:$4 sm:$0xff]   ;;  %v7188_v52 = vld [vmem:[%s11201_s3 + $0x114] ss:$8 sps:$4 sm:$0xff]  }
 0x2e2   :  { %v3520_v56 = vunpack.c.l.b16 %v11591_v31  ;;  %v3376_v62 = vunpack.c.l.b16 %v1675_v28  ;;  %v2188_v0 = vrot.slane %v2187_v4, 2  ;;  %v2169_v3 = vmax.f32 %v2167_v23, %v2168_v20  ;;  %v11594_v20 = vld [vmem:[#allocation8_spill] sm:$0xff] }
 0x2e3   :  { %v2148_v40 = vpack.i.bf16 %v2147_v21, %v2147_v21  ;;  %v2209_v44 = vmax.f32 %v2207_v1, %v2208_v32  ;;  %v1709_v48 = vrot.slane %v11592_v11, 2  ;;  %v1731_v18 = vrot.slane %v9430_v34, 2  ;;  %v7186_v21 = vld [vmem:[%s11201_s3 + $0x110] ss:$8 sps:$4 sm:$0xff]  }
 0x2e4   :  { %v3534_v16 = vsel %vm3378_vm0, %v3520_v56, %v3518_v53  ;;  %v3390_v35 = vsel %vm2405_vm10, %v3376_v62, %v3389_v27  ;;  %v2189_v49 = vmax.f32 %v2187_v4, %v2188_v0  ;;  %v2170_v29 = vpack.i.bf16 %v2169_v3, %v2169_v3 }
 0x2e5   :  { %v2210_v17 = vrot.slane %v2209_v44, 2  ;;  %v3526_v59 = vunpack.c.l.b16 %v2148_v40  ;;  %v3398_v33 = vpack.c.b16 %v3390_v35, %v3390_v35  ;;  %v3535_v15 = vsel %vm3380_vm12, %v3522_v47, %v3534_v16 }
 0x2e6   :  { %v1710_v58 = vmax.f32 %v11592_v11, %v1709_v48  ;;  %v2190_v57 = vrot.slane %v2189_v49, 1  ;;  %v3536_v38 = vsel %vm3382_vm14, %v3524_v5, %v3535_v15  ;;  %v1732_v7 = vmax.f32 %v9430_v34, %v1731_v18  ;;  %v11597_v11 = vld [vmem:[#allocation30_spill] sm:$0xff] }
 0x2e7   :  { %v2211_v55 = vmax.f32 %v2209_v44, %v2210_v17  ;;  %5817 = vmatmul.mubr.bf16.vlgmr.msra.gmra.mrb[64].mxu0 %v3398_v33  ;;  %v3528_v37 = vunpack.c.l.b16 %v2170_v29  ;;  %v3537_v1 = vsel %vm3384_vm6, %v3526_v59, %v3536_v38  ;;  %v11593_v12 = vrot.slane %v9556_v14, 4  ;;  %v7192_v33 = vld [vmem:[%s11201_s3 + $0x120] ss:$8 sps:$4 sm:$0xff]  }
 0x2e8   :  { %v1711_v27 = vrot.slane %v1710_v58, 1  ;;  %5826 = vmatpush1.bf16.msra.mxu0 %v7180_v41  ;;  %v2191_v42 = vmax.f32 %v2189_v49, %v2190_v57  ;;  %v1733_v53 = vrot.slane %v1732_v7, 1  ;;  %v1773_v28 = vrot.slane %v9691_v43, 4 }
 0x2e9   :  { %v1752_v23 = vmax.f32 %v9556_v14, %v11593_v12  ;;  %v2212_v46 = vrot.slane %v2211_v55, 1  ;;  %v3538_v34 = vsel %vm3386_vm8, %v3528_v37, %v3537_v1  ;;  %v11595_v31 = vunpack.i.h.bf16 %v11594_v20  ;;  %5827 = vmatprep.subr.bf16.mxu0 %v7188_v52  ;;  %v7194_v14 = vld [vmem:[%s11201_s3 + $0x124] ss:$8 sps:$4 sm:$0xff]   ;;  %v7200_v52 = vld [vmem:[%s11201_s3 + $0x134] ss:$8 sps:$4 sm:$0xff]  }
 0x2ea   :  { %v1712_v4 = vmax.f32 %v1710_v58, %v1711_v27  ;;  %v11596_v56 = vunpack.i.l.bf16 %v11594_v20  ;;  %v2192_v5 = vpack.i.bf16 %v2191_v42, %v2191_v42  ;;  %v1734_v40 = vmax.f32 %v1732_v7, %v1733_v53  ;;  %v7183_v37 = vld [vmem:[%s11201_s3 + $0x400] ss:$8 sps:$4 sm:$0xff]  }
 0x2eb   :  { %v1753_v32 = vrot.slane %v1752_v23, 2  ;;  %v2213_v62 = vmax.f32 %v2211_v55, %v2212_v46  ;;  %v1774_v0 = vmax.f32 %v9691_v43, %v1773_v28  ;;  %v11598_v48 = vunpack.i.h.bf16 %v11597_v11 }
 0x2ec   :  { %v1794_v47 = vmax.f32 %v11596_v56, %v11595_v31  ;;  %v1713_v44 = vpack.i.bf16 %v1712_v4, %v1712_v4  ;;  %v11599_v18 = vunpack.i.l.bf16 %v11597_v11  ;;  %v3530_v49 = vunpack.c.l.b16 %v2192_v5  ;;  %5828 = vmatpush1.bf16.msra.mxu0 %v7186_v21  ;;  %v7198_v21 = vld [vmem:[%s11201_s3 + $0x130] ss:$8 sps:$4 sm:$0xff]   ;;  %v7191_v31 = vld [vmem:[%s11201_s3 + $0x414] ss:$8 sps:$4 sm:$0xff]  }
 0x2ed   :  { %v1754_v3 = vmax.f32 %v1752_v23, %v1753_v32  ;;  %v2214_v35 = vpack.i.bf16 %v2213_v62, %v2213_v62  ;;  %v1735_v17 = vpack.i.bf16 %v1734_v40, %v1734_v40  ;;  %v1775_v59 = vrot.slane %v1774_v0, 2  ;;  %5829 = vmatprep.subr.bf16.mxu0 %v7194_v14 }
 0x2ee   :  { %v1795_v16 = vrot.slane %v1794_v47, 4  ;;  %v1816_v41 = vmax.f32 %v11599_v18, %v11598_v48  ;;  %v1835_v58 = vsel %vm8321_vm11, %v11561_v26, 4286644096  ;;  %v3539_v55 = vsel %vm3388_vm9, %v3530_v49, %v3538_v34  ;;  %v7189_v18 = vld [vmem:[%s11201_s3 + $0x410] ss:$8 sps:$4 sm:$0xff]  }
 0x2ef   :  { %v1755_v29 = vrot.slane %v1754_v3, 1  ;;  %v3532_v57 = vunpack.c.l.b16 %v2214_v35  ;;  %v1776_v38 = vmax.f32 %v1774_v0, %v1775_v59  ;;  %v1836_v7 = vunpack.i.l.bf16 %v1835_v58 }
 0x2f0   :  { %v1796_v15 = vmax.f32 %v1794_v47, %v1795_v16  ;;  %v1817_v43 = vrot.slane %v1816_v41, 4  ;;  %v1837_v23 = vunpack.i.h.bf16 %v1835_v58  ;;  %v1857_v53 = vsel %vm8321_vm11, %v11562_v45, 4286644096  ;;  %5830 = vmatpush1.bf16.msra.mxu0 %v7192_v33  ;;  %v7197_v33 = vld [vmem:[%s11201_s3 + $0x424] ss:$8 sps:$4 sm:$0xff]  }
 0x2f1   :  { %v1756_v1 = vmax.f32 %v1754_v3, %v1755_v29  ;;  %v3540_v42 = vsel %vm2405_vm10, %v3532_v57, %v3539_v55  ;;  %v1777_v46 = vrot.slane %v1776_v38, 1  ;;  %v3419_v28 = vunpack.c.l.b16 %v1713_v44  ;;  %5831 = vmatprep.subr.bf16.mxu0 %v7200_v52  ;;  %v7212_v29 = vld [vmem:[%s11201_s3 + $0x154] ss:$8 sps:$4 sm:$0xff]  }
 0x2f2   :  { %v1797_v27 = vrot.slane %v1796_v15, 2  ;;  %v1818_v12 = vmax.f32 %v1816_v41, %v1817_v43  ;;  %v3548_v34 = vpack.c.b16 %v3540_v42, %v3540_v42  ;;  %v1838_v47 = vmax.f32 %v1836_v7, %v1837_v23  ;;  %v7204_v41 = vld [vmem:[%s11201_s3 + $0x140] ss:$8 sps:$4 sm:$0xff]  }
 0x2f3   :  { %v1757_v4 = vpack.i.bf16 %v1756_v1, %v1756_v1  ;;  %v1778_v56 = vmax.f32 %v1776_v38, %v1777_v46  ;;  %v1858_v14 = vunpack.i.l.bf16 %v1857_v53  ;;  %v1859_v5 = vunpack.i.h.bf16 %v1857_v53  ;;  %v7195_v42 = vld [vmem:[%s11201_s3 + $0x420] ss:$8 sps:$4 sm:$0xff]  }
 0x2f4   :  { %v1798_v32 = vmax.f32 %v1796_v15, %v1797_v27  ;;  %v1819_v20 = vrot.slane %v1818_v12, 2  ;;  %5940 = vmatmul.mubr.bf16.vlgmr.msra.gmra.mrb[32].mxu1 %v3548_v34  ;;  %v3421_v0 = vunpack.c.l.b16 %v1735_v17  ;;  %v1839_v16 = vrot.slane %v1838_v47, 4  ;;  %5832 = vmatpush1.bf16.msra.mxu0 %v7198_v21  ;;  %v7203_v21 = vld [vmem:[%s11201_s3 + $0x434] ss:$8 sps:$4 sm:$0xff]  }
 0x2f5   :  { %v3423_v44 = vunpack.c.l.b16 %v1757_v4  ;;  %5949 = vmatpush1.bf16.msra.mxu1 %v7183_v37  ;;  %v1779_v3 = vpack.i.bf16 %v1778_v56, %v1778_v56  ;;  %v1860_v11 = vmax.f32 %v1858_v14, %v1859_v5  ;;  %v2246_v48 = vrot.slane %v9242_v13, 2  ;;  %5833 = vmatprep.subr.bf16.mxu0 %v7206_v2 }
 0x2f6   :  { %v1799_v62 = vrot.slane %v1798_v32, 1  ;;  %v1820_v40 = vmax.f32 %v1818_v12, %v1819_v20  ;;  %v3441_v17 = vsel %vm3378_vm0, %v3421_v0, %v3419_v28  ;;  %v2268_v59 = vrot.slane %v9456_v19, 2  ;;  %5950 = vmatprep.subr.bf16.mxu1 %v7191_v31  ;;  %v7218_v20 = vld [vmem:[%s11201_s3 + $0x164] ss:$8 sps:$4 sm:$0xff]   ;;  %v7201_v0 = vld [vmem:[%s11201_s3 + $0x430] ss:$8 sps:$4 sm:$0xff]  }
 0x2f7   :  { %v1840_v15 = vmax.f32 %v1838_v47, %v1839_v16  ;;  %v1861_v43 = vrot.slane %v1860_v11, 4  ;;  %v3425_v58 = vunpack.c.l.b16 %v1779_v3  ;;  %v3442_v52 = vsel %vm3380_vm12, %v3423_v44, %v3441_v17 }
 0x2f8   :  { %v1800_v35 = vmax.f32 %v1798_v32, %v1799_v62  ;;  %v1821_v49 = vrot.slane %v1820_v40, 1  ;;  %v2247_v38 = vmax.f32 %v9242_v13, %v2246_v48  ;;  %v2269_v7 = vmax.f32 %v9456_v19, %v2268_v59  ;;  %5834 = vmatpush1.bf16.msra.mxu0 %v7204_v41  ;;  %v7210_v13 = vld [vmem:[%s11201_s3 + $0x150] ss:$8 sps:$4 sm:$0xff]  }
 0x2f9   :  { %v1841_v37 = vrot.slane %v1840_v15, 2  ;;  %v1862_v1 = vmax.f32 %v1860_v11, %v1861_v43  ;;  %v3443_v27 = vsel %vm3382_vm14, %v3425_v58, %v3442_v52  ;;  %v11600_v12 = vrot.slane %v9595_v36, 4  ;;  %5951 = vmatpush1.bf16.msra.mxu1 %v7189_v18  ;;  %5835 = vmatprep.subr.bf16.mxu0 %v7212_v29  ;;  %v11601_v11 = vld [vmem:[#allocation14_spill] sm:$0xff]  ;;  %v7224_v29 = vld [vmem:[%s11201_s3 + $0x174] ss:$8 sps:$4 sm:$0xff]  }
 0x2fa   :  { %v1801_v57 = vpack.i.bf16 %v1800_v35, %v1800_v35  ;;  %v1822_v55 = vmax.f32 %v1820_v40, %v1821_v49  ;;  %v2248_v53 = vrot.slane %v2247_v38, 1  ;;  %v2270_v28 = vrot.slane %v2269_v7, 1  ;;  %5952 = vmatprep.subr.bf16.mxu1 %v7197_v33  ;;  %v7216_v35 = vld [vmem:[%s11201_s3 + $0x160] ss:$8 sps:$4 sm:$0xff]   ;;  %v11604_v43 = vld [vmem:[#allocation33_spill] sm:$0xff] }
 0x2fb   :  { %v2289_v23 = vmax.f32 %v9595_v36, %v11600_v12  ;;  %v1842_v36 = vmax.f32 %v1840_v15, %v1841_v37  ;;  %v1863_v34 = vrot.slane %v1862_v1, 2  ;;  %v2310_v32 = vrot.slane %v9704_v30, 4  ;;  %v7207_v12 = vld [vmem:[%s11201_s3 + $0x440] ss:$8 sps:$4 sm:$0xff]  }
 0x2fc   :  { %v1823_v46 = vpack.i.bf16 %v1822_v55, %v1822_v55  ;;  %v3427_v19 = vunpack.c.l.b16 %v1801_v57  ;;  %v2249_v56 = vmax.f32 %v2247_v38, %v2248_v53  ;;  %v9962_v47 = vmax.f32 %v2269_v7, %v2270_v28  ;;  %5836 = vmatpush1.bf16.msra.mxu0 %v7210_v13 }
 0x2fd   :  { %v2290_v4 = vrot.slane %v2289_v23, 2  ;;  %v1843_v14 = vrot.slane %v1842_v36, 1  ;;  %v1864_v5 = vmax.f32 %v1862_v1, %v1863_v34  ;;  %v2311_v40 = vmax.f32 %v9704_v30, %v2310_v32  ;;  %5953 = vmatpush1.bf16.msra.mxu1 %v7195_v42  ;;  %v7209_v30 = vld [vmem:[%s11201_s3 + $0x444] ss:$8 sps:$4 sm:$0xff]   ;;  %5837 = vmatprep.subr.bf16.mxu0 %v7218_v20 }
 0x2fe   :  { %v3429_v31 = vunpack.c.l.b16 %v1823_v46  ;;  %v3444_v2 = vsel %vm3384_vm6, %v3427_v19, %v3443_v27  ;;  %v2250_v3 = vpack.i.bf16 %v2249_v56, %v2249_v56  ;;  %v2272_v16 = vpack.i.bf16 %v9962_v47, %v9962_v47  ;;  %5954 = vmatprep.subr.bf16.mxu1 %v7203_v21  ;;  %v7215_v19 = vld [vmem:[%s11201_s3 + $0x454] ss:$8 sps:$4 sm:$0xff]   ;;  %v7230_v34 = vld [vmem:[%s11201_s3 + $0x184] ss:$8 sps:$4 sm:$0xff]  }
 0x2ff   :  { %v2291_v62 = vmax.f32 %v2289_v23, %v2290_v4  ;;  %v11602_v48 = vunpack.i.h.bf16 %v11601_v11  ;;  %v11603_v18 = vunpack.i.l.bf16 %v11601_v11  ;;  %v1844_v49 = vmax.f32 %v1842_v36, %v1843_v14 }
 0x300   :  { %v3445_v44 = vsel %vm3386_vm8, %v3429_v31, %v3444_v2  ;;  %v1865_v17 = vrot.slane %v1864_v5, 1  ;;  %v2312_v33 = vrot.slane %v2311_v40, 2  ;;  %v11605_v58 = vunpack.i.h.bf16 %v11604_v43  ;;  %5838 = vmatpush1.bf16.msra.mxu0 %v7216_v35  ;;  %v7228_v35 = vld [vmem:[%s11201_s3 + $0x180] ss:$8 sps:$4 sm:$0xff]  }
 0x301   :  { %v2331_v41 = vmax.f32 %v11603_v18, %v11602_v48  ;;  %v2292_v59 = vrot.slane %v2291_v62, 1  ;;  %v11606_v52 = vunpack.i.l.bf16 %v11604_v43  ;;  %v2372_v55 = vsel %vm8337_vm2, %v11561_v26, 4286644096  ;;  %5955 = vmatpush1.bf16.msra.mxu1 %v7201_v0  ;;  %5839 = vmatprep.subr.bf16.mxu0 %v7224_v29  ;;  %v7221_v48 = vld [vmem:[%s11201_s3 + $0x464] ss:$8 sps:$4 sm:$0xff]  }
 0x302   :  { %v2394_v38 = vsel %vm8337_vm2, %v11562_v45, 4286644096  ;;  %v1845_v7 = vpack.i.bf16 %v1844_v49, %v1844_v49  ;;  %v1866_v37 = vmax.f32 %v1864_v5, %v1865_v17  ;;  %v2313_v27 = vmax.f32 %v2311_v40, %v2312_v33  ;;  %5956 = vmatprep.subr.bf16.mxu1 %v7209_v30  ;;  %v7213_v5 = vld [vmem:[%s11201_s3 + $0x450] ss:$8 sps:$4 sm:$0xff]   ;;  %v7236_v33 = vld [vmem:[%s11201_s3 + $0x194] ss:$8 sps:$4 sm:$0xff]  }
 0x303   :  { %v2332_v15 = vrot.slane %v2331_v41, 4  ;;  %v2353_v57 = vmax.f32 %v11606_v52, %v11605_v58  ;;  %v2293_v1 = vmax.f32 %v2291_v62, %v2292_v59  ;;  %v2373_v13 = vunpack.i.l.bf16 %v2372_v55 }
 0x304   :  { %v2374_v46 = vunpack.i.h.bf16 %v2372_v55  ;;  %v1867_v53 = vpack.i.bf16 %v1866_v37, %v1866_v37  ;;  %v3431_v28 = vunpack.c.l.b16 %v1845_v7  ;;  %v2314_v36 = vrot.slane %v2313_v27, 1  ;;  %5840 = vmatpush1.bf16.msra.mxu0 %v7222_v60  ;;  %v11607_v7 = vld [vmem:[#allocation77_spill] sm:$0xff] }
 0x305   :  { %v2333_v23 = vmax.f32 %v2331_v41, %v2332_v15  ;;  %v2354_v42 = vrot.slane %v2353_v57, 4  ;;  %v2294_v21 = vpack.i.bf16 %v2293_v1, %v2293_v1  ;;  %v2395_v31 = vunpack.i.l.bf16 %v2394_v38  ;;  %5957 = vmatpush1.bf16.msra.mxu1 %v7207_v12  ;;  %5841 = vmatprep.subr.bf16.mxu0 %v7230_v34  ;;  %v7234_v12 = vld [vmem:[%s11201_s3 + $0x190] ss:$8 sps:$4 sm:$0xff]  }
 0x306   :  { %v2375_v20 = vmax.f32 %v2373_v13, %v2374_v46  ;;  %v3433_v2 = vunpack.c.l.b16 %v1867_v53  ;;  %v3446_v56 = vsel %vm3388_vm9, %v3431_v28, %v3445_v44  ;;  %v2315_v47 = vmax.f32 %v2313_v27, %v2314_v36  ;;  %5958 = vmatprep.subr.bf16.mxu1 %v7215_v19  ;;  %v7242_v28 = vld [vmem:[%s11201_s3 + $0x1a4] ss:$8 sps:$4 sm:$0xff]   ;;  %v7225_v36 = vld [vmem:[%s11201_s3 + $0x470] ss:$8 sps:$4 sm:$0xff]  }
 0x307   :  { %v2334_v4 = vrot.slane %v2333_v23, 2  ;;  %v2355_v32 = vmax.f32 %v2353_v57, %v2354_v42  ;;  %v2396_v14 = vunpack.i.h.bf16 %v2394_v38  ;;  %v3569_v11 = vunpack.c.l.b16 %v2250_v3  ;;  %v7227_v38 = vld [vmem:[%s11201_s3 + $0x474] ss:$8 sps:$4 sm:$0xff]  }
 0x308   :  { %v2376_v0 = vrot.slane %v2375_v20, 4  ;;  %v3447_v18 = vsel %vm2405_vm10, %v3433_v2, %v3446_v56  ;;  %v2316_v44 = vpack.i.bf16 %v2315_v47, %v2315_v47  ;;  %v3571_v30 = vunpack.c.l.b16 %v2272_v16  ;;  %v7219_v16 = vld [vmem:[%s11201_s3 + $0x460] ss:$8 sps:$4 sm:$0xff]   ;;  %5842 = vmatpush1.bf16.msra.mxu0 %v7228_v35  ;;  %v7233_v2 = vld [vmem:[%s11201_s3 + $0x484] ss:$8 sps:$4 sm:$0xff]  }
 0x309   :  { %v2335_v62 = vmax.f32 %v2333_v23, %v2334_v4  ;;  %v2356_v40 = vrot.slane %v2355_v32, 2  ;;  %v2397_v41 = vmax.f32 %v2395_v31, %v2396_v14  ;;  %v3449_v49 = vpack.c.b16 %v3447_v18, %v3447_v18  ;;  %5959 = vmatpush1.bf16.msra.mxu1 %v7213_v5  ;;  %5843 = vmatprep.subr.bf16.mxu0 %v7236_v33  ;;  %v7240_v14 = vld [vmem:[%s11201_s3 + $0x1a0] ss:$8 sps:$4 sm:$0xff]  }
 0x30a   :  { %v2377_v3 = vmax.f32 %v2375_v20, %v2376_v0  ;;  %v3573_v15 = vunpack.c.l.b16 %v2294_v21  ;;  %v3575_v43 = vunpack.c.l.b16 %v2316_v44  ;;  %v3591_v58 = vsel %vm3378_vm0, %v3571_v30, %v3569_v11  ;;  %5960 = vmatprep.subr.bf16.mxu1 %v7221_v48  ;;  %v7248_v48 = vld [vmem:[%s11201_s3 + $0x1b4] ss:$8 sps:$4 sm:$0xff]   ;;  %v11609_v35 = vld [vmem:[#allocation7_spill] sm:$0xff] }
 0x30b   :  { %v2336_v17 = vrot.slane %v2335_v62, 1  ;;  %v2357_v59 = vmax.f32 %v2355_v32, %v2356_v40  ;;  %v2398_v29 = vrot.slane %v2397_v41, 4  ;;  %5857 = vmatprep.mubr.bf16.mxu0 %v3449_v49  ;;  %v1700_v37 = vrot.slane %v11607_v7, 1 }
 0x30c   :  { %v2378_v55 = vrot.slane %v2377_v3, 2  ;;  %v3592_v27 = vsel %vm3380_vm12, %v3573_v15, %v3591_v58  ;;  %v1722_v23 = vrot.slane %v9399_v10, 1  ;;  %v11608_v42 = vrot.slane %v9533_v61, 2  ;;  %5844 = vmatpush1.bf16.msra.mxu0 %v7234_v12  ;;  %v11613_v58 = vld [vmem:[#allocation46_spill] sm:$0xff] }
 0x30d   :  { %v2337_v52 = vmax.f32 %v2335_v62, %v2336_v17  ;;  %v2358_v57 = vrot.slane %v2357_v59, 1  ;;  %v2399_v1 = vmax.f32 %v2397_v41, %v2398_v29  ;;  %v3593_v53 = vsel %vm3382_vm14, %v3575_v43, %v3592_v27  ;;  %5961 = vmatpush1.bf16.msra.mxu1 %v7219_v16  ;;  %5845 = vmatprep.subr.bf16.mxu0 %v7242_v28  ;;  %v7231_v41 = vld [vmem:[%s11201_s3 + $0x480] ss:$8 sps:$4 sm:$0xff]   ;;  %v11610_v17 = vld [vmem:[#allocation25_spill] sm:$0xff] }
 0x30e   :  { %v1743_v13 = vmax.f32 %v9533_v61, %v11608_v42  ;;  %v2379_v60 = vmax.f32 %v2377_v3, %v2378_v55  ;;  %v1701_v34 = vmax.f32 %v11607_v7, %v1700_v37  ;;  %v1723_v61 = vmax.f32 %v9399_v10, %v1722_v23  ;;  %5962 = vmatprep.subr.bf16.mxu1 %v7227_v38  ;;  %v7246_v38 = vld [vmem:[%s11201_s3 + $0x1b0] ss:$8 sps:$4 sm:$0xff]   ;;  %v7254_v23 = vld [vmem:[%s11201_s3 + $0x1c4] ss:$8 sps:$4 sm:$0xff]  }
 0x30f   :  { %v2338_v46 = vpack.i.bf16 %v2337_v52, %v2337_v52  ;;  %v2359_v19 = vmax.f32 %v2357_v59, %v2358_v57  ;;  %v2400_v21 = vrot.slane %v2399_v1, 2  ;;  %v1764_v56 = vrot.slane %v9668_v24, 2 }
 0x310   :  { %v1744_v4 = vrot.slane %v1743_v13, 1  ;;  %v2380_v20 = vrot.slane %v2379_v60, 1  ;;  %v1702_v5 = vpack.i.bf16 %v1701_v34, %v1701_v34  ;;  %v1724_v62 = vpack.i.bf16 %v1723_v61, %v1723_v61  ;;  %5846 = vmatpush1.bf16.msra.mxu0 %v7240_v14  ;;  %v7245_v34 = vld [vmem:[%s11201_s3 + $0x4a4] ss:$8 sps:$4 sm:$0xff]   ;;  %v7260_v14 = vld [vmem:[%s11201_s3 + $0x1d4] ss:$8 sps:$4 sm:$0xff]  }
 0x311   :  { %v2360_v32 = vpack.i.bf16 %v2359_v19, %v2359_v19  ;;  %v3577_v31 = vunpack.c.l.b16 %v2338_v46  ;;  %v2401_v47 = vmax.f32 %v2399_v1, %v2400_v21  ;;  %v1765_v18 = vmax.f32 %v9668_v24, %v1764_v56  ;;  %5963 = vmatpush1.bf16.msra.mxu1 %v7225_v36  ;;  %v7239_v24 = vld [vmem:[%s11201_s3 + $0x494] ss:$8 sps:$4 sm:$0xff]   ;;  %v11616_v1 = vld [vmem:[#allocation3_spill] sm:$0xff]  ;;  %5847 = vmatprep.subr.bf16.mxu0 %v7248_v48 }
 0x312   :  { %v1745_v10 = vmax.f32 %v1743_v13, %v1744_v4  ;;  %v2381_v40 = vmax.f32 %v2379_v60, %v2380_v20  ;;  %v1784_v49 = vrot.slane %v11609_v35, 4  ;;  %v11611_v59 = vunpack.i.h.bf16 %v11610_v17  ;;  %5964 = vmatprep.subr.bf16.mxu1 %v7233_v2  ;;  %v7237_v60 = vld [vmem:[%s11201_s3 + $0x490] ss:$8 sps:$4 sm:$0xff]   ;;  %v7243_v48 = vld [vmem:[%s11201_s3 + $0x4a0] ss:$8 sps:$4 sm:$0xff]  }
 0x313   :  { %v3579_v0 = vunpack.c.l.b16 %v2360_v32  ;;  %v3594_v11 = vsel %vm3384_vm6, %v3577_v31, %v3593_v53  ;;  %v2402_v44 = vrot.slane %v2401_v47, 1  ;;  %v11612_v3 = vunpack.i.l.bf16 %v11610_v17  ;;  %v7252_v31 = vld [vmem:[%s11201_s3 + $0x1c0] ss:$8 sps:$4 sm:$0xff]  }
 0x314   :  { %v1746_v30 = vpack.i.bf16 %v1745_v10, %v1745_v10  ;;  %v2382_v29 = vpack.i.bf16 %v2381_v40, %v2381_v40  ;;  %v1766_v43 = vrot.slane %v1765_v18, 1  ;;  %v11614_v16 = vunpack.i.h.bf16 %v11613_v58  ;;  %5848 = vmatpush1.bf16.msra.mxu0 %v7246_v38  ;;  %v7249_v38 = vld [vmem:[%s11201_s3 + $0x4b0] ss:$8 sps:$4 sm:$0xff]  }
 0x315   :  { %v1805_v33 = vmax.f32 %v11612_v3, %v11611_v59  ;;  %v3595_v15 = vsel %vm3386_vm8, %v3579_v0, %v3594_v11  ;;  %v11615_v52 = vunpack.i.l.bf16 %v11613_v58  ;;  %v2403_v55 = vmax.f32 %v2401_v47, %v2402_v44  ;;  %5965 = vmatpush1.bf16.msra.mxu1 %v7231_v41  ;;  %5849 = vmatprep.subr.bf16.mxu0 %v7254_v23  ;;  %v7258_v59 = vld [vmem:[%s11201_s3 + $0x1d0] ss:$8 sps:$4 sm:$0xff]   ;;  %v7257_v23 = vld [vmem:[%s11201_s3 + $0x4c4] ss:$8 sps:$4 sm:$0xff]  }
 0x316   :  { %v1785_v7 = vmax.f32 %v11609_v35, %v1784_v49  ;;  %v1847_v27 = vunpack.i.l.bf16 %v11616_v1  ;;  %v3581_v12 = vunpack.c.l.b16 %v2382_v29  ;;  %v1767_v42 = vmax.f32 %v1765_v18, %v1766_v43  ;;  %5966 = vmatprep.subr.bf16.mxu1 %v7239_v24  ;;  %v7251_v35 = vld [vmem:[%s11201_s3 + $0x4b4] ss:$8 sps:$4 sm:$0xff]   ;;  %v7266_v43 = vld [vmem:[%s11201_s3 + $0x1e4] ss:$8 sps:$4 sm:$0xff]  }
 0x317   :  { %v1827_v57 = vmax.f32 %v11615_v52, %v11614_v16  ;;  %v1806_v37 = vrot.slane %v1805_v33, 4  ;;  %v1848_v46 = vunpack.i.h.bf16 %v11616_v1  ;;  %v2404_v19 = vpack.i.bf16 %v2403_v55, %v2403_v55 }
 0x318   :  { %v1786_v53 = vrot.slane %v1785_v7, 2  ;;  %v3418_v21 = vunpack.c.l.b16 %v1702_v5  ;;  %v3596_v36 = vsel %vm3388_vm9, %v3581_v12, %v3595_v15  ;;  %v1768_v61 = vpack.i.bf16 %v1767_v42, %v1767_v42  ;;  %5850 = vmatpush1.bf16.msra.mxu0 %v7252_v31  ;;  %v11617_v15 = vld [vmem:[#allocation83_spill] sm:$0xff] }
 0x319   :  { %v1828_v13 = vrot.slane %v1827_v57, 4  ;;  %v1807_v28 = vmax.f32 %v1805_v33, %v1806_v37  ;;  %v1849_v32 = vmax.f32 %v1847_v27, %v1848_v46  ;;  %v3583_v20 = vunpack.c.l.b16 %v2404_v19  ;;  %5967 = vmatpush1.bf16.msra.mxu1 %v7237_v60  ;;  %5851 = vmatprep.subr.bf16.mxu0 %v7260_v14  ;;  %v11619_v27 = vld [vmem:[#allocation87_spill] sm:$0xff]  ;;  %v7263_v14 = vld [vmem:[%s11201_s3 + $0x4d4] ss:$8 sps:$4 sm:$0xff]  }
 0x31a   :  { %v1787_v2 = vmax.f32 %v1785_v7, %v1786_v53  ;;  %v3420_v47 = vunpack.c.l.b16 %v1724_v62  ;;  %v3422_v40 = vunpack.c.l.b16 %v1746_v30  ;;  %v3424_v0 = vunpack.c.l.b16 %v1768_v61  ;;  %5968 = vmatprep.subr.bf16.mxu1 %v7245_v34  ;;  %v7264_v19 = vld [vmem:[%s11201_s3 + $0x1e0] ss:$8 sps:$4 sm:$0xff]  }
 0x31b   :  { %v1829_v4 = vmax.f32 %v1827_v57, %v1828_v13  ;;  %v1808_v56 = vrot.slane %v1807_v28, 2  ;;  %v1850_v10 = vrot.slane %v1849_v32, 4  ;;  %v3597_v11 = vsel %vm2405_vm10, %v3583_v20, %v3596_v36  ;;  %v7272_v36 = vld [vmem:[%s11201_s3 + $0x1f4] ss:$8 sps:$4 sm:$0xff]  }
 0x31c   :  { %v1788_v18 = vrot.slane %v1787_v2, 1  ;;  %v3434_v62 = vsel %vm3378_vm0, %v3420_v47, %v3418_v21  ;;  %v3599_v41 = vpack.c.b16 %v3597_v11, %v3597_v11  ;;  %v2237_v24 = vrot.slane %v11617_v15, 1  ;;  %5852 = vmatpush1.bf16.msra.mxu0 %v7258_v59 }
 0x31d   :  { %v1830_v5 = vrot.slane %v1829_v4, 2  ;;  %v1809_v44 = vmax.f32 %v1807_v28, %v1808_v56  ;;  %v1851_v30 = vmax.f32 %v1849_v32, %v1850_v10  ;;  %v3435_v17 = vsel %vm3380_vm12, %v3422_v40, %v3434_v62  ;;  %5969 = vmatpush1.bf16.msra.mxu1 %v7243_v48  ;;  %5853 = vmatprep.subr.bf16.mxu0 %v7266_v43  ;;  %v7255_v32 = vld [vmem:[%s11201_s3 + $0x4c0] ss:$8 sps:$4 sm:$0xff]   ;;  %v11620_v56 = vld [vmem:[#allocation13_spill] sm:$0xff] }
 0x31e   :  { %v1789_v3 = vmax.f32 %v1787_v2, %v1788_v18  ;;  %v3436_v29 = vsel %vm3382_vm14, %v3424_v0, %v3435_v17  ;;  %5980 = vmatprep.mubr.bf16.mxu1 %v3599_v41  ;;  %v2259_v52 = vrot.slane %v9415_v6, 1  ;;  %v11618_v57 = vrot.slane %v9546_v8, 2  ;;  %5970 = vmatprep.subr.bf16.mxu1 %v7251_v35  ;;  %v11621_v0 = vld [vmem:[#allocation28_spill] sm:$0xff] }
 0x31f   :  { %v1831_v49 = vmax.f32 %v1829_v4, %v1830_v5  ;;  %v1810_v33 = vrot.slane %v1809_v44, 1  ;;  %v1852_v16 = vrot.slane %v1851_v30, 2  ;;  %v2238_v1 = vmax.f32 %v11617_v15, %v2237_v24  ;;  %v11627_v24 = vld [vmem:[#allocation65_spill] sm:$0xff] }
 0x320   :  { %v2280_v55 = vmax.f32 %v9546_v8, %v11618_v57  ;;  %v1790_v7 = vpack.i.bf16 %v1789_v3, %v1789_v3  ;;  %v2301_v12 = vrot.slane %v11619_v27, 2  ;;  %v2260_v8 = vmax.f32 %v9415_v6, %v2259_v52  ;;  %5854 = vmatpush1.bf16.msra.mxu0 %v7264_v19  ;;  %v7276_v19 = vld [vmem:[%s11201_s3 + $0x200] ss:$8 sps:$4 sm:$0xff]  }
 0x321   :  { %v1832_v58 = vrot.slane %v1831_v49, 1  ;;  %v1811_v37 = vmax.f32 %v1809_v44, %v1810_v33  ;;  %v1853_v13 = vmax.f32 %v1851_v30, %v1852_v16  ;;  %v2239_v28 = vpack.i.bf16 %v2238_v1, %v2238_v1  ;;  %5971 = vmatpush1.bf16.msra.mxu1 %v7249_v38  ;;  %v7270_v44 = vld [vmem:[%s11201_s3 + $0x1f0] ss:$8 sps:$4 sm:$0xff]   ;;  %5855 = vmatprep.subr.bf16.mxu0 %v7272_v36  ;;  %v7269_v38 = vld [vmem:[%s11201_s3 + $0x4e4] ss:$8 sps:$4 sm:$0xff]  }
 0x322   :  { %v2281_v46 = vrot.slane %v2280_v55, 1  ;;  %v3426_v53 = vunpack.c.l.b16 %v1790_v7  ;;  %v2302_v21 = vmax.f32 %v11619_v27, %v2301_v12  ;;  %v2261_v4 = vpack.i.bf16 %v2260_v8, %v2260_v8  ;;  %5972 = vmatprep.subr.bf16.mxu1 %v7257_v23  ;;  %v7267_v8 = vld [vmem:[%s11201_s3 + $0x4e0] ss:$8 sps:$4 sm:$0xff]  }
 0x323   :  { %v1833_v42 = vmax.f32 %v1831_v49, %v1832_v58  ;;  %v1812_v60 = vpack.i.bf16 %v1811_v37, %v1811_v37  ;;  %v1854_v61 = vrot.slane %v1853_v13, 1  ;;  %v2321_v47 = vrot.slane %v11620_v56, 4  ;;  %v11624_v49 = vld [vmem:[#allocation49_spill] sm:$0xff] }
 0x324   :  { %v2282_v6 = vmax.f32 %v2280_v55, %v2281_v46  ;;  %v3437_v31 = vsel %vm3384_vm6, %v3426_v53, %v3436_v29  ;;  %v2303_v2 = vrot.slane %v2302_v21, 1  ;;  %v11622_v11 = vunpack.i.h.bf16 %v11621_v0  ;;  %v7278_v29 = vld [vmem:[%s11201_s3 + $0x204] ss:$8 sps:$4 sm:$0xff]   ;;  %v7261_v58 = vld [vmem:[%s11201_s3 + $0x4d0] ss:$8 sps:$4 sm:$0xff]   ;;  %5856 = vmatpush1.bf16.msra.mxu0 %v7270_v44 }
 0x325   :  { %v1834_v34 = vpack.i.bf16 %v1833_v42, %v1833_v42  ;;  %v3428_v20 = vunpack.c.l.b16 %v1812_v60  ;;  %v1855_v5 = vmax.f32 %v1853_v13, %v1854_v61  ;;  %v11623_v48 = vunpack.i.l.bf16 %v11621_v0  ;;  %5973 = vmatpush1.bf16.msra.mxu1 %v7255_v32  ;;  %5866 = vmatprep.subr.bf16.mxu0 %v7278_v29  ;;  %v7273_v0 = vld [vmem:[%s11201_s3 + $0x4f0] ss:$8 sps:$4 sm:$0xff]  }
 0x326   :  { %v2283_v40 = vpack.i.bf16 %v2282_v6, %v2282_v6  ;;  %v2304_v41 = vmax.f32 %v2302_v21, %v2303_v2  ;;  %v2322_v35 = vmax.f32 %v11620_v56, %v2321_v47  ;;  %v11625_v30 = vunpack.i.h.bf16 %v11624_v49  ;;  %5974 = vmatprep.subr.bf16.mxu1 %v7263_v14  ;;  %v7275_v6 = vld [vmem:[%s11201_s3 + $0x4f4] ss:$8 sps:$4 sm:$0xff]  }
 0x327   :  { %v3430_v10 = vunpack.c.l.b16 %v1834_v34  ;;  %v2342_v18 = vmax.f32 %v11623_v48, %v11622_v11  ;;  %v3438_v62 = vsel %vm3386_vm8, %v3428_v20, %v3437_v31  ;;  %v11626_v17 = vunpack.i.l.bf16 %v11624_v49  ;;  %v11628_v31 = vld [vmem:[#allocation85_spill] sm:$0xff]  ;;  %v11630_v44 = vld [vmem:[#allocation112_spill] sm:$0xff] }
 0x328   :  { %v1856_v3 = vpack.i.bf16 %v1855_v5, %v1855_v5  ;;  %v2384_v43 = vunpack.i.l.bf16 %v11627_v24  ;;  %v2305_v16 = vpack.i.bf16 %v2304_v41, %v2304_v41  ;;  %v2323_v52 = vrot.slane %v2322_v35, 2  ;;  %v11629_v56 = vld [vmem:[#allocation101_spill] sm:$0xff] }
 0x329   :  { %v2364_v59 = vmax.f32 %v11626_v17, %v11625_v30  ;;  %v3439_v33 = vsel %vm3388_vm9, %v3430_v10, %v3438_v62  ;;  %v2343_v15 = vrot.slane %v2342_v18, 4  ;;  %v2385_v55 = vunpack.i.h.bf16 %v11627_v24  ;;  %5975 = vmatpush1.bf16.msra.mxu1 %v7261_v58 }
 0x32a   :  { %v3432_v7 = vunpack.c.l.b16 %v1856_v3  ;;  %v3568_v1 = vunpack.c.l.b16 %v2239_v28  ;;  %v3570_v27 = vunpack.c.l.b16 %v2261_v4  ;;  %v2324_v12 = vmax.f32 %v2322_v35, %v2323_v52  ;;  %v7284_v4 = vld [vmem:[%s11201_s3 + $0x214] ss:$8 sps:$4 sm:$0xff]   ;;  %5976 = vmatprep.subr.bf16.mxu1 %v7269_v38  ;;  %v7282_v35 = vld [vmem:[%s11201_s3 + $0x210] ss:$8 sps:$4 sm:$0xff]  }
 0x32b   :  { %v2365_v57 = vrot.slane %v2364_v59, 4  ;;  %v2344_v37 = vmax.f32 %v2342_v18, %v2343_v15  ;;  %v2386_v42 = vmax.f32 %v2384_v43, %v2385_v55  ;;  %v3572_v13 = vunpack.c.l.b16 %v2283_v40  ;;  %v7281_v15 = vld [vmem:[%s11201_s3 + $0x504] ss:$8 sps:$4 sm:$0xff]  }
 0x32c   :  { %v3440_v46 = vsel %vm2405_vm10, %v3432_v7, %v3439_v33  ;;  %v3574_v53 = vunpack.c.l.b16 %v2305_v16  ;;  %v3584_v28 = vsel %vm3378_vm0, %v3570_v27, %v3568_v1  ;;  %v2325_v36 = vrot.slane %v2324_v12, 1  ;;  %v7290_v33 = vld [vmem:[%s11201_s3 + $0x224] ss:$8 sps:$4 sm:$0xff]   ;;  %v7288_v27 = vld [vmem:[%s11201_s3 + $0x220] ss:$8 sps:$4 sm:$0xff]  }
 0x32d   :  { %v2366_v23 = vmax.f32 %v2364_v59, %v2365_v57  ;;  %v2345_v60 = vrot.slane %v2344_v37, 2  ;;  %v3448_v21 = vpack.c.b16 %v3440_v46, %v3440_v46  ;;  %v2387_v61 = vrot.slane %v2386_v42, 4  ;;  %5977 = vmatpush1.bf16.msra.mxu1 %v7267_v8  ;;  %v11632_v59 = vld [vmem:[#allocation121_spill] sm:$0xff] }
 0x32e   :  { %v3585_v20 = vsel %vm3380_vm12, %v3572_v13, %v3584_v28  ;;  %v1888_v2 = vrot.slane %v11628_v31, 2  ;;  %v1910_v47 = vrot.slane %v11629_v56, 2  ;;  %v2326_v14 = vmax.f32 %v2324_v12, %v2325_v36  ;;  %5978 = vmatprep.subr.bf16.mxu1 %v7275_v6  ;;  %v7296_v8 = vld [vmem:[%s11201_s3 + $0x234] ss:$8 sps:$4 sm:$0xff]  }
 0x32f   :  { %v2367_v34 = vrot.slane %v2366_v23, 2  ;;  %v2346_v32 = vmax.f32 %v2344_v37, %v2345_v60  ;;  %5858 = vmatmul.mubr.bf16.vlgmr.msra.gmra.mrb[64].mxu0 %v3448_v21  ;;  %v2388_v10 = vmax.f32 %v2386_v42, %v2387_v61  ;;  %v3586_v40 = vsel %vm3382_vm14, %v3574_v53, %v3585_v20 }
 0x330   :  { %5867 = vmatpush1.bf16.msra.mxu0 %v7276_v19  ;;  %v1889_v48 = vmax.f32 %v11628_v31, %v1888_v2  ;;  %v1911_v18 = vmax.f32 %v11629_v56, %v1910_v47  ;;  %v11631_v62 = vrot.slane %v11630_v44, 4  ;;  %v2327_v49 = vpack.i.bf16 %v2326_v14, %v2326_v14  ;;  %v11636_v31 = vld [vmem:[#allocation31_spill] sm:$0xff] }
 0x331   :  { %v2368_v5 = vmax.f32 %v2366_v23, %v2367_v34  ;;  %v2347_v11 = vrot.slane %v2346_v32, 1  ;;  %v2389_v17 = vrot.slane %v2388_v10, 2  ;;  %v1952_v3 = vrot.slane %v11632_v59, 4  ;;  %5868 = vmatprep.subr.bf16.mxu0 %v7284_v4  ;;  %5979 = vmatpush1.bf16.msra.mxu1 %v7273_v0  ;;  %v11633_v34 = vld [vmem:[#allocation9_spill] sm:$0xff] }
 0x332   :  { %v1931_v41 = vmax.f32 %v11630_v44, %v11631_v62  ;;  %v1890_v24 = vrot.slane %v1889_v48, 1  ;;  %v1912_v43 = vrot.slane %v1911_v18, 1  ;;  %v3576_v57 = vunpack.c.l.b16 %v2327_v49  ;;  %5989 = vmatprep.subr.bf16.mxu1 %v7281_v15  ;;  %v7300_v15 = vld [vmem:[%s11201_s3 + $0x240] ss:$8 sps:$4 sm:$0xff]  }
 0x333   :  { %v2369_v30 = vrot.slane %v2368_v5, 1  ;;  %v2348_v29 = vmax.f32 %v2346_v32, %v2347_v11  ;;  %v2390_v52 = vmax.f32 %v2388_v10, %v2389_v17  ;;  %v1953_v55 = vmax.f32 %v11632_v59, %v1952_v3  ;;  %v7294_v10 = vld [vmem:[%s11201_s3 + $0x230] ss:$8 sps:$4 sm:$0xff]  }
 0x334   :  { %v1932_v58 = vrot.slane %v1931_v41, 2  ;;  %v1891_v7 = vmax.f32 %v1889_v48, %v1890_v24  ;;  %v1913_v37 = vmax.f32 %v1911_v18, %v1912_v43  ;;  %5869 = vmatpush1.bf16.msra.mxu0 %v7282_v35  ;;  %v3587_v42 = vsel %vm3384_vm6, %v3576_v57, %v3586_v40  ;;  %v7302_v18 = vld [vmem:[%s11201_s3 + $0x244] ss:$8 sps:$4 sm:$0xff]   ;;  %v7279_v43 = vld [vmem:[%s11201_s3 + $0x500] ss:$8 sps:$4 sm:$0xff]  }
 0x335   :  { %v2370_v16 = vmax.f32 %v2368_v5, %v2369_v30  ;;  %v2349_v38 = vpack.i.bf16 %v2348_v29, %v2348_v29  ;;  %v2391_v23 = vrot.slane %v2390_v52, 1  ;;  %v1954_v13 = vrot.slane %v1953_v55, 2  ;;  %5870 = vmatprep.subr.bf16.mxu0 %v7290_v33 }
 0x336   :  { %v1933_v1 = vmax.f32 %v1931_v41, %v1932_v58  ;;  %v1892_v19 = vpack.i.bf16 %v1891_v7, %v1891_v7  ;;  %v1914_v60 = vpack.i.bf16 %v1913_v37, %v1913_v37  ;;  %v11634_v61 = vunpack.i.h.bf16 %v11633_v34  ;;  %v7287_v37 = vld [vmem:[%s11201_s3 + $0x514] ss:$8 sps:$4 sm:$0xff]  }
 0x337   :  { %v2371_v12 = vpack.i.bf16 %v2370_v16, %v2370_v16  ;;  %v3578_v46 = vunpack.c.l.b16 %v2349_v38  ;;  %v2392_v28 = vmax.f32 %v2390_v52, %v2391_v23  ;;  %v1955_v36 = vmax.f32 %v1953_v55, %v1954_v13 }
 0x338   :  { %v1934_v53 = vrot.slane %v1933_v1, 1  ;;  %v11635_v4 = vunpack.i.l.bf16 %v11633_v34  ;;  %v11637_v2 = vunpack.i.h.bf16 %v11636_v31  ;;  %v11638_v56 = vunpack.i.l.bf16 %v11636_v31  ;;  %5871 = vmatpush1.bf16.msra.mxu0 %v7288_v27 }
 0x339   :  { %v3580_v21 = vunpack.c.l.b16 %v2371_v12  ;;  %v3588_v32 = vsel %vm3386_vm8, %v3578_v46, %v3587_v42  ;;  %v2014_v5 = vsel %vm8326_vm15, %v11561_v26, 4286644096  ;;  %v2393_v40 = vpack.i.bf16 %v2392_v28, %v2392_v28  ;;  %5872 = vmatprep.subr.bf16.mxu0 %v7296_v8  ;;  %v11640_v46 = vld [vmem:[#allocation93_spill] sm:$0xff] }
 0x33a   :  { %v1973_v6 = vmax.f32 %v11635_v4, %v11634_v61  ;;  %v1935_v20 = vmax.f32 %v1933_v1, %v1934_v53  ;;  %v1995_v47 = vmax.f32 %v11638_v56, %v11637_v2  ;;  %v1956_v11 = vrot.slane %v1955_v36, 1  ;;  %v7306_v53 = vld [vmem:[%s11201_s3 + $0x250] ss:$8 sps:$4 sm:$0xff]  }
 0x33b   :  { %v3589_v0 = vsel %vm3388_vm9, %v3580_v21, %v3588_v32  ;;  %v2015_v41 = vunpack.i.l.bf16 %v2014_v5  ;;  %v2016_v35 = vunpack.i.h.bf16 %v2014_v5  ;;  %v3582_v26 = vunpack.c.l.b16 %v2393_v40  ;;  %v7314_v32 = vld [vmem:[%s11201_s3 + $0x264] ss:$8 sps:$4 sm:$0xff]  }
 0x33c   :  { %v1974_v48 = vrot.slane %v1973_v6, 4  ;;  %v1936_v44 = vpack.i.bf16 %v1935_v20, %v1935_v20  ;;  %v1996_v62 = vrot.slane %v1995_v47, 4  ;;  %v1957_v49 = vmax.f32 %v1955_v36, %v1956_v11  ;;  %5873 = vmatpush1.bf16.msra.mxu0 %v7294_v10  ;;  %v11641_v36 = vld [vmem:[#allocation113_spill] sm:$0xff] }
 0x33d   :  { %v2036_v17 = vsel %vm8326_vm15, %v11562_v45, 4286644096  ;;  %v2017_v3 = vmax.f32 %v2015_v41, %v2016_v35  ;;  %v3590_v24 = vsel %vm2405_vm10, %v3582_v26, %v3589_v0  ;;  %v3469_v52 = vunpack.c.l.b16 %v1892_v19  ;;  %5874 = vmatprep.subr.bf16.mxu0 %v7302_v18  ;;  %v7308_v45 = vld [vmem:[%s11201_s3 + $0x254] ss:$8 sps:$4 sm:$0xff]  }
 0x33e   :  { %v1975_v30 = vmax.f32 %v1973_v6, %v1974_v48  ;;  %v1997_v59 = vmax.f32 %v1995_v47, %v1996_v62  ;;  %v2037_v33 = vunpack.i.l.bf16 %v2036_v17  ;;  %v2038_v29 = vunpack.i.h.bf16 %v2036_v17  ;;  %v7285_v6 = vld [vmem:[%s11201_s3 + $0x510] ss:$8 sps:$4 sm:$0xff]   ;;  %v7293_v47 = vld [vmem:[%s11201_s3 + $0x524] ss:$8 sps:$4 sm:$0xff]  }
 0x33f   :  { %v1958_v58 = vpack.i.bf16 %v1957_v49, %v1957_v49  ;;  %v3598_v57 = vpack.c.b16 %v3590_v24, %v3590_v24  ;;  %v2018_v38 = vrot.slane %v2017_v3, 4  ;;  %v3471_v27 = vunpack.c.l.b16 %v1914_v60  ;;  %v11642_v60 = vld [vmem:[#allocation118_spill] sm:$0xff] }
 0x340   :  { %v1976_v16 = vrot.slane %v1975_v30, 2  ;;  %v1998_v55 = vrot.slane %v1997_v59, 2  ;;  %v2039_v7 = vmax.f32 %v2037_v33, %v2038_v29  ;;  %v3473_v12 = vunpack.c.l.b16 %v1936_v44  ;;  %5875 = vmatpush1.bf16.msra.mxu0 %v7300_v15  ;;  %v7312_v44 = vld [vmem:[%s11201_s3 + $0x260] ss:$8 sps:$4 sm:$0xff]   ;;  %v7299_v29 = vld [vmem:[%s11201_s3 + $0x534] ss:$8 sps:$4 sm:$0xff]  }
 0x341   :  { %v3475_v23 = vunpack.c.l.b16 %v1958_v58  ;;  %5981 = vmatmul.mubr.bf16.vlgmr.msra.gmra.mrb[32].mxu1 %v3598_v57  ;;  %v2019_v13 = vmax.f32 %v2017_v3, %v2018_v38  ;;  %v2434_v19 = vrot.slane %v11640_v46, 1  ;;  %v3491_v21 = vsel %vm3378_vm0, %v3471_v27, %v3469_v52  ;;  %5876 = vmatprep.subr.bf16.mxu0 %v7308_v45  ;;  %v7291_v49 = vld [vmem:[%s11201_s3 + $0x520] ss:$8 sps:$4 sm:$0xff]  }
 0x342   :  { %v1977_v1 = vmax.f32 %v1975_v30, %v1976_v16  ;;  %v1999_v42 = vmax.f32 %v1997_v59, %v1998_v55  ;;  %v2040_v8 = vrot.slane %v2039_v7, 4  ;;  %5990 = vmatpush1.bf16.msra.mxu1 %v7279_v43  ;;  %v2462_v34 = vrot.slane %v11641_v36, 1  ;;  %v7320_v30 = vld [vmem:[%s11201_s3 + $0x274] ss:$8 sps:$4 sm:$0xff]   ;;  %v11644_v43 = vld [vmem:[#allocation26_spill] sm:$0xff] }
 0x343   :  { %v11643_v61 = vrot.slane %v11642_v60, 2  ;;  %v2020_v31 = vrot.slane %v2019_v13, 2  ;;  %v3492_v56 = vsel %vm3380_vm12, %v3473_v12, %v3491_v21  ;;  %5991 = vmatprep.subr.bf16.mxu1 %v7287_v37  ;;  %v2435_v10 = vmax.f32 %v11640_v46, %v2434_v19  ;;  %v11645_v16 = vld [vmem:[#allocation36_spill] sm:$0xff] }
 0x344   :  { %v1978_v28 = vrot.slane %v1977_v1, 1  ;;  %v2000_v20 = vrot.slane %v1999_v42, 1  ;;  %v2041_v2 = vmax.f32 %v2039_v7, %v2040_v8  ;;  %v3493_v5 = vsel %vm3382_vm14, %v3475_v23, %v3492_v56  ;;  %5877 = vmatpush1.bf16.msra.mxu0 %v7306_v53  ;;  %v11648_v53 = vld [vmem:[#allocation54_spill] sm:$0xff] }
 0x345   :  { %v2489_v4 = vmax.f32 %v11642_v60, %v11643_v61  ;;  %v10266_v40 = vmax.f32 %v11641_v36, %v2462_v34  ;;  %v2021_v11 = vmax.f32 %v2019_v13, %v2020_v31  ;;  %v2436_v41 = vpack.i.bf16 %v2435_v10, %v2435_v10  ;;  %5878 = vmatprep.subr.bf16.mxu0 %v7314_v32  ;;  %v7326_v13 = vld [vmem:[%s11201_s3 + $0x284] ss:$8 sps:$4 sm:$0xff]  }
 0x346   :  { %v1979_v14 = vmax.f32 %v1977_v1, %v1978_v28  ;;  %v2001_v0 = vmax.f32 %v1999_v42, %v2000_v20  ;;  %v2042_v48 = vrot.slane %v2041_v2, 2  ;;  %v2516_v26 = vrot.slane %v9762_v9, 2  ;;  %5992 = vmatpush1.bf16.msra.mxu1 %v7285_v6  ;;  %v7318_v1 = vld [vmem:[%s11201_s3 + $0x270] ss:$8 sps:$4 sm:$0xff]   ;;  %v7305_v34 = vld [vmem:[%s11201_s3 + $0x544] ss:$8 sps:$4 sm:$0xff]  }
 0x347   :  { %v2490_v18 = vrot.slane %v2489_v4, 1  ;;  %v2464_v35 = vpack.i.bf16 %v10266_v40, %v10266_v40  ;;  %v2022_v59 = vrot.slane %v2021_v11, 1  ;;  %5993 = vmatprep.subr.bf16.mxu1 %v7293_v47  ;;  %v2542_v58 = vrot.slane %v11644_v43, 4  ;;  %v7297_v42 = vld [vmem:[%s11201_s3 + $0x530] ss:$8 sps:$4 sm:$0xff]   ;;  %v11651_v6 = vld [vmem:[#allocation71_spill] sm:$0xff] }
 0x348   :  { %v1980_v62 = vpack.i.bf16 %v1979_v14, %v1979_v14  ;;  %v2002_v17 = vpack.i.bf16 %v2001_v0, %v2001_v0  ;;  %v2043_v3 = vmax.f32 %v2041_v2, %v2042_v48  ;;  %v2517_v24 = vmax.f32 %v9762_v9, %v2516_v26  ;;  %5879 = vmatpush1.bf16.msra.mxu0 %v7312_v44  ;;  %v7324_v47 = vld [vmem:[%s11201_s3 + $0x280] ss:$8 sps:$4 sm:$0xff]  }
 0x349   :  { %v2491_v33 = vmax.f32 %v2489_v4, %v2490_v18  ;;  %v11646_v52 = vunpack.i.h.bf16 %v11645_v16  ;;  %v11647_v45 = vunpack.i.l.bf16 %v11645_v16  ;;  %v2023_v55 = vmax.f32 %v2021_v11, %v2022_v59  ;;  %5880 = vmatprep.subr.bf16.mxu0 %v7320_v30  ;;  %v7303_v0 = vld [vmem:[%s11201_s3 + $0x540] ss:$8 sps:$4 sm:$0xff]   ;;  %v7332_v11 = vld [vmem:[%s11201_s3 + $0x294] ss:$8 sps:$4 sm:$0xff]  }
 0x34a   :  { %v3477_v15 = vunpack.c.l.b16 %v1980_v62  ;;  %v2044_v38 = vrot.slane %v2043_v3, 1  ;;  %v3479_v7 = vunpack.c.l.b16 %v2002_v17  ;;  %v2518_v12 = vrot.slane %v2517_v24, 1  ;;  %5994 = vmatpush1.bf16.msra.mxu1 %v7291_v49 }
 0x34b   :  { %v2569_v57 = vmax.f32 %v11647_v45, %v11646_v52  ;;  %v2492_v37 = vpack.i.bf16 %v2491_v33, %v2491_v33  ;;  %v2543_v9 = vmax.f32 %v11644_v43, %v2542_v58  ;;  %v2024_v8 = vpack.i.bf16 %v2023_v55, %v2023_v55  ;;  %5995 = vmatprep.subr.bf16.mxu1 %v7299_v29  ;;  %v7338_v52 = vld [vmem:[%s11201_s3 + $0x2a4] ss:$8 sps:$4 sm:$0xff]  }
 0x34c   :  { %v3494_v27 = vsel %vm3384_vm6, %v3477_v15, %v3493_v5  ;;  %v2045_v46 = vmax.f32 %v2043_v3, %v2044_v38  ;;  %v11649_v28 = vunpack.i.h.bf16 %v11648_v53  ;;  %v11650_v21 = vunpack.i.l.bf16 %v11648_v53  ;;  %5881 = vmatpush1.bf16.msra.mxu0 %v7318_v1  ;;  %v7330_v15 = vld [vmem:[%s11201_s3 + $0x290] ss:$8 sps:$4 sm:$0xff]   ;;  %v7317_v38 = vld [vmem:[%s11201_s3 + $0x564] ss:$8 sps:$4 sm:$0xff]  }
 0x34d   :  { %v2570_v23 = vrot.slane %v2569_v57, 4  ;;  %v3495_v19 = vsel %vm3386_vm8, %v3479_v7, %v3494_v27  ;;  %v2519_v60 = vmax.f32 %v2517_v24, %v2518_v12  ;;  %v2544_v61 = vrot.slane %v2543_v9, 2  ;;  %5882 = vmatprep.subr.bf16.mxu0 %v7326_v13  ;;  %v11652_v7 = vld [vmem:[#allocation81_spill] sm:$0xff] }
 0x34e   :  { %v2597_v36 = vmax.f32 %v11650_v21, %v11649_v28  ;;  %v2623_v32 = vunpack.i.l.bf16 %v11651_v6  ;;  %v2046_v20 = vpack.i.bf16 %v2045_v46, %v2045_v46  ;;  %v3481_v31 = vunpack.c.l.b16 %v2024_v8  ;;  %5996 = vmatpush1.bf16.msra.mxu1 %v7297_v42  ;;  %v7336_v8 = vld [vmem:[%s11201_s3 + $0x2a0] ss:$8 sps:$4 sm:$0xff]  }
 0x34f   :  { %v2571_v4 = vmax.f32 %v2569_v57, %v2570_v23  ;;  %v2624_v56 = vunpack.i.h.bf16 %v11651_v6  ;;  %v2520_v14 = vpack.i.bf16 %v2519_v60, %v2519_v60  ;;  %v2545_v5 = vmax.f32 %v2543_v9, %v2544_v61  ;;  %5997 = vmatprep.subr.bf16.mxu1 %v7305_v34  ;;  %v11653_v9 = vld [vmem:[#allocation100_spill] sm:$0xff]  ;;  %v7315_v34 = vld [vmem:[%s11201_s3 + $0x560] ss:$8 sps:$4 sm:$0xff]  }
 0x350   :  { %v2598_v2 = vrot.slane %v2597_v36, 4  ;;  %v3619_v40 = vunpack.c.l.b16 %v2436_v41  ;;  %v3483_v48 = vunpack.c.l.b16 %v2046_v20  ;;  %v3496_v18 = vsel %vm3388_vm9, %v3481_v31, %v3495_v19  ;;  %v7311_v41 = vld [vmem:[%s11201_s3 + $0x554] ss:$8 sps:$4 sm:$0xff]   ;;  %5883 = vmatpush1.bf16.msra.mxu0 %v7324_v47  ;;  %v11654_v19 = vld [vmem:[#allocation111_spill] sm:$0xff] }
 0x351   :  { %v2572_v10 = vrot.slane %v2571_v4, 2  ;;  %v2625_v62 = vmax.f32 %v2623_v32, %v2624_v56  ;;  %v2546_v26 = vrot.slane %v2545_v5, 1  ;;  %v3621_v30 = vunpack.c.l.b16 %v2464_v35  ;;  %v7309_v35 = vld [vmem:[%s11201_s3 + $0x550] ss:$8 sps:$4 sm:$0xff]   ;;  %5884 = vmatprep.subr.bf16.mxu0 %v7332_v11  ;;  %v7344_v60 = vld [vmem:[%s11201_s3 + $0x2b4] ss:$8 sps:$4 sm:$0xff]  }
 0x352   :  { %v2599_v44 = vmax.f32 %v2597_v36, %v2598_v2  ;;  %v3623_v17 = vunpack.c.l.b16 %v2492_v37  ;;  %v3497_v59 = vsel %vm2405_vm10, %v3483_v48, %v3496_v18  ;;  %v3625_v29 = vunpack.c.l.b16 %v2520_v14  ;;  %5998 = vmatpush1.bf16.msra.mxu1 %v7303_v0  ;;  %v7323_v31 = vld [vmem:[%s11201_s3 + $0x574] ss:$8 sps:$4 sm:$0xff]   ;;  %v7342_v11 = vld [vmem:[%s11201_s3 + $0x2b0] ss:$8 sps:$4 sm:$0xff]   ;;  %v11657_v18 = vld [vmem:[#allocation11_spill] sm:$0xff] }
 0x353   :  { %v2573_v49 = vmax.f32 %v2571_v4, %v2572_v10  ;;  %v2626_v33 = vrot.slane %v2625_v62, 4  ;;  %v3499_v24 = vpack.c.b16 %v3497_v59, %v3497_v59  ;;  %v2547_v43 = vmax.f32 %v2545_v5, %v2546_v26  ;;  %5999 = vmatprep.subr.bf16.mxu1 %v7311_v41  ;;  %v11656_v4 = vld [vmem:[#allocation88_spill] sm:$0xff]  ;;  %v7350_v26 = vld [vmem:[%s11201_s3 + $0x2c4] ss:$8 sps:$4 sm:$0xff]  }
 0x354   :  { %v2600_v3 = vrot.slane %v2599_v44, 2  ;;  %v3641_v16 = vsel %vm3378_vm0, %v3621_v30, %v3619_v40  ;;  %v1879_v37 = vrot.slane %v11652_v7, 1  ;;  %v1901_v23 = vrot.slane %v11653_v9, 1  ;;  %5885 = vmatpush1.bf16.msra.mxu0 %v7330_v15  ;;  %v7321_v41 = vld [vmem:[%s11201_s3 + $0x570] ss:$8 sps:$4 sm:$0xff]   ;;  %v11658_v30 = vld [vmem:[#allocation27_spill] sm:$0xff] }
 0x355   :  { %v2574_v58 = vrot.slane %v2573_v49, 1  ;;  %v2627_v57 = vmax.f32 %v2625_v62, %v2626_v33  ;;  %v3642_v55 = vsel %vm3380_vm12, %v3623_v17, %v3641_v16  ;;  %5898 = vmatprep.mubr.bf16.mxu0 %v3499_v24  ;;  %v2548_v1 = vpack.i.bf16 %v2547_v43, %v2547_v43  ;;  %5886 = vmatprep.subr.bf16.mxu0 %v7338_v52  ;;  %v11661_v33 = vld [vmem:[#allocation47_spill] sm:$0xff] }
 0x356   :  { %v2601_v45 = vmax.f32 %v2599_v44, %v2600_v3  ;;  %v3643_v12 = vsel %vm3382_vm14, %v3625_v29, %v3642_v55  ;;  %v1880_v46 = vmax.f32 %v11652_v7, %v1879_v37  ;;  %v11655_v53 = vrot.slane %v11654_v19, 2  ;;  %6000 = vmatpush1.bf16.msra.mxu1 %v7309_v35  ;;  %v7329_v16 = vld [vmem:[%s11201_s3 + $0x584] ss:$8 sps:$4 sm:$0xff]  }
 0x357   :  { %v2575_v27 = vmax.f32 %v2573_v49, %v2574_v58  ;;  %v2628_v13 = vrot.slane %v2627_v57, 2  ;;  %v3627_v36 = vunpack.c.l.b16 %v2548_v1  ;;  %v1902_v61 = vmax.f32 %v11653_v9, %v1901_v23  ;;  %6001 = vmatprep.subr.bf16.mxu1 %v7317_v38  ;;  %v11664_v38 = vld [vmem:[#allocation63_spill] sm:$0xff] }
 0x358   :  { %v2602_v42 = vrot.slane %v2601_v45, 1  ;;  %v1922_v28 = vmax.f32 %v11654_v19, %v11655_v53  ;;  %v1943_v6 = vrot.slane %v11656_v4, 2  ;;  %v1881_v2 = vpack.i.bf16 %v1880_v46, %v1880_v46  ;;  %5887 = vmatpush1.bf16.msra.mxu0 %v7336_v8  ;;  %v7327_v23 = vld [vmem:[%s11201_s3 + $0x580] ss:$8 sps:$4 sm:$0xff]  }
 0x359   :  { %v2576_v21 = vpack.i.bf16 %v2575_v27, %v2575_v27  ;;  %v2629_v20 = vmax.f32 %v2627_v57, %v2628_v13  ;;  %v3644_v14 = vsel %vm3384_vm6, %v3627_v36, %v3643_v12  ;;  %v1903_v5 = vpack.i.bf16 %v1902_v61, %v1902_v61  ;;  %5888 = vmatprep.subr.bf16.mxu0 %v7344_v60  ;;  %v7348_v27 = vld [vmem:[%s11201_s3 + $0x2c0] ss:$8 sps:$4 sm:$0xff]  }
 0x35a   :  { %v2603_v32 = vmax.f32 %v2601_v45, %v2602_v42  ;;  %v1923_v56 = vrot.slane %v1922_v28, 1  ;;  %v1944_v10 = vmax.f32 %v11656_v4, %v1943_v6  ;;  %v1963_v44 = vrot.slane %v11657_v18, 4  ;;  %6002 = vmatpush1.bf16.msra.mxu1 %v7315_v34  ;;  %v7356_v42 = vld [vmem:[%s11201_s3 + $0x2d4] ss:$8 sps:$4 sm:$0xff]  }
 0x35b   :  { %v3629_v47 = vunpack.c.l.b16 %v2576_v21  ;;  %v2630_v0 = vrot.slane %v2629_v20, 1  ;;  %v11659_v17 = vunpack.i.h.bf16 %v11658_v30  ;;  %v11660_v59 = vunpack.i.l.bf16 %v11658_v30  ;;  %6003 = vmatprep.subr.bf16.mxu1 %v7323_v31 }
 0x35c   :  { %v2604_v40 = vpack.i.bf16 %v2603_v32, %v2603_v32  ;;  %v1924_v48 = vmax.f32 %v1922_v28, %v1923_v56  ;;  %v1945_v49 = vrot.slane %v1944_v10, 1  ;;  %v11662_v29 = vunpack.i.h.bf16 %v11661_v33  ;;  %5889 = vmatpush1.bf16.msra.mxu0 %v7342_v11  ;;  %v7335_v28 = vld [vmem:[%s11201_s3 + $0x594] ss:$8 sps:$4 sm:$0xff]  }
 0x35d   :  { %v3645_v62 = vsel %vm3386_vm8, %v3629_v47, %v3644_v14  ;;  %v1984_v3 = vmax.f32 %v11660_v59, %v11659_v17  ;;  %v11663_v15 = vunpack.i.l.bf16 %v11661_v33  ;;  %v2631_v43 = vmax.f32 %v2629_v20, %v2630_v0  ;;  %5890 = vmatprep.subr.bf16.mxu0 %v7350_v26  ;;  %v7354_v20 = vld [vmem:[%s11201_s3 + $0x2d0] ss:$8 sps:$4 sm:$0xff]   ;;  %v11667_v59 = vld [vmem:[#allocation103_spill] sm:$0xff] }
 0x35e   :  { %v3631_v58 = vunpack.c.l.b16 %v2604_v40  ;;  %v1925_v35 = vpack.i.bf16 %v1924_v48, %v1924_v48  ;;  %v1964_v52 = vmax.f32 %v11657_v18, %v1963_v44  ;;  %v1946_v45 = vmax.f32 %v1944_v10, %v1945_v49  ;;  %6004 = vmatpush1.bf16.msra.mxu1 %v7321_v41  ;;  %v7333_v14 = vld [vmem:[%s11201_s3 + $0x590] ss:$8 sps:$4 sm:$0xff]   ;;  %v7341_v48 = vld [vmem:[%s11201_s3 + $0x5a4] ss:$8 sps:$4 sm:$0xff]   ;;  %v7360_v33 = vld [vmem:[%s11201_s3 + $0x2e0] ss:$8 sps:$4 sm:$0xff]  }
 0x35f   :  { %v2006_v24 = vmax.f32 %v11663_v15, %v11662_v29  ;;  %v1985_v57 = vrot.slane %v1984_v3, 4  ;;  %v2026_v7 = vunpack.i.l.bf16 %v11664_v38  ;;  %v2632_v37 = vpack.i.bf16 %v2631_v43, %v2631_v43  ;;  %6005 = vmatprep.subr.bf16.mxu1 %v7329_v16  ;;  %v11665_v0 = vld [vmem:[#allocation76_spill] sm:$0xff]  ;;  %v11666_v41 = vld [vmem:[#allocation90_spill] sm:$0xff] }
 0x360   :  { %v3646_v1 = vsel %vm3388_vm9, %v3631_v58, %v3645_v62  ;;  %v1965_v12 = vrot.slane %v1964_v52, 2  ;;  %v2027_v9 = vunpack.i.h.bf16 %v11664_v38  ;;  %v1947_v13 = vpack.i.bf16 %v1946_v45, %v1946_v45  ;;  %5891 = vmatpush1.bf16.msra.mxu0 %v7348_v27  ;;  %v7339_v16 = vld [vmem:[%s11201_s3 + $0x5a0] ss:$8 sps:$4 sm:$0xff]  }
 0x361   :  { %v2007_v55 = vrot.slane %v2006_v24, 4  ;;  %v1986_v8 = vmax.f32 %v1984_v3, %v1985_v57  ;;  %v3468_v19 = vunpack.c.l.b16 %v1881_v2  ;;  %v3633_v53 = vunpack.c.l.b16 %v2632_v37  ;;  %5892 = vmatprep.subr.bf16.mxu0 %v7356_v42  ;;  %v11669_v57 = vld [vmem:[#allocation18_spill] sm:$0xff]  ;;  %v11670_v38 = vld [vmem:[#allocation35_spill] sm:$0xff] }
 0x362   :  { %v1966_v21 = vmax.f32 %v1964_v52, %v1965_v12  ;;  %v2028_v36 = vmax.f32 %v2026_v7, %v2027_v9  ;;  %v3470_v34 = vunpack.c.l.b16 %v1903_v5  ;;  %v3472_v4 = vunpack.c.l.b16 %v1925_v35  ;;  %6006 = vmatpush1.bf16.msra.mxu1 %v7327_v23  ;;  %v7362_v5 = vld [vmem:[%s11201_s3 + $0x2e4] ss:$8 sps:$4 sm:$0xff]   ;;  %v7368_v35 = vld [vmem:[%s11201_s3 + $0x2f4] ss:$8 sps:$4 sm:$0xff]  }
 0x363   :  { %v2008_v46 = vmax.f32 %v2006_v24, %v2007_v55  ;;  %v1987_v60 = vrot.slane %v1986_v8, 2  ;;  %v3474_v6 = vunpack.c.l.b16 %v1947_v13  ;;  %v3647_v32 = vsel %vm2405_vm10, %v3633_v53, %v3646_v1  ;;  %6007 = vmatprep.subr.bf16.mxu1 %v7335_v28 }
 0x364   :  { %v1967_v31 = vrot.slane %v1966_v21, 1  ;;  %v2029_v2 = vrot.slane %v2028_v36, 4  ;;  %v3484_v56 = vsel %vm3378_vm0, %v3470_v34, %v3468_v19  ;;  %v3649_v47 = vpack.c.b16 %v3647_v32, %v3647_v32  ;;  %5893 = vmatpush1.bf16.msra.mxu0 %v7354_v20  ;;  %v7345_v34 = vld [vmem:[%s11201_s3 + $0x5b0] ss:$8 sps:$4 sm:$0xff]   ;;  %v7353_v32 = vld [vmem:[%s11201_s3 + $0x5c4] ss:$8 sps:$4 sm:$0xff]  }
 0x365   :  { %v2009_v61 = vrot.slane %v2008_v46, 2  ;;  %v1988_v10 = vmax.f32 %v1986_v8, %v1987_v60  ;;  %v2476_v11 = vrot.slane %v11665_v0, 1  ;;  %v3485_v62 = vsel %vm3380_vm12, %v3472_v4, %v3484_v56  ;;  %5894 = vmatprep.subr.bf16.mxu0 %v7362_v5  ;;  %v11673_v56 = vld [vmem:[#allocation66_spill] sm:$0xff] }
 0x366   :  { %v1968_v18 = vmax.f32 %v1966_v21, %v1967_v31  ;;  %v2030_v44 = vmax.f32 %v2028_v36, %v2029_v2  ;;  %v2422_v26 = vpack.i.bf16 %v11666_v41, %v11666_v41  ;;  %6021 = vmatprep.mubr.bf16.mxu1 %v3649_v47  ;;  %v3486_v17 = vsel %vm3382_vm14, %v3474_v6, %v3485_v62  ;;  %v11672_v21 = vld [vmem:[#allocation58_spill] sm:$0xff] }
 0x367   :  { %v2010_v40 = vmax.f32 %v2008_v46, %v2009_v61  ;;  %v1989_v49 = vrot.slane %v1988_v10, 1  ;;  %v2450_v3 = vpack.i.bf16 %v11667_v59, %v11667_v59  ;;  %v2477_v24 = vmax.f32 %v11665_v0, %v2476_v11  ;;  %6008 = vmatpush1.bf16.msra.mxu1 %v7333_v14  ;;  %v7366_v46 = vld [vmem:[%s11201_s3 + $0x2f0] ss:$8 sps:$4 sm:$0xff]   ;;  %v7351_v41 = vld [vmem:[%s11201_s3 + $0x5c0] ss:$8 sps:$4 sm:$0xff]  }
 0x368   :  { %v1969_v29 = vpack.i.bf16 %v1968_v18, %v1968_v18  ;;  %v2031_v15 = vrot.slane %v2030_v44, 2  ;;  %v11668_v43 = vrot.slane %v9727_v50, 2  ;;  %v2530_v55 = vrot.slane %v11669_v57, 2  ;;  %6009 = vmatprep.subr.bf16.mxu1 %v7341_v48  ;;  %5895 = vmatpush1.bf16.msra.mxu0 %v7360_v33 }
 0x369   :  { %v2011_v30 = vrot.slane %v2010_v40, 1  ;;  %v1990_v52 = vmax.f32 %v1988_v10, %v1989_v49  ;;  %v11671_v7 = vrot.slane %v11670_v38, 4  ;;  %v2478_v12 = vpack.i.bf16 %v2477_v24, %v2477_v24  ;;  %5896 = vmatprep.subr.bf16.mxu0 %v7368_v35  ;;  %v11676_v35 = vld [vmem:[#allocation91_spill] sm:$0xff] }
 0x36a   :  { %v2503_v58 = vmax.f32 %v9727_v50, %v11668_v43  ;;  %v7347_v50 = vld [vmem:[%s11201_s3 + $0x5b4] ss:$8 sps:$4 sm:$0xff]   ;;  %v2032_v1 = vmax.f32 %v2030_v44, %v2031_v15  ;;  %v3476_v27 = vunpack.c.l.b16 %v1969_v29  ;;  %v2531_v13 = vmax.f32 %v11669_v57, %v2530_v55 }
 0x36b   :  { %v2012_v45 = vmax.f32 %v2010_v40, %v2011_v30  ;;  %v2557_v37 = vmax.f32 %v11670_v38, %v11671_v7  ;;  %v1991_v23 = vpack.i.bf16 %v1990_v52, %v1990_v52  ;;  %v2584_v36 = vrot.slane %v11672_v21, 4  ;;  %6010 = vmatpush1.bf16.msra.mxu1 %v7339_v16  ;;  %v7357_v7 = vld [vmem:[%s11201_s3 + $0x5d0] ss:$8 sps:$4 sm:$0xff]  }
 0x36c   :  { %v2504_v9 = vrot.slane %v2503_v58, 1  ;;  %v2033_v19 = vrot.slane %v2032_v1, 1  ;;  %v3487_v53 = vsel %vm3384_vm6, %v3476_v27, %v3486_v17  ;;  %v2532_v4 = vrot.slane %v2531_v13, 1  ;;  %6011 = vmatprep.subr.bf16.mxu1 %v7347_v50  ;;  %5897 = vmatpush1.bf16.msra.mxu0 %v7366_v46 }
 0x36d   :  { %v2013_v42 = vpack.i.bf16 %v2012_v45, %v2012_v45  ;;  %v2558_v8 = vrot.slane %v2557_v37, 2  ;;  %v3478_v60 = vunpack.c.l.b16 %v1991_v23  ;;  %v2585_v2 = vmax.f32 %v11672_v21, %v2584_v36 }
 0x36e   :  { %v2505_v28 = vmax.f32 %v2503_v58, %v2504_v9  ;;  %v2034_v20 = vmax.f32 %v2032_v1, %v2033_v19  ;;  %v11674_v47 = vunpack.i.h.bf16 %v11673_v56  ;;  %v11675_v14 = vunpack.i.l.bf16 %v11673_v56 }
 0x36f   :  { %v3480_v61 = vunpack.c.l.b16 %v2013_v42  ;;  %v2559_v6 = vmax.f32 %v2557_v37, %v2558_v8  ;;  %v3488_v10 = vsel %vm3386_vm8, %v3478_v60, %v3487_v53  ;;  %v2533_v40 = vmax.f32 %v2531_v13, %v2532_v4  ;;  %6012 = vmatpush1.bf16.msra.mxu1 %v7345_v34  ;;  %v11678_v13 = vld [vmem:[#allocation106_spill] sm:$0xff]  ;;  %v11682_v34 = vld [vmem:[#allocation21_spill] sm:$0xff] }
 0x370   :  { %v2506_v31 = vpack.i.bf16 %v2505_v28, %v2505_v28  ;;  %v2611_v5 = vmax.f32 %v11675_v14, %v11674_v47  ;;  %v3618_v11 = vunpack.c.l.b16 %v2422_v26  ;;  %v2035_v48 = vpack.i.bf16 %v2034_v20, %v2034_v20  ;;  %6013 = vmatprep.subr.bf16.mxu1 %v7353_v32  ;;  %v7359_v26 = vld [vmem:[%s11201_s3 + $0x5d4] ss:$8 sps:$4 sm:$0xff]   ;;  %v11680_v53 = vld [vmem:[#allocation78_spill] sm:$0xff] }
 0x371   :  { %v2560_v0 = vrot.slane %v2559_v6, 1  ;;  %v3489_v18 = vsel %vm3388_vm9, %v3480_v61, %v3488_v10  ;;  %v2586_v44 = vrot.slane %v2585_v2, 2  ;;  %v2534_v49 = vpack.i.bf16 %v2533_v40, %v2533_v40  ;;  %v11684_v20 = vld [vmem:[#allocation42_spill] sm:$0xff] }
 0x372   :  { %v2612_v62 = vrot.slane %v2611_v5, 4  ;;  %v3620_v17 = vunpack.c.l.b16 %v2450_v3  ;;  %v3622_v59 = vunpack.c.l.b16 %v2478_v12  ;;  %v3482_v33 = vunpack.c.l.b16 %v2035_v48  ;;  %v7365_v12 = vld [vmem:[%s11201_s3 + $0x5e4] ss:$8 sps:$4 sm:$0xff]  }
 0x373   :  { %v2561_v30 = vmax.f32 %v2559_v6, %v2560_v0  ;;  %v2587_v29 = vmax.f32 %v2585_v2, %v2586_v44  ;;  %v3624_v24 = vunpack.c.l.b16 %v2506_v31  ;;  %v3626_v58 = vunpack.c.l.b16 %v2534_v49  ;;  %6014 = vmatpush1.bf16.msra.mxu1 %v7351_v41  ;;  %v7363_v2 = vld [vmem:[%s11201_s3 + $0x5e0] ss:$8 sps:$4 sm:$0xff]   ;;  %v7371_v0 = vld [vmem:[%s11201_s3 + $0x5f4] ss:$8 sps:$4 sm:$0xff]  }
 0x374   :  { %v2613_v15 = vmax.f32 %v2611_v5, %v2612_v62  ;;  %v3634_v16 = vsel %vm3378_vm0, %v3620_v17, %v3618_v11  ;;  %v11677_v52 = vrot.slane %v11676_v35, 1  ;;  %v3490_v3 = vsel %vm2405_vm10, %v3482_v33, %v3489_v18  ;;  %6015 = vmatprep.subr.bf16.mxu1 %v7359_v26  ;;  %v11685_v5 = vld [vmem:[#allocation55_spill] sm:$0xff] }
 0x375   :  { %v2562_v43 = vpack.i.bf16 %v2561_v30, %v2561_v30  ;;  %v2588_v57 = vrot.slane %v2587_v29, 1  ;;  %v3635_v38 = vsel %vm3380_vm12, %v3622_v59, %v3634_v16  ;;  %v3498_v37 = vpack.c.b16 %v3490_v3, %v3490_v3  ;;  %v11688_v44 = vld [vmem:[#allocation67_spill] sm:$0xff] }
 0x376   :  { %v2656_v45 = vmax.f32 %v11676_v35, %v11677_v52  ;;  %v2614_v55 = vrot.slane %v2613_v15, 2  ;;  %v3636_v1 = vsel %vm3382_vm14, %v3624_v24, %v3635_v38  ;;  %v11679_v8 = vrot.slane %v11678_v13, 1  ;;  %v7374_v3 = vld [vmem:[%s11201_s3 + $0x604] ss:$8 sps:$4 sm:$0xff]  }
 0x377   :  { %v3628_v50 = vunpack.c.l.b16 %v2562_v43  ;;  %v2589_v9 = vmax.f32 %v2587_v29, %v2588_v57  ;;  %v3637_v42 = vsel %vm3384_vm6, %v3626_v58, %v3636_v1  ;;  %5899 = vmatmul.mubr.bf16.vlgmr.msra.gmra.mrb[64].mxu0 %v3498_v37  ;;  %v2699_v28 = vrot.slane %v11680_v53, 1  ;;  %6016 = vmatpush1.bf16.msra.mxu1 %v7357_v7  ;;  %v7369_v43 = vld [vmem:[%s11201_s3 + $0x5f0] ss:$8 sps:$4 sm:$0xff]  }
 0x378   :  { %v2657_v27 = vpack.i.bf16 %v2656_v45, %v2656_v45  ;;  %v2615_v23 = vmax.f32 %v2613_v15, %v2614_v55  ;;  %v2678_v46 = vmax.f32 %v11678_v13, %v11679_v8  ;;  %v11681_v21 = vrot.slane %v9746_v63, 2  ;;  %6017 = vmatprep.subr.bf16.mxu1 %v7365_v12  ;;  %v7372_v13 = vld [vmem:[%s11201_s3 + $0x600] ss:$8 sps:$4 sm:$0xff]  }
 0x379   :  { %v3638_v19 = vsel %vm3386_vm8, %v3628_v50, %v3637_v42  ;;  %v11683_v60 = vrot.slane %v11682_v34, 4  ;;  %v2590_v4 = vpack.i.bf16 %v2589_v9, %v2589_v9  ;;  %v2761_v31 = vrot.slane %v11684_v20, 4 }
 0x37a   :  { %v2720_v36 = vmax.f32 %v9746_v63, %v11681_v21  ;;  %v2616_v6 = vrot.slane %v2615_v23, 1  ;;  %v2679_v32 = vpack.i.bf16 %v2678_v46, %v2678_v46  ;;  %v2700_v56 = vmax.f32 %v11680_v53, %v2699_v28 }
 0x37b   :  { %v2740_v61 = vmax.f32 %v11682_v34, %v11683_v60  ;;  %v11686_v63 = vunpack.i.h.bf16 %v11685_v5  ;;  %v11687_v10 = vunpack.i.l.bf16 %v11685_v5  ;;  %v3630_v48 = vunpack.c.l.b16 %v2590_v4  ;;  %6018 = vmatpush1.bf16.msra.mxu1 %v7363_v2  ;;  %v11691_v34 = vld [vmem:[#allocation114_spill] sm:$0xff] }
 0x37c   :  { %v2721_v47 = vrot.slane %v2720_v36, 1  ;;  %v2617_v11 = vmax.f32 %v2615_v23, %v2616_v6  ;;  %v2762_v18 = vmax.f32 %v11684_v20, %v2761_v31  ;;  %v11689_v62 = vunpack.i.h.bf16 %v11688_v44  ;;  %6019 = vmatprep.subr.bf16.mxu1 %v7371_v0  ;;  %v11693_v20 = vld [vmem:[#allocation16_spill] sm:$0xff]  ;;  %v11695_v5 = vld [vmem:[#allocation38_spill] sm:$0xff] }
 0x37d   :  { %v2741_v14 = vrot.slane %v2740_v61, 2  ;;  %v2782_v40 = vmax.f32 %v11687_v10, %v11686_v63  ;;  %v11690_v41 = vunpack.i.l.bf16 %v11688_v44  ;;  %v2701_v30 = vpack.i.bf16 %v2700_v56, %v2700_v56  ;;  %v7375_v0 = vld [vmem:[%s11201_s3 + $0x610] ss:$8 sps:$4 sm:$0xff]  }
 0x37e   :  { %v2722_v17 = vmax.f32 %v2720_v36, %v2721_v47  ;;  %v2618_v33 = vpack.i.bf16 %v2617_v11, %v2617_v11  ;;  %v3639_v29 = vsel %vm3388_vm9, %v3630_v48, %v3638_v19  ;;  %v2763_v15 = vrot.slane %v2762_v18, 2  ;;  %v7377_v36 = vld [vmem:[%s11201_s3 + $0x614] ss:$8 sps:$4 sm:$0xff]  }
 0x37f   :  { %v2804_v49 = vmax.f32 %v11690_v41, %v11689_v62  ;;  %v2742_v59 = vmax.f32 %v2740_v61, %v2741_v14  ;;  %v2783_v26 = vrot.slane %v2782_v40, 4  ;;  %v3669_v52 = vunpack.c.l.b16 %v2657_v27  ;;  %6020 = vmatpush1.bf16.msra.mxu1 %v7369_v43  ;;  %v7380_v62 = vld [vmem:[%s11201_s3 + $0x624] ss:$8 sps:$4 sm:$0xff]  }
 0x380   :  { %v2723_v58 = vpack.i.bf16 %v2722_v17, %v2722_v17  ;;  %v3632_v45 = vunpack.c.l.b16 %v2618_v33  ;;  %v2764_v57 = vmax.f32 %v2762_v18, %v2763_v15  ;;  %v3671_v38 = vunpack.c.l.b16 %v2679_v32  ;;  %6030 = vmatprep.subr.bf16.mxu1 %v7374_v3 }
 0x381   :  { %v2805_v24 = vrot.slane %v2804_v49, 4  ;;  %v2743_v16 = vrot.slane %v2742_v59, 1  ;;  %v2784_v35 = vmax.f32 %v2782_v40, %v2783_v26  ;;  %v3673_v50 = vunpack.c.l.b16 %v2701_v30 }
 0x382   :  { %v3675_v1 = vunpack.c.l.b16 %v2723_v58  ;;  %v3640_v12 = vsel %vm2405_vm10, %v3632_v45, %v3639_v29  ;;  %v2765_v9 = vrot.slane %v2764_v57, 1  ;;  %v3691_v42 = vsel %vm3378_vm0, %v3671_v38, %v3669_v52  ;;  %v11698_v29 = vld [vmem:[#allocation69_spill] sm:$0xff] }
 0x383   :  { %v2806_v55 = vmax.f32 %v2804_v49, %v2805_v24  ;;  %v2744_v7 = vmax.f32 %v2742_v59, %v2743_v16  ;;  %v2785_v37 = vrot.slane %v2784_v35, 2  ;;  %v3648_v27 = vpack.c.b16 %v3640_v12, %v3640_v12  ;;  %v11696_v49 = vld [vmem:[#allocation51_spill] sm:$0xff] }
 0x384   :  { %v3692_v19 = vsel %vm3380_vm12, %v3673_v50, %v3691_v42  ;;  %v2766_v53 = vmax.f32 %v2764_v57, %v2765_v9  ;;  %v11692_v60 = vrot.slane %v11691_v34, 1  ;;  %v2710_v32 = vrot.slane %v9738_v51, 1  ;;  %v11699_v9 = vld [vmem:[#allocation92_spill] sm:$0xff] }
 0x385   :  { %v2807_v23 = vrot.slane %v2806_v55, 2  ;;  %v2745_v8 = vpack.i.bf16 %v2744_v7, %v2744_v7  ;;  %v2786_v46 = vmax.f32 %v2784_v35, %v2785_v37  ;;  %v3693_v21 = vsel %vm3382_vm14, %v3675_v1, %v3692_v19  ;;  %6022 = vmatmul.mubr.bf16.vlgmr.msra.gmra.mrb[32].mxu1 %v3648_v27  ;;  %v7378_v35 = vld [vmem:[%s11201_s3 + $0x620] ss:$8 sps:$4 sm:$0xff]  }
 0x386   :  { %v2689_v61 = vmax.f32 %v11691_v34, %v11692_v60  ;;  %v11694_v31 = vrot.slane %v11693_v20, 2  ;;  %v2767_v56 = vpack.i.bf16 %v2766_v53, %v2766_v53  ;;  %v2752_v63 = vrot.slane %v11695_v5, 2  ;;  %6031 = vmatpush1.bf16.msra.mxu1 %v7372_v13  ;;  %v7381_v53 = vld [vmem:[%s11201_s3 + $0x630] ss:$8 sps:$4 sm:$0xff]  }
 0x387   :  { %v2808_v28 = vmax.f32 %v2806_v55, %v2807_v23  ;;  %v2787_v4 = vrot.slane %v2786_v46, 1  ;;  %v3677_v6 = vunpack.c.l.b16 %v2745_v8  ;;  %v2711_v11 = vmax.f32 %v9738_v51, %v2710_v32  ;;  %6032 = vmatprep.subr.bf16.mxu1 %v7377_v36  ;;  %v7383_v55 = vld [vmem:[%s11201_s3 + $0x634] ss:$8 sps:$4 sm:$0xff]   ;;  %v11701_v36 = vld [vmem:[#allocation94_spill] sm:$0xff] }
 0x388   :  { %v2731_v2 = vmax.f32 %v11693_v20, %v11694_v31  ;;  %v2690_v14 = vpack.i.bf16 %v2689_v61, %v2689_v61  ;;  %v3679_v44 = vunpack.c.l.b16 %v2767_v56  ;;  %v2753_v41 = vmax.f32 %v11695_v5, %v2752_v63  ;;  %v11700_v23 = vld [vmem:[#allocation104_spill] sm:$0xff]  ;;  %v7386_v61 = vld [vmem:[%s11201_s3 + $0x644] ss:$8 sps:$4 sm:$0xff]  }
 0x389   :  { %v2809_v47 = vrot.slane %v2808_v28, 1  ;;  %v2788_v10 = vmax.f32 %v2786_v46, %v2787_v4  ;;  %v3694_v40 = vsel %vm3384_vm6, %v3677_v6, %v3693_v21  ;;  %v11697_v30 = vrot.slane %v11696_v49, 4  ;;  %v11703_v20 = vld [vmem:[#allocation108_spill] sm:$0xff] }
 0x38a   :  { %v2732_v48 = vrot.slane %v2731_v2, 1  ;;  %v2712_v26 = vpack.i.bf16 %v2711_v11, %v2711_v11  ;;  %v2794_v15 = vrot.slane %v11698_v29, 4  ;;  %v3695_v24 = vsel %vm3386_vm8, %v3679_v44, %v3694_v40  ;;  %6033 = vmatpush1.bf16.msra.mxu1 %v7375_v0 }
 0x38b   :  { %v2810_v18 = vmax.f32 %v2808_v28, %v2809_v47  ;;  %v2773_v17 = vmax.f32 %v11696_v49, %v11697_v30  ;;  %v2789_v59 = vpack.i.bf16 %v2788_v10, %v2788_v10  ;;  %v2754_v43 = vrot.slane %v2753_v41, 1  ;;  %6034 = vmatprep.subr.bf16.mxu1 %v7380_v62  ;;  %v7384_v62 = vld [vmem:[%s11201_s3 + $0x640] ss:$8 sps:$4 sm:$0xff]  }
 0x38c   :  { %v2733_v33 = vmax.f32 %v2731_v2, %v2732_v48  ;;  %v2795_v45 = vmax.f32 %v11698_v29, %v2794_v15  ;;  %v3672_v3 = vunpack.c.l.b16 %v2690_v14  ;;  %v3674_v37 = vunpack.c.l.b16 %v2712_v26  ;;  %v11705_v14 = vld [vmem:[#allocation86_spill] sm:$0xff]  ;;  %v11710_v29 = vld [vmem:[#allocation59_spill] sm:$0xff] }
 0x38d   :  { %v2811_v51 = vpack.i.bf16 %v2810_v18, %v2810_v18  ;;  %v2774_v58 = vrot.slane %v2773_v17, 2  ;;  %v3681_v16 = vunpack.c.l.b16 %v2789_v59  ;;  %v2755_v38 = vmax.f32 %v2753_v41, %v2754_v43  ;;  %v11707_v48 = vld [vmem:[#allocation22_spill] sm:$0xff]  ;;  %v11713_v43 = vld [vmem:[#allocation68_spill] sm:$0xff] }
 0x38e   :  { %v2734_v52 = vpack.i.bf16 %v2733_v33, %v2733_v33  ;;  %v2796_v1 = vrot.slane %v2795_v45, 2  ;;  %v3684_v42 = vsel %vm3378_vm0, %v11700_v23, %v11699_v9  ;;  %6035 = vmatpush1.bf16.msra.mxu1 %v7378_v35  ;;  %v11702_v34 = vrot.slane %v11701_v36, 1 }
 0x38f   :  { %v3683_v57 = vunpack.c.l.b16 %v2811_v51  ;;  %v2775_v7 = vmax.f32 %v2773_v17, %v2774_v58  ;;  %v3696_v50 = vsel %vm3388_vm9, %v3681_v16, %v3695_v24  ;;  %v2756_v13 = vpack.i.bf16 %v2755_v38, %v2755_v38  ;;  %6036 = vmatprep.subr.bf16.mxu1 %v7383_v55  ;;  %v11709_v17 = vld [vmem:[#allocation44_spill] sm:$0xff] }
 0x390   :  { %v3676_v12 = vunpack.c.l.b16 %v2734_v52  ;;  %v3685_v46 = vsel %vm3380_vm12, %v3672_v3, %v3684_v42  ;;  %v2797_v28 = vmax.f32 %v2795_v45, %v2796_v1  ;;  %v2834_v60 = vmax.f32 %v11701_v36, %v11702_v34  ;;  %v7392_v42 = vld [vmem:[%s11201_s3 + $0x664] ss:$8 sps:$4 sm:$0xff]  }
 0x391   :  { %v3697_v27 = vsel %vm2405_vm10, %v3683_v57, %v3696_v50  ;;  %v2776_v8 = vrot.slane %v2775_v7, 1  ;;  %v3686_v21 = vsel %vm3382_vm14, %v3674_v37, %v3685_v46  ;;  %v3678_v6 = vunpack.c.l.b16 %v2756_v13  ;;  %v7387_v50 = vld [vmem:[%s11201_s3 + $0x650] ss:$8 sps:$4 sm:$0xff]  }
 0x392   :  { %v3699_v19 = vpack.c.b16 %v3697_v27, %v3697_v27  ;;  %v3687_v32 = vsel %vm3384_vm6, %v3676_v12, %v3686_v21  ;;  %v11704_v31 = vrot.slane %v11703_v20, 1  ;;  %v2798_v56 = vrot.slane %v2797_v28, 1  ;;  %6037 = vmatpush1.bf16.msra.mxu1 %v7381_v53 }
 0x393   :  { %v2777_v4 = vmax.f32 %v2775_v7, %v2776_v8  ;;  %v2835_v47 = vpack.i.bf16 %v2834_v60, %v2834_v60  ;;  %v2877_v5 = vrot.slane %v11705_v14, 1  ;;  %v11706_v63 = vrot.slane %v9757_v25, 2  ;;  %6038 = vmatprep.subr.bf16.mxu1 %v7386_v61 }
 0x394   :  { %v2856_v2 = vmax.f32 %v11703_v20, %v11704_v31  ;;  %6062 = vmatprep.mubr.bf16.mxu1 %v3699_v19  ;;  %v3688_v0 = vsel %vm3386_vm8, %v3678_v6, %v3687_v32  ;;  %v11708_v18 = vrot.slane %v11707_v48, 4  ;;  %v2799_v41 = vmax.f32 %v2797_v28, %v2798_v56  ;;  %v7390_v6 = vld [vmem:[%s11201_s3 + $0x660] ss:$8 sps:$4 sm:$0xff]  }
 0x395   :  { %v2898_v10 = vmax.f32 %v9757_v25, %v11706_v63  ;;  %v2778_v40 = vpack.i.bf16 %v2777_v4, %v2777_v4  ;;  %v2878_v49 = vmax.f32 %v11705_v14, %v2877_v5  ;;  %v2939_v59 = vrot.slane %v11709_v17, 4  ;;  %v7389_v25 = vld [vmem:[%s11201_s3 + $0x654] ss:$8 sps:$4 sm:$0xff]   ;;  %v11717_v31 = vld [vmem:[#allocation115_spill] sm:$0xff] }
 0x396   :  { %v2857_v11 = vpack.i.bf16 %v2856_v2, %v2856_v2  ;;  %v2918_v44 = vmax.f32 %v11707_v48, %v11708_v18  ;;  %v11711_v15 = vunpack.i.h.bf16 %v11710_v29  ;;  %v11712_v51 = vunpack.i.l.bf16 %v11710_v29  ;;  %6039 = vmatpush1.bf16.msra.mxu1 %v7384_v62  ;;  %v11722_v29 = vld [vmem:[#allocation52_spill] sm:$0xff] }
 0x397   :  { %v2899_v30 = vrot.slane %v2898_v10, 1  ;;  %v3680_v26 = vunpack.c.l.b16 %v2778_v40  ;;  %v11714_v58 = vunpack.i.h.bf16 %v11713_v43  ;;  %v11715_v16 = vunpack.i.l.bf16 %v11713_v43  ;;  %6040 = vmatprep.subr.bf16.mxu1 %v7389_v25 }
 0x398   :  { %v2919_v33 = vrot.slane %v2918_v44, 2  ;;  %v2960_v24 = vmax.f32 %v11712_v51, %v11711_v15  ;;  %v2800_v52 = vpack.i.bf16 %v2799_v41, %v2799_v41  ;;  %v2879_v45 = vpack.i.bf16 %v2878_v49, %v2878_v49  ;;  %v11719_v41 = vld [vmem:[#allocation17_spill] sm:$0xff]  ;;  %v7398_v51 = vld [vmem:[%s11201_s3 + $0x684] ss:$8 sps:$4 sm:$0xff]  }
 0x399   :  { %v2982_v35 = vmax.f32 %v11715_v16, %v11714_v58  ;;  %v2900_v3 = vmax.f32 %v2898_v10, %v2899_v30  ;;  %v2940_v57 = vmax.f32 %v11709_v17, %v2939_v59  ;;  %v3689_v55 = vsel %vm3388_vm9, %v3680_v26, %v3688_v0  ;;  %v7393_v17 = vld [vmem:[%s11201_s3 + $0x670] ss:$8 sps:$4 sm:$0xff]   ;;  %v11721_v26 = vld [vmem:[#allocation39_spill] sm:$0xff] }
 0x39a   :  { %v2920_v38 = vmax.f32 %v2918_v44, %v2919_v33  ;;  %v2961_v7 = vrot.slane %v2960_v24, 4  ;;  %v3682_v1 = vunpack.c.l.b16 %v2800_v52  ;;  %v3719_v23 = vunpack.c.l.b16 %v2835_v47  ;;  %6041 = vmatpush1.bf16.msra.mxu1 %v7387_v50  ;;  %v7396_v50 = vld [vmem:[%s11201_s3 + $0x680] ss:$8 sps:$4 sm:$0xff]  }
 0x39b   :  { %v2983_v37 = vrot.slane %v2982_v35, 4  ;;  %v2901_v12 = vpack.i.bf16 %v2900_v3, %v2900_v3  ;;  %v2941_v9 = vrot.slane %v2940_v57, 2  ;;  %v3721_v46 = vunpack.c.l.b16 %v2857_v11  ;;  %6042 = vmatprep.subr.bf16.mxu1 %v7392_v42  ;;  %v11724_v3 = vld [vmem:[#allocation70_spill] sm:$0xff]  ;;  %v7401_v42 = vld [vmem:[%s11201_s3 + $0x694] ss:$8 sps:$4 sm:$0xff]  }
 0x39c   :  { %v2921_v27 = vrot.slane %v2920_v38, 1  ;;  %v2962_v13 = vmax.f32 %v2960_v24, %v2961_v7  ;;  %v10606_v19 = vsel %vm2405_vm10, %v3682_v1, %v3689_v55  ;;  %v3723_v28 = vunpack.c.l.b16 %v2879_v45 }
 0x39d   :  { %v2984_v8 = vmax.f32 %v2982_v35, %v2983_v37  ;;  %v2942_v53 = vmax.f32 %v2940_v57, %v2941_v9  ;;  %v3725_v21 = vunpack.c.l.b16 %v2901_v12  ;;  %v11716_v36 = vrot.slane %v9755_v22, 4 }
 0x39e   :  { %v2922_v60 = vmax.f32 %v2920_v38, %v2921_v27  ;;  %v2963_v61 = vrot.slane %v2962_v13, 2  ;;  %v3741_v20 = vsel %vm3378_vm0, %v3721_v46, %v3719_v23  ;;  %v11718_v2 = vrot.slane %v11717_v31, 1  ;;  %6043 = vmatpush1.bf16.msra.mxu1 %v7390_v6 }
 0x39f   :  { %v10611_v34 = vmax.f32 %v9755_v22, %v11716_v36  ;;  %v2985_v4 = vrot.slane %v2984_v8, 2  ;;  %v2943_v32 = vrot.slane %v2942_v53, 1  ;;  %v2888_v47 = vrot.slane %v9740_v54, 1  ;;  %v7395_v22 = vld [vmem:[%s11201_s3 + $0x674] ss:$8 sps:$4 sm:$0xff]   ;;  %v11725_v36 = vld [vmem:[#allocation95_spill] sm:$0xff] }
 0x3a0   :  { %v2867_v56 = vmax.f32 %v11717_v31, %v11718_v2  ;;  %v2923_v14 = vpack.i.bf16 %v2922_v60, %v2922_v60  ;;  %v2964_v5 = vmax.f32 %v2962_v13, %v2963_v61  ;;  %v3742_v10 = vsel %vm3380_vm12, %v3723_v28, %v3741_v20  ;;  %6044 = vmatprep.subr.bf16.mxu1 %v7395_v22  ;;  %v11726_v60 = vld [vmem:[#allocation105_spill] sm:$0xff]  ;;  %v11727_v20 = vld [vmem:[#allocation98_spill] sm:$0xff] }
 0x3a1   :  { %v2986_v63 = vmax.f32 %v2984_v8, %v2985_v4  ;;  %v2944_v40 = vmax.f32 %v2942_v53, %v2943_v32  ;;  %v3743_v0 = vsel %vm3382_vm14, %v3725_v21, %v3742_v10  ;;  %v2889_v48 = vmax.f32 %v9740_v54, %v2888_v47  ;;  %v7404_v10 = vld [vmem:[%s11201_s3 + $0x6a4] ss:$8 sps:$4 sm:$0xff]  }
 0x3a2   :  { %v2868_v11 = vpack.i.bf16 %v2867_v56, %v2867_v56  ;;  %v2965_v18 = vrot.slane %v2964_v5, 1  ;;  %v3727_v62 = vunpack.c.l.b16 %v2923_v14  ;;  %v11720_v49 = vrot.slane %v11719_v41, 2  ;;  %6045 = vmatpush1.bf16.msra.mxu1 %v7393_v17  ;;  %v7399_v56 = vld [vmem:[%s11201_s3 + $0x690] ss:$8 sps:$4 sm:$0xff]   ;;  %v11731_v17 = vld [vmem:[#allocation119_spill] sm:$0xff] }
 0x3a3   :  { %v2987_v44 = vrot.slane %v2986_v63, 1  ;;  %v2945_v59 = vpack.i.bf16 %v2944_v40, %v2944_v40  ;;  %v2890_v25 = vpack.i.bf16 %v2889_v48, %v2889_v48  ;;  %v2930_v33 = vrot.slane %v11721_v26, 2  ;;  %6046 = vmatprep.subr.bf16.mxu1 %v7398_v51 }
 0x3a4   :  { %v2909_v30 = vmax.f32 %v11719_v41, %v11720_v49  ;;  %v11723_v15 = vrot.slane %v11722_v29, 4  ;;  %v2966_v24 = vmax.f32 %v2964_v5, %v2965_v18  ;;  %v3744_v58 = vsel %vm3384_vm6, %v3727_v62, %v3743_v0 }
 0x3a5   :  { %v2988_v43 = vmax.f32 %v2986_v63, %v2987_v44  ;;  %v3729_v35 = vunpack.c.l.b16 %v2945_v59  ;;  %v2931_v52 = vmax.f32 %v11721_v26, %v2930_v33  ;;  %v2972_v57 = vrot.slane %v11724_v3, 4  ;;  %v11733_v33 = vld [vmem:[#allocation23_spill] sm:$0xff] }
 0x3a6   :  { %v2951_v54 = vmax.f32 %v11722_v29, %v11723_v15  ;;  %v2910_v16 = vrot.slane %v2909_v30, 1  ;;  %v2967_v55 = vpack.i.bf16 %v2966_v24, %v2966_v24  ;;  %v3722_v37 = vunpack.c.l.b16 %v2868_v11  ;;  %6047 = vmatpush1.bf16.msra.mxu1 %v7396_v50  ;;  %v11729_v11 = vld [vmem:[#allocation109_spill] sm:$0xff] }
 0x3a7   :  { %v2989_v38 = vpack.i.bf16 %v2988_v43, %v2988_v43  ;;  %v3745_v1 = vsel %vm3386_vm8, %v3729_v35, %v3744_v58  ;;  %v2932_v12 = vrot.slane %v2931_v52, 1  ;;  %v2973_v23 = vmax.f32 %v11724_v3, %v2972_v57  ;;  %6048 = vmatprep.subr.bf16.mxu1 %v7401_v42  ;;  %v11735_v58 = vld [vmem:[#allocation45_spill] sm:$0xff]  ;;  %v11736_v3 = vld [vmem:[#allocation60_spill] sm:$0xff] }
 0x3a8   :  { %v2952_v45 = vrot.slane %v2951_v54, 2  ;;  %v2911_v7 = vmax.f32 %v2909_v30, %v2910_v16  ;;  %v3731_v27 = vunpack.c.l.b16 %v2967_v55  ;;  %v3724_v46 = vunpack.c.l.b16 %v2890_v25 }
 0x3a9   :  { %v3733_v13 = vunpack.c.l.b16 %v2989_v38  ;;  %v2933_v53 = vmax.f32 %v2931_v52, %v2932_v12  ;;  %v2974_v21 = vrot.slane %v2973_v23, 2  ;;  %v3734_v61 = vsel %vm3378_vm0, %v11726_v60, %v11725_v36  ;;  %v7410_v60 = vld [vmem:[%s11201_s3 + $0x6c4] ss:$8 sps:$4 sm:$0xff]  }
 0x3aa   :  { %v2953_v9 = vmax.f32 %v2951_v54, %v2952_v45  ;;  %v2912_v8 = vpack.i.bf16 %v2911_v7, %v2911_v7  ;;  %v3746_v4 = vsel %vm3388_vm9, %v3731_v27, %v3745_v1  ;;  %v3735_v32 = vsel %vm3380_vm12, %v3722_v37, %v3734_v61  ;;  %6049 = vmatpush1.bf16.msra.mxu1 %v7399_v56  ;;  %v7402_v54 = vld [vmem:[%s11201_s3 + $0x6a0] ss:$8 sps:$4 sm:$0xff]   ;;  %v11739_v1 = vld [vmem:[#allocation72_spill] sm:$0xff] }
 0x3ab   :  { %v11728_v31 = vrot.slane %v11727_v20, 1  ;;  %v10663_v47 = vsel %vm2405_vm10, %v3733_v13, %v3746_v4  ;;  %v2934_v22 = vpack.i.bf16 %v2933_v53, %v2933_v53  ;;  %v2975_v5 = vmax.f32 %v2973_v23, %v2974_v21  ;;  %6050 = vmatprep.subr.bf16.mxu1 %v7404_v10 }
 0x3ac   :  { %v2954_v28 = vrot.slane %v2953_v9, 1  ;;  %v3726_v6 = vunpack.c.l.b16 %v2912_v8  ;;  %v3253_v63 = vrot.slane %v10611_v34, 2  ;;  %v3736_v40 = vsel %vm3382_vm14, %v3724_v46, %v3735_v32  ;;  %v7405_v46 = vld [vmem:[%s11201_s3 + $0x6b0] ss:$8 sps:$4 sm:$0xff]  }
 0x3ad   :  { %v3013_v2 = vmax.f32 %v11727_v20, %v11728_v31  ;;  %v11730_v48 = vrot.slane %v11729_v11, 1  ;;  %v2976_v62 = vrot.slane %v2975_v5, 1  ;;  %v3728_v41 = vunpack.c.l.b16 %v2934_v22 }
 0x3ae   :  { %v2955_v14 = vmax.f32 %v2953_v9, %v2954_v28  ;;  %v3737_v49 = vsel %vm3384_vm6, %v3726_v6, %v3736_v40  ;;  %v3056_v59 = vrot.slane %v11731_v17, 1  ;;  %v11732_v25 = vrot.slane %v9765_v39, 2  ;;  %6051 = vmatpush1.bf16.msra.mxu1 %v7402_v54  ;;  %v7408_v40 = vld [vmem:[%s11201_s3 + $0x6c0] ss:$8 sps:$4 sm:$0xff]  }
 0x3af   :  { %v3014_v0 = vpack.i.bf16 %v3013_v2, %v3013_v2  ;;  %v3035_v18 = vmax.f32 %v11729_v11, %v11730_v48  ;;  %v11734_v29 = vrot.slane %v11733_v33, 4  ;;  %v2977_v51 = vmax.f32 %v2975_v5, %v2976_v62 }
 0x3b0   :  { %v2956_v44 = vpack.i.bf16 %v2955_v14, %v2955_v14  ;;  %v3077_v26 = vmax.f32 %v9765_v39, %v11732_v25  ;;  %v3738_v43 = vsel %vm3386_vm8, %v3728_v41, %v3737_v49  ;;  %v3118_v16 = vrot.slane %v11735_v58, 4  ;;  %v7407_v39 = vld [vmem:[%s11201_s3 + $0x6b4] ss:$8 sps:$4 sm:$0xff]  }
 0x3b1   :  { %v3036_v30 = vpack.i.bf16 %v3035_v18, %v3035_v18  ;;  %v3097_v15 = vmax.f32 %v11733_v33, %v11734_v29  ;;  %v3057_v35 = vmax.f32 %v11731_v17, %v3056_v59  ;;  %v11737_v57 = vunpack.i.h.bf16 %v11736_v3  ;;  %6052 = vmatprep.subr.bf16.mxu1 %v7407_v39  ;;  %v11742_v18 = vld [vmem:[#allocation116_spill] sm:$0xff]  ;;  %v11744_v59 = vld [vmem:[#allocation89_spill] sm:$0xff] }
 0x3b2   :  { %v3730_v24 = vunpack.c.l.b16 %v2956_v44  ;;  %v3078_v52 = vrot.slane %v3077_v26, 1  ;;  %v11738_v55 = vunpack.i.l.bf16 %v11736_v3  ;;  %v2978_v7 = vpack.i.bf16 %v2977_v51, %v2977_v51  ;;  %6053 = vmatpush1.bf16.msra.mxu1 %v7405_v46  ;;  %v7413_v41 = vld [vmem:[%s11201_s3 + $0x6d4] ss:$8 sps:$4 sm:$0xff]   ;;  %v7411_v39 = vld [vmem:[%s11201_s3 + $0x6d0] ss:$8 sps:$4 sm:$0xff]  }
 0x3b3   :  { %v3098_v45 = vrot.slane %v3097_v15, 2  ;;  %v3119_v50 = vmax.f32 %v11735_v58, %v3118_v16  ;;  %v11740_v12 = vunpack.i.h.bf16 %v11739_v1  ;;  %v11741_v9 = vunpack.i.l.bf16 %v11739_v1  ;;  %6054 = vmatprep.subr.bf16.mxu1 %v7410_v60  ;;  %v11750_v46 = vld [vmem:[#allocation73_spill] sm:$0xff] }
 0x3b4   :  { %v3139_v38 = vmax.f32 %v11738_v55, %v11737_v57  ;;  %v3739_v37 = vsel %vm3388_vm9, %v3730_v24, %v3738_v43  ;;  %v3058_v42 = vpack.i.bf16 %v3057_v35, %v3057_v35  ;;  %v3079_v27 = vmax.f32 %v3077_v26, %v3078_v52  ;;  %v11745_v43 = vld [vmem:[#allocation19_spill] sm:$0xff]  ;;  %v11748_v57 = vld [vmem:[#allocation56_spill] sm:$0xff] }
 0x3b5   :  { %v3161_v23 = vmax.f32 %v11741_v9, %v11740_v12  ;;  %v3099_v13 = vmax.f32 %v3097_v15, %v3098_v45  ;;  %v3732_v53 = vunpack.c.l.b16 %v2978_v7  ;;  %v3120_v28 = vrot.slane %v3119_v50, 2  ;;  %v11747_v45 = vld [vmem:[#allocation40_spill] sm:$0xff]  ;;  %v7416_v7 = vld [vmem:[%s11201_s3 + $0x6e4] ss:$8 sps:$4 sm:$0xff]  }
 0x3b6   :  { %v3140_v8 = vrot.slane %v3139_v38, 4  ;;  %v3769_v36 = vunpack.c.l.b16 %v3014_v0  ;;  %v3080_v61 = vpack.i.bf16 %v3079_v27, %v3079_v27  ;;  %v3771_v32 = vunpack.c.l.b16 %v3036_v30  ;;  %6055 = vmatpush1.bf16.msra.mxu1 %v7408_v40  ;;  %v11751_v40 = vld [vmem:[#allocation96_spill] sm:$0xff] }
 0x3b7   :  { %v3162_v21 = vrot.slane %v3161_v23, 4  ;;  %v3100_v4 = vrot.slane %v3099_v13, 1  ;;  %v10707_v20 = vsel %vm2405_vm10, %v3732_v53, %v3739_v37  ;;  %v3121_v31 = vmax.f32 %v3119_v50, %v3120_v28  ;;  %6056 = vmatprep.subr.bf16.mxu1 %v7413_v41  ;;  %v7417_v41 = vld [vmem:[%s11201_s3 + $0x6f0] ss:$8 sps:$4 sm:$0xff]  }
 0x3b8   :  { %v3141_v6 = vmax.f32 %v3139_v38, %v3140_v8  ;;  %v3773_v56 = vunpack.c.l.b16 %v3058_v42  ;;  %v3698_v22 = vpack.c.b16 %v10606_v19, %v10606_v19  ;;  %v3775_v10 = vunpack.c.l.b16 %v3080_v61  ;;  %v7428_v19 = vld [vmem:[%s11201_s3 + $0x724] ss:$8 sps:$4 sm:$0xff]  }
 0x3b9   :  { %v3163_v2 = vmax.f32 %v3161_v23, %v3162_v21  ;;  %v3101_v14 = vmax.f32 %v3099_v13, %v3100_v4  ;;  %v3122_v0 = vrot.slane %v3121_v31, 1  ;;  %v3791_v48 = vsel %vm3378_vm0, %v3771_v32, %v3769_v36  ;;  %v7414_v21 = vld [vmem:[%s11201_s3 + $0x6e0] ss:$8 sps:$4 sm:$0xff]  }
 0x3ba   :  { %v3142_v5 = vrot.slane %v3141_v6, 2  ;;  %v11743_v44 = vrot.slane %v11742_v18, 1  ;;  %v3792_v17 = vsel %vm3380_vm12, %v3773_v56, %v3791_v48  ;;  %v3067_v25 = vrot.slane %v11744_v59, 1  ;;  %6057 = vmatpush1.bf16.msra.mxu1 %v7411_v39 }
 0x3bb   :  { %v3164_v11 = vrot.slane %v3163_v2, 2  ;;  %v3102_v49 = vpack.i.bf16 %v3101_v14, %v3101_v14  ;;  %v3123_v26 = vmax.f32 %v3121_v31, %v3122_v0  ;;  %v3793_v29 = vsel %vm3382_vm14, %v3775_v10, %v3792_v17  ;;  %6058 = vmatprep.subr.bf16.mxu1 %v7416_v7  ;;  %v11752_v0 = vld [vmem:[#allocation107_spill] sm:$0xff] }
 0x3bc   :  { %v3046_v62 = vmax.f32 %v11742_v18, %v11743_v44  ;;  %v3143_v30 = vmax.f32 %v3141_v6, %v3142_v5  ;;  %v3068_v24 = vmax.f32 %v11744_v59, %v3067_v25  ;;  %v11746_v58 = vrot.slane %v11745_v43, 2  ;;  %v7419_v6 = vld [vmem:[%s11201_s3 + $0x6f4] ss:$8 sps:$4 sm:$0xff]   ;;  %v7422_v25 = vld [vmem:[%s11201_s3 + $0x704] ss:$8 sps:$4 sm:$0xff]  }
 0x3bd   :  { %v3165_v33 = vmax.f32 %v3163_v2, %v3164_v11  ;;  %v3777_v51 = vunpack.c.l.b16 %v3102_v49  ;;  %v3124_v35 = vpack.i.bf16 %v3123_v26, %v3123_v26  ;;  %v3109_v3 = vrot.slane %v11747_v45, 2  ;;  %v7420_v7 = vld [vmem:[%s11201_s3 + $0x700] ss:$8 sps:$4 sm:$0xff]  }
 0x3be   :  { %v3047_v15 = vpack.i.bf16 %v3046_v62, %v3046_v62  ;;  %v3144_v54 = vrot.slane %v3143_v30, 1  ;;  %v3088_v16 = vmax.f32 %v11745_v43, %v11746_v58  ;;  %v11749_v55 = vrot.slane %v11748_v57, 4  ;;  %6059 = vmatpush1.bf16.msra.mxu1 %v7414_v21  ;;  %v11755_v58 = vld [vmem:[#allocation110_spill] sm:$0xff] }
 0x3bf   :  { %v3166_v52 = vrot.slane %v3165_v33, 1  ;;  %v3794_v50 = vsel %vm3384_vm6, %v3777_v51, %v3793_v29  ;;  %v3069_v1 = vpack.i.bf16 %v3068_v24, %v3068_v24  ;;  %v3779_v23 = vunpack.c.l.b16 %v3124_v35  ;;  %6060 = vmatprep.subr.bf16.mxu1 %v7419_v6  ;;  %v11757_v35 = vld [vmem:[#allocation120_spill] sm:$0xff] }
 0x3c0   :  { %v3130_v38 = vmax.f32 %v11748_v57, %v11749_v55  ;;  %v3145_v37 = vmax.f32 %v3143_v30, %v3144_v54  ;;  %v3089_v12 = vrot.slane %v3088_v16, 1  ;;  %v3110_v42 = vmax.f32 %v11747_v45, %v3109_v3  ;;  %v11758_v57 = vld [vmem:[#allocation24_spill] sm:$0xff] }
 0x3c1   :  { %v3167_v9 = vmax.f32 %v3165_v33, %v3166_v52  ;;  %v3151_v53 = vrot.slane %v11750_v46, 4  ;;  %v3772_v28 = vunpack.c.l.b16 %v3047_v15  ;;  %v3795_v60 = vsel %vm3386_vm8, %v3779_v23, %v3794_v50  ;;  %v11753_v15 = vld [vmem:[#allocation99_spill] sm:$0xff] }
 0x3c2   :  { %v3131_v27 = vrot.slane %v3130_v38, 2  ;;  %v3146_v13 = vpack.i.bf16 %v3145_v37, %v3145_v37  ;;  %v3090_v8 = vmax.f32 %v3088_v16, %v3089_v12  ;;  %v3111_v61 = vrot.slane %v3110_v42, 1  ;;  %6061 = vmatpush1.bf16.msra.mxu1 %v7417_v41 }
 0x3c3   :  { %v3168_v36 = vpack.i.bf16 %v3167_v9, %v3167_v9  ;;  %v3152_v2 = vmax.f32 %v11750_v46, %v3151_v53  ;;  %v3774_v56 = vunpack.c.l.b16 %v3069_v1  ;;  %v3784_v11 = vsel %vm3378_vm0, %v11752_v0, %v11751_v40  ;;  %6071 = vmatprep.subr.bf16.mxu1 %v7422_v25  ;;  %v11761_v46 = vld [vmem:[#allocation61_spill] sm:$0xff] }
 0x3c4   :  { %v3132_v4 = vmax.f32 %v3130_v38, %v3131_v27  ;;  %v3781_v32 = vunpack.c.l.b16 %v3146_v13  ;;  %v3091_v31 = vpack.i.bf16 %v3090_v8, %v3090_v8  ;;  %v3112_v5 = vmax.f32 %v3110_v42, %v3111_v61  ;;  %v11760_v42 = vld [vmem:[#allocation48_spill] sm:$0xff] }
 0x3c5   :  { %v3783_v14 = vunpack.c.l.b16 %v3168_v36  ;;  %v3153_v18 = vrot.slane %v3152_v2, 2  ;;  %v3785_v62 = vsel %vm3380_vm12, %v3772_v28, %v3784_v11  ;;  %v3749_v26 = vpack.c.b16 %v10663_v47, %v10663_v47  ;;  %v11764_v36 = vld [vmem:[#allocation75_spill] sm:$0xff]  ;;  %6063 = vmatmul.mubr.bf16.vlgmr.msra.gmra.mrb[32].mxu1 %v3698_v22 }
 0x3c6   :  { %v3133_v10 = vrot.slane %v3132_v4, 1  ;;  %v3796_v48 = vsel %vm3388_vm9, %v3781_v32, %v3795_v60  ;;  %v3776_v44 = vunpack.c.l.b16 %v3091_v31  ;;  %v3113_v30 = vpack.i.bf16 %v3112_v5, %v3112_v5  ;;  %6072 = vmatpush1.bf16.msra.mxu1 %v7420_v7 }
 0x3c7   :  { %v10758_v49 = vsel %vm2405_vm10, %v3783_v14, %v3796_v48  ;;  %v3786_v59 = vsel %vm3382_vm14, %v3774_v56, %v3785_v62  ;;  %v3154_v33 = vmax.f32 %v3152_v2, %v3153_v18  ;;  %v11754_v54 = vrot.slane %v11753_v15, 1  ;;  %6103 = vmatprep.mubr.bf16.mxu1 %v3749_v26  ;;  %v7423_v56 = vld [vmem:[%s11201_s3 + $0x710] ss:$8 sps:$4 sm:$0xff]   ;;  %v11767_v26 = vld [vmem:[#allocation102_spill] sm:$0xff] }
 0x3c8   :  { %v3134_v17 = vmax.f32 %v3132_v4, %v3133_v10  ;;  %v3787_v29 = vsel %vm3384_vm6, %v3776_v44, %v3786_v59  ;;  %v3778_v43 = vunpack.c.l.b16 %v3113_v30  ;;  %v11756_v16 = vrot.slane %v11755_v58, 1 }
 0x3c9   :  { %v3190_v51 = vmax.f32 %v11753_v15, %v11754_v54  ;;  %v3233_v52 = vrot.slane %v11757_v35, 1  ;;  %v3155_v45 = vrot.slane %v3154_v33, 1  ;;  %v3254_v47 = vmax.f32 %v10611_v34, %v3253_v63  ;;  %v7425_v34 = vld [vmem:[%s11201_s3 + $0x714] ss:$8 sps:$4 sm:$0xff]   ;;  %v7426_v15 = vld [vmem:[%s11201_s3 + $0x720] ss:$8 sps:$4 sm:$0xff]  }
 0x3ca   :  { %v3135_v24 = vpack.i.bf16 %v3134_v17, %v3134_v17  ;;  %v3212_v39 = vmax.f32 %v11755_v58, %v11756_v16  ;;  %v11759_v55 = vrot.slane %v11758_v57, 4  ;;  %v3788_v50 = vsel %vm3386_vm8, %v3778_v43, %v3787_v29  ;;  %6073 = vmatprep.subr.bf16.mxu1 %v7425_v34  ;;  %v7431_v43 = vld [vmem:[%s11201_s3 + $0x734] ss:$8 sps:$4 sm:$0xff]  }
 0x3cb   :  { %v3191_v3 = vpack.i.bf16 %v3190_v51, %v3190_v51  ;;  %v3234_v12 = vmax.f32 %v11757_v35, %v3233_v52  ;;  %v3156_v63 = vmax.f32 %v3154_v33, %v3155_v45  ;;  %v3255_v9 = vrot.slane %v3254_v47, 1  ;;  %6074 = vmatpush1.bf16.msra.mxu1 %v7423_v56  ;;  %v11769_v35 = vld [vmem:[#allocation117_spill] sm:$0xff] }
 0x3cc   :  { %v3274_v38 = vmax.f32 %v11758_v57, %v11759_v55  ;;  %v3780_v37 = vunpack.c.l.b16 %v3135_v24  ;;  %v3213_v1 = vpack.i.bf16 %v3212_v39, %v3212_v39  ;;  %v3295_v27 = vrot.slane %v11760_v42, 4  ;;  %6075 = vmatprep.subr.bf16.mxu1 %v7428_v19  ;;  %v11771_v57 = vld [vmem:[#allocation79_spill] sm:$0xff]  ;;  %v11774_v34 = vld [vmem:[#allocation41_spill] sm:$0xff] }
 0x3cd   :  { %v3235_v8 = vpack.i.bf16 %v3234_v12, %v3234_v12  ;;  %v11762_v53 = vunpack.i.h.bf16 %v11761_v46  ;;  %v11763_v28 = vunpack.i.l.bf16 %v11761_v46  ;;  %v11765_v60 = vunpack.i.h.bf16 %v11764_v36 }
 0x3ce   :  { %v3275_v23 = vrot.slane %v3274_v38, 2  ;;  %v3789_v13 = vsel %vm3388_vm9, %v3780_v37, %v3788_v50  ;;  %v11766_v61 = vunpack.i.l.bf16 %v11764_v36  ;;  %v3157_v6 = vpack.i.bf16 %v3156_v63, %v3156_v63 }
 0x3cf   :  { %v3316_v21 = vmax.f32 %v11763_v28, %v11762_v53  ;;  %v3256_v32 = vmax.f32 %v3254_v47, %v3255_v9  ;;  %v3296_v2 = vmax.f32 %v11760_v42, %v3295_v27  ;;  %v3819_v10 = vunpack.c.l.b16 %v3191_v3  ;;  %6076 = vmatpush1.bf16.msra.mxu1 %v7426_v15  ;;  %v7429_v9 = vld [vmem:[%s11201_s3 + $0x730] ss:$8 sps:$4 sm:$0xff]   ;;  %v7434_v53 = vld [vmem:[%s11201_s3 + $0x744] ss:$8 sps:$4 sm:$0xff]  }
 0x3d0   :  { %v3338_v4 = vmax.f32 %v11766_v61, %v11765_v60  ;;  %v3276_v31 = vmax.f32 %v3274_v38, %v3275_v23  ;;  %v3821_v40 = vunpack.c.l.b16 %v3213_v1  ;;  %v3782_v22 = vunpack.c.l.b16 %v3157_v6  ;;  %v11772_v38 = vld [vmem:[#allocation20_spill] sm:$0xff]  ;;  %6077 = vmatprep.subr.bf16.mxu1 %v7431_v43  ;;  %v11778_v15 = vld [vmem:[#allocation97_spill] sm:$0xff] }
 0x3d1   :  { %v3317_v14 = vrot.slane %v3316_v21, 4  ;;  %v3257_v0 = vpack.i.bf16 %v3256_v32, %v3256_v32  ;;  %v3297_v48 = vrot.slane %v3296_v2, 2  ;;  %v3823_v62 = vunpack.c.l.b16 %v3235_v8 }
 0x3d2   :  { %v3339_v5 = vrot.slane %v3338_v4, 4  ;;  %v3277_v11 = vrot.slane %v3276_v31, 1  ;;  %v3841_v41 = vsel %vm3378_vm0, %v3821_v40, %v3819_v10  ;;  %v10810_v30 = vsel %vm2405_vm10, %v3782_v22, %v3789_v13  ;;  %v11775_v13 = vld [vmem:[#allocation57_spill] sm:$0xff]  ;;  %v7432_v10 = vld [vmem:[%s11201_s3 + $0x740] ss:$8 sps:$4 sm:$0xff]  }
 0x3d3   :  { %v3318_v18 = vmax.f32 %v3316_v21, %v3317_v14  ;;  %v3298_v59 = vmax.f32 %v3296_v2, %v3297_v48  ;;  %v3825_v25 = vunpack.c.l.b16 %v3257_v0  ;;  %v11768_v33 = vpack.i.bf16 %v11767_v26, %v11767_v26  ;;  %v11777_v14 = vld [vmem:[#allocation74_spill] sm:$0xff]  ;;  %6078 = vmatpush1.bf16.msra.mxu1 %v7429_v9 }
 0x3d4   :  { %v3340_v44 = vmax.f32 %v3338_v4, %v3339_v5  ;;  %v3278_v17 = vmax.f32 %v3276_v31, %v3277_v11  ;;  %v3842_v24 = vsel %vm3380_vm12, %v3823_v62, %v3841_v41  ;;  %v11770_v52 = vrot.slane %v11769_v35, 1  ;;  %6079 = vmatprep.subr.bf16.mxu1 %v7434_v53  ;;  %v7437_v11 = vld [vmem:[%s11201_s3 + $0x754] ss:$8 sps:$4 sm:$0xff]  }
 0x3d5   :  { %v3820_v29 = vunpack.c.l.b16 %v11768_v33  ;;  %v3319_v54 = vrot.slane %v3318_v18, 2  ;;  %v3299_v16 = vrot.slane %v3298_v59, 1  ;;  %v3843_v39 = vsel %vm3382_vm14, %v3825_v25, %v3842_v24  ;;  %v7455_v53 = vld [vmem:[%s11201_s3 + $0x7b4] ss:$8 sps:$4 sm:$0xff]  }
 0x3d6   :  { %v3341_v51 = vrot.slane %v3340_v44, 2  ;;  %v3279_v58 = vpack.i.bf16 %v3278_v17, %v3278_v17  ;;  %v3223_v45 = vmax.f32 %v11769_v35, %v11770_v52  ;;  %v3244_v55 = vrot.slane %v11771_v57, 1 }
 0x3d7   :  { %v3320_v3 = vmax.f32 %v3318_v18, %v3319_v54  ;;  %v11773_v7 = vrot.slane %v11772_v38, 2  ;;  %v3300_v50 = vmax.f32 %v3298_v59, %v3299_v16  ;;  %v3286_v63 = vrot.slane %v11774_v34, 2  ;;  %6080 = vmatpush1.bf16.msra.mxu1 %v7432_v10  ;;  %v7440_v16 = vld [vmem:[%s11201_s3 + $0x764] ss:$8 sps:$4 sm:$0xff]  }
 0x3d8   :  { %v3342_v47 = vmax.f32 %v3340_v44, %v3341_v51  ;;  %v3827_v1 = vunpack.c.l.b16 %v3279_v58  ;;  %v3224_v12 = vpack.i.bf16 %v3223_v45, %v3223_v45  ;;  %v3245_v27 = vmax.f32 %v11771_v57, %v3244_v55  ;;  %v7435_v51 = vld [vmem:[%s11201_s3 + $0x750] ss:$8 sps:$4 sm:$0xff]   ;;  %6081 = vmatprep.subr.bf16.mxu1 %v7437_v11  ;;  %v7438_v55 = vld [vmem:[%s11201_s3 + $0x760] ss:$8 sps:$4 sm:$0xff]  }
 0x3d9   :  { %v3265_v37 = vmax.f32 %v11772_v38, %v11773_v7  ;;  %v3321_v23 = vrot.slane %v3320_v3, 1  ;;  %v11776_v8 = vrot.slane %v11775_v13, 4  ;;  %v3301_v28 = vpack.i.bf16 %v3300_v50, %v3300_v50  ;;  %v7567_v11 = vld [vmem:[%s11202_s5 + $0x8] sm:$0xff]  }
 0x3da   :  { %v3343_v42 = vrot.slane %v3342_v47, 1  ;;  %v3844_v21 = vsel %vm3384_vm6, %v3827_v1, %v3843_v39  ;;  %v3287_v60 = vmax.f32 %v11774_v34, %v3286_v63  ;;  %v3246_v6 = vpack.i.bf16 %v3245_v27, %v3245_v27  ;;  %v7441_v34 = vld [vmem:[%s11201_s3 + $0x770] ss:$8 sps:$4 sm:$0xff]   ;;  %v7446_v63 = vld [vmem:[%s11201_s3 + $0x784] ss:$8 sps:$4 sm:$0xff]  }
 0x3db   :  { %v3307_v46 = vmax.f32 %v11775_v13, %v11776_v8  ;;  %v3266_v36 = vrot.slane %v3265_v37, 1  ;;  %v3322_v61 = vmax.f32 %v3320_v3, %v3321_v23  ;;  %v3829_v31 = vunpack.c.l.b16 %v3301_v28  ;;  %6082 = vmatpush1.bf16.msra.mxu1 %v7435_v51  ;;  %v7449_v27 = vld [vmem:[%s11201_s3 + $0x794] ss:$8 sps:$4 sm:$0xff]   ;;  %v7447_v13 = vld [vmem:[%s11201_s3 + $0x790] ss:$8 sps:$4 sm:$0xff]   ;;  %v7574_v51 = vld [vmem:[%s11202_s5 + $0x68] sm:$0xff]  }
 0x3dc   :  { %v3344_v4 = vmax.f32 %v3342_v47, %v3343_v42  ;;  %v3288_v56 = vrot.slane %v3287_v60, 1  ;;  %v3328_v5 = vrot.slane %v11777_v14, 4  ;;  %v3822_v0 = vunpack.c.l.b16 %v3224_v12  ;;  %6083 = vmatprep.subr.bf16.mxu1 %v7440_v16  ;;  %v7444_v42 = vld [vmem:[%s11201_s3 + $0x780] ss:$8 sps:$4 sm:$0xff]   ;;  %v7452_v8 = vld [vmem:[%s11201_s3 + $0x7a4] ss:$8 sps:$4 sm:$0xff]  }
 0x3dd   :  { %v3308_v32 = vrot.slane %v3307_v46, 2  ;;  %v3267_v2 = vmax.f32 %v3265_v37, %v3266_v36  ;;  %v3323_v40 = vpack.i.bf16 %v3322_v61, %v3322_v61  ;;  %v3845_v48 = vsel %vm3386_vm8, %v3829_v31, %v3844_v21  ;;  %v7443_v37 = vld [vmem:[%s11201_s3 + $0x774] ss:$8 sps:$4 sm:$0xff]   ;;  %v7453_v28 = vld [vmem:[%s11201_s3 + $0x7b0] ss:$8 sps:$4 sm:$0xff]  }
 0x3de   :  { %v3345_v19 = vpack.i.bf16 %v3344_v4, %v3344_v4  ;;  %v3289_v44 = vmax.f32 %v3287_v60, %v3288_v56  ;;  %v3329_v62 = vmax.f32 %v11777_v14, %v3328_v5  ;;  %v3824_v59 = vunpack.c.l.b16 %v3246_v6  ;;  %v7458_v21 = vld [vmem:[%s11201_s3 + $0x7c4] ss:$8 sps:$4 sm:$0xff]   ;;  %v7456_v36 = vld [vmem:[%s11201_s3 + $0x7c0] ss:$8 sps:$4 sm:$0xff]   ;;  %v7461_v60 = vld [vmem:[%s11201_s3 + $0x7d4] ss:$8 sps:$4 sm:$0xff]  }
 0x3df   :  { %v3309_v22 = vmax.f32 %v3307_v46, %v3308_v32  ;;  %v3268_v18 = vpack.i.bf16 %v3267_v2, %v3267_v2  ;;  %v3831_v41 = vunpack.c.l.b16 %v3323_v40  ;;  %v3834_v54 = vsel %vm3378_vm0, %v3820_v29, %v11778_v15  ;;  %6084 = vmatpush1.bf16.msra.mxu1 %v7438_v55  ;;  %v7450_v46 = vld [vmem:[%s11201_s3 + $0x7a0] ss:$8 sps:$4 sm:$0xff]   ;;  %v7459_v61 = vld [vmem:[%s11201_s3 + $0x7d0] ss:$8 sps:$4 sm:$0xff]   ;;  %v7464_v4 = vld [vmem:[%s11201_s3 + $0x7e4] ss:$8 sps:$4 sm:$0xff]  }
 0x3e0   :  { %v3833_v25 = vunpack.c.l.b16 %v3345_v19  ;;  %v3290_v26 = vpack.i.bf16 %v3289_v44, %v3289_v44  ;;  %v3330_v33 = vrot.slane %v3329_v62, 2  ;;  %v3835_v58 = vsel %vm3380_vm12, %v3822_v0, %v3834_v54  ;;  %6085 = vmatprep.subr.bf16.mxu1 %v7443_v37  ;;  %v7462_v6 = vld [vmem:[%s11201_s3 + $0x7e0] ss:$8 sps:$4 sm:$0xff]   ;;  %v7467_v32 = vld [vmem:[%s11201_s3 + $0x7f4] ss:$8 sps:$4 sm:$0xff]  }
 0x3e1   :  { %v3310_v17 = vrot.slane %v3309_v22, 1  ;;  %v3846_v24 = vsel %vm3388_vm9, %v3831_v41, %v3845_v48  ;;  %v3826_v29 = vunpack.c.l.b16 %v3268_v18  ;;  %v3836_v52 = vsel %vm3382_vm14, %v3824_v59, %v3835_v58  ;;  %v7465_v31 = vld [vmem:[%s11201_s3 + $0x7f0] ss:$8 sps:$4 sm:$0xff]   ;;  %v7470_v2 = vld [vmem:[%s11201_s3 + $0x804] ss:$8 sps:$4 sm:$0xff]  }
 0x3e2   :  { %v10863_v39 = vsel %vm2405_vm10, %v3833_v25, %v3846_v24  ;;  %v3331_v35 = vmax.f32 %v3329_v62, %v3330_v33  ;;  %v3828_v3 = vunpack.c.l.b16 %v3290_v26  ;;  %v7468_v56 = vld [vmem:[%s11201_s3 + $0x800] ss:$8 sps:$4 sm:$0xff]   ;;  %v3748_v14 = vpack.c.b16 %v10707_v20, %v10707_v20  ;;  %v7473_v5 = vld [vmem:[%s11201_s3 + $0x814] ss:$8 sps:$4 sm:$0xff]   ;;  %v7471_v40 = vld [vmem:[%s11201_s3 + $0x810] ss:$8 sps:$4 sm:$0xff]  }
 0x3e3   :  { %v3311_v43 = vmax.f32 %v3309_v22, %v3310_v17  ;;  %v3837_v57 = vsel %vm3384_vm6, %v3826_v29, %v3836_v52  ;;  %6086 = vmatpush1.bf16.msra.mxu1 %v7441_v34  ;;  %v3799_v10 = vpack.c.b16 %v10758_v49, %v10758_v49  ;;  %v7476_v19 = vld [vmem:[%s11201_s3 + $0x824] ss:$8 sps:$4 sm:$0xff]   ;;  %v7474_v22 = vld [vmem:[%s11201_s3 + $0x820] ss:$8 sps:$4 sm:$0xff]   ;;  %v7568_v48 = vld [vmem:[%s11202_s5 + $0x50] sm:$0xff]  }
 0x3e4   :  { %v3332_v47 = vrot.slane %v3331_v35, 1  ;;  %v3838_v7 = vsel %vm3386_vm8, %v3828_v3, %v3837_v57  ;;  %6087 = vmatprep.subr.bf16.mxu1 %v7446_v63  ;;  %v7564_v20 = vld [vmem:[%s11202_s5 + $0x40] sm:$0xff]   ;;  %v7566_v0 = vld [vmem:[%s11202_s5 + $0x48] sm:$0xff]   ;;  %v7479_v18 = vld [vmem:[%s11201_s3 + $0x834] ss:$8 sps:$4 sm:$0xff]  }
 0x3e5   :  { %v3312_v45 = vpack.i.bf16 %v3311_v43, %v3311_v43  ;;  %v7565_v49 = vld [vmem:[%s11202_s5] sm:$0xff]   ;;  %6804 = vmatprep.subr.bf16.mxu0 %v7564_v20  ;;  %v7477_v44 = vld [vmem:[%s11201_s3 + $0x830] ss:$8 sps:$4 sm:$0xff]   ;;  %v7485_v26 = vld [vmem:[%s11201_s3 + $0x854] ss:$8 sps:$4 sm:$0xff]  }
 0x3e6   :  { %v3333_v50 = vmax.f32 %v3331_v35, %v3332_v47  ;;  %6805 = vmatpush3.bf16.msra.mxu0 %v7565_v49  ;;  %v7569_v62 = vld [vmem:[%s11202_s5 + $0x10] sm:$0xff]   ;;  %v7570_v41 = vld [vmem:[%s11202_s5 + $0x58] sm:$0xff]   ;;  %v7482_v17 = vld [vmem:[%s11201_s3 + $0x844] ss:$8 sps:$4 sm:$0xff]  }
 0x3e7   :  { %v3830_v38 = vunpack.c.l.b16 %v3312_v45  ;;  %6088 = vmatpush1.bf16.msra.mxu1 %v7444_v42  ;;  %6806 = vmatprep.subr.bf16.mxu0 %v7566_v0  ;;  %v7480_v59 = vld [vmem:[%s11201_s3 + $0x840] ss:$8 sps:$4 sm:$0xff]   ;;  %v7571_v25 = vld [vmem:[%s11202_s5 + $0x18] sm:$0xff]   ;;  %v7488_v24 = vld [vmem:[%s11201_s3 + $0x864] ss:$8 sps:$4 sm:$0xff]  }
 0x3e8   :  { %v3334_v12 = vpack.i.bf16 %v3333_v50, %v3333_v50  ;;  %6089 = vmatprep.subr.bf16.mxu1 %v7449_v27  ;;  %v7572_v33 = vld [vmem:[%s11202_s5 + $0x60] sm:$0xff]   ;;  %v7483_v54 = vld [vmem:[%s11201_s3 + $0x850] ss:$8 sps:$4 sm:$0xff]   ;;  %v7575_v43 = vld [vmem:[%s11202_s5 + $0x28] sm:$0xff]  }
 0x3e9   :  { %v3839_v1 = vsel %vm3388_vm9, %v3830_v38, %v3838_v7  ;;  %v7573_v15 = vld [vmem:[%s11202_s5 + $0x20] sm:$0xff]   ;;  %v7491_v16 = vld [vmem:[%s11201_s3 + $0x874] ss:$8 sps:$4 sm:$0xff]   ;;  %v7489_v35 = vld [vmem:[%s11201_s3 + $0x870] ss:$8 sps:$4 sm:$0xff]  }
 0x3ea   :  { %v3832_v9 = vunpack.c.l.b16 %v3334_v12  ;;  %6807 = vmatpush3.bf16.msra.mxu0 %v7567_v11  ;;  %v7486_v58 = vld [vmem:[%s11201_s3 + $0x860] ss:$8 sps:$4 sm:$0xff]   ;;  %v7494_v29 = vld [vmem:[%s11201_s3 + $0x884] ss:$8 sps:$4 sm:$0xff]   ;;  %v7497_v45 = vld [vmem:[%s11201_s3 + $0x894] ss:$8 sps:$4 sm:$0xff]  }
 0x3eb   :  { %6090 = vmatpush1.bf16.msra.mxu1 %v7447_v13  ;;  %6808 = vmatprep.subr.bf16.mxu0 %v7568_v48  ;;  %v7492_v52 = vld [vmem:[%s11201_s3 + $0x880] ss:$8 sps:$4 sm:$0xff]   ;;  %v7495_v3 = vld [vmem:[%s11201_s3 + $0x890] ss:$8 sps:$4 sm:$0xff]   ;;  %v7500_v47 = vld [vmem:[%s11201_s3 + $0x8a4] ss:$8 sps:$4 sm:$0xff]   ;;  %v3798_v13 = vpack.c.b16 %v10810_v30, %v10810_v30 }
 0x3ec   :  { %v10882_v23 = vsel %vm2405_vm10, %v3832_v9, %v3839_v1  ;;  %6091 = vmatprep.subr.bf16.mxu1 %v7452_v8  ;;  %v7498_v57 = vld [vmem:[%s11201_s3 + $0x8a0] ss:$8 sps:$4 sm:$0xff]   ;;  %v7503_v55 = vld [vmem:[%s11201_s3 + $0x8b4] ss:$8 sps:$4 sm:$0xff]   ;;  %v7501_v38 = vld [vmem:[%s11201_s3 + $0x8b0] ss:$8 sps:$4 sm:$0xff]  }
 0x3ed   :  { %v7506_v7 = vld [vmem:[%s11201_s3 + $0x8c4] ss:$8 sps:$4 sm:$0xff]   ;;  %v7504_v37 = vld [vmem:[%s11201_s3 + $0x8c0] ss:$8 sps:$4 sm:$0xff]   ;;  %v7509_v50 = vld [vmem:[%s11201_s3 + $0x8d4] ss:$8 sps:$4 sm:$0xff]  }
 0x3ee   :  { %6809 = vmatpush3.bf16.msra.mxu0 %v7569_v62  ;;  %v7507_v1 = vld [vmem:[%s11201_s3 + $0x8d0] ss:$8 sps:$4 sm:$0xff]   ;;  %v7512_v12 = vld [vmem:[%s11201_s3 + $0x8e4] ss:$8 sps:$4 sm:$0xff]   ;;  %v7510_v34 = vld [vmem:[%s11201_s3 + $0x8e0] ss:$8 sps:$4 sm:$0xff]  }
 0x3ef   :  { %6092 = vmatpush1.bf16.msra.mxu1 %v7450_v46  ;;  %6810 = vmatprep.subr.bf16.mxu0 %v7570_v41  ;;  %v7515_v63 = vld [vmem:[%s11201_s3 + $0x8f4] ss:$8 sps:$4 sm:$0xff]   ;;  %v7513_v9 = vld [vmem:[%s11201_s3 + $0x8f0] ss:$8 sps:$4 sm:$0xff]   ;;  %v7518_v42 = vld [vmem:[%s11201_s3 + $0x904] ss:$8 sps:$4 sm:$0xff]   ;;  %v3849_v46 = vpack.c.b16 %v10863_v39, %v10863_v39 }
 0x3f0   :  { %6093 = vmatprep.subr.bf16.mxu1 %v7455_v53  ;;  %v7516_v27 = vld [vmem:[%s11201_s3 + $0x900] ss:$8 sps:$4 sm:$0xff]   ;;  %v7521_v8 = vld [vmem:[%s11201_s3 + $0x914] ss:$8 sps:$4 sm:$0xff]   ;;  %v7519_v53 = vld [vmem:[%s11201_s3 + $0x910] ss:$8 sps:$4 sm:$0xff]  }
 0x3f1   :  { %v7524_v30 = vld [vmem:[%s11201_s3 + $0x924] ss:$8 sps:$4 sm:$0xff]   ;;  %v7527_v39 = vld [vmem:[%s11201_s3 + $0x934] ss:$8 sps:$4 sm:$0xff]   ;;  %v7543_v49 = vld [vmem:[%s11201_s3 + $0x990] ss:$8 sps:$4 sm:$0xff]  }
 0x3f2   :  { %6811 = vmatpush3.bf16.msra.mxu0 %v7571_v25  ;;  %v7545_v20 = vld [vmem:[%s11201_s3 + $0x994] ss:$8 sps:$4 sm:$0xff]   ;;  %v7546_v0 = vld [vmem:[%s11201_s3 + $0x9a0] ss:$8 sps:$4 sm:$0xff]   ;;  %v7549_v48 = vld [vmem:[%s11201_s3 + $0x9b0] ss:$8 sps:$4 sm:$0xff]  }
 0x3f3   :  { %6094 = vmatpush1.bf16.msra.mxu1 %v7453_v28  ;;  %6812 = vmatprep.subr.bf16.mxu0 %v7572_v33  ;;  %v7522_v28 = vld [vmem:[%s11201_s3 + $0x920] ss:$8 sps:$4 sm:$0xff]   ;;  %v7551_v11 = vld [vmem:[%s11201_s3 + $0x9b4] ss:$8 sps:$4 sm:$0xff]   ;;  %v7555_v41 = vld [vmem:[%s11201_s3 + $0x9d0] ss:$8 sps:$4 sm:$0xff]   ;;  %v3848_v33 = vpack.c.b16 %v10882_v23, %v10882_v23 }
 0x3f4   :  { %6095 = vmatprep.subr.bf16.mxu1 %v7458_v21  ;;  %v7557_v62 = vld [vmem:[%s11201_s3 + $0x9d4] ss:$8 sps:$4 sm:$0xff]   ;;  %v4172_v23 = vld [vmem:[%s11203_s4] sm:$0x3] }
 0x3f5   :  { %v7563_v25 = vld [vmem:[%s11201_s3 + $0x9f4] ss:$8 sps:$4 sm:$0xff]  }
 0x3f6   :  { %6813 = vmatpush3.bf16.msra.mxu0 %v7573_v15  ;;  %v7576_v15 = vld [vmem:[%s11202_s5 + $0x70] sm:$0xff]  }
 0x3f7   :  { %6096 = vmatpush1.bf16.msra.mxu1 %v7456_v36  ;;  %6814 = vmatprep.subr.bf16.mxu0 %v7574_v51  ;;  %v7578_v51 = vld [vmem:[%s11202_s5 + $0x78] sm:$0xff]  }
 0x3f8   :  { %6097 = vmatprep.subr.bf16.mxu1 %v7461_v60 }
 0x3fa   :  { %6815 = vmatpush3.bf16.msra.mxu0 %v7575_v43  ;;  %v11779_v43 = vld [vmem:[#allocation4_spill] sm:$0xff] }
 0x3fb   :  { %6098 = vmatpush1.bf16.msra.mxu1 %v7459_v61  ;;  %v7525_v61 = vld [vmem:[%s11201_s3 + $0x930] ss:$8 sps:$4 sm:$0xff]   ;;  %6816 = vmatprep.subr.bf16.mxu0 %v7576_v15 }
 0x3fc   :  { %6099 = vmatprep.subr.bf16.mxu1 %v7464_v4 }
 0x3ff   :  { %6100 = vmatpush1.bf16.msra.mxu1 %v7462_v6  ;;  %v7530_v6 = vld [vmem:[%s11201_s3 + $0x944] ss:$8 sps:$4 sm:$0xff]  }
 0x400   :  { %6101 = vmatprep.subr.bf16.mxu1 %v7467_v32  ;;  %v7528_v32 = vld [vmem:[%s11201_s3 + $0x940] ss:$8 sps:$4 sm:$0xff]  }
 0x403   :  { %6102 = vmatpush1.bf16.msra.mxu1 %v7465_v31  ;;  %v7533_v31 = vld [vmem:[%s11201_s3 + $0x954] ss:$8 sps:$4 sm:$0xff]  }
 0x404   :  { %6112 = vmatprep.subr.bf16.mxu1 %v7470_v2  ;;  %v7531_v2 = vld [vmem:[%s11201_s3 + $0x950] ss:$8 sps:$4 sm:$0xff]  }
 0x406   :  { %6104 = vmatmul.mubr.bf16.vlgmr.msra.gmra.mrb[32].mxu1 %v3748_v14  ;;  %v7534_v14 = vld [vmem:[%s11201_s3 + $0x960] ss:$8 sps:$4 sm:$0xff]  }
 0x407   :  { %6113 = vmatpush1.bf16.msra.mxu1 %v7468_v56  ;;  %6144 = vmatprep.mubr.bf16.mxu1 %v3799_v10  ;;  %v7536_v56 = vld [vmem:[%s11201_s3 + $0x964] ss:$8 sps:$4 sm:$0xff]   ;;  %v7537_v10 = vld [vmem:[%s11201_s3 + $0x970] ss:$8 sps:$4 sm:$0xff]  }
 0x408   :  { %6114 = vmatprep.subr.bf16.mxu1 %v7473_v5  ;;  %v7539_v5 = vld [vmem:[%s11201_s3 + $0x974] ss:$8 sps:$4 sm:$0xff]  }
 0x40b   :  { %6115 = vmatpush1.bf16.msra.mxu1 %v7471_v40  ;;  %v7542_v40 = vld [vmem:[%s11201_s3 + $0x984] ss:$8 sps:$4 sm:$0xff]  }
 0x40c   :  { %6116 = vmatprep.subr.bf16.mxu1 %v7476_v19  ;;  %v7540_v19 = vld [vmem:[%s11201_s3 + $0x980] ss:$8 sps:$4 sm:$0xff]  }
 0x40f   :  { %6117 = vmatpush1.bf16.msra.mxu1 %v7474_v22  ;;  %v7548_v22 = vld [vmem:[%s11201_s3 + $0x9a4] ss:$8 sps:$4 sm:$0xff]  }
 0x410   :  { %6118 = vmatprep.subr.bf16.mxu1 %v7479_v18  ;;  %v7554_v18 = vld [vmem:[%s11201_s3 + $0x9c4] ss:$8 sps:$4 sm:$0xff]  }
 0x413   :  { %6119 = vmatpush1.bf16.msra.mxu1 %v7477_v44  ;;  %v7552_v44 = vld [vmem:[%s11201_s3 + $0x9c0] ss:$8 sps:$4 sm:$0xff]  }
 0x414   :  { %6120 = vmatprep.subr.bf16.mxu1 %v7482_v17  ;;  %v7560_v17 = vld [vmem:[%s11201_s3 + $0x9e4] ss:$8 sps:$4 sm:$0xff]  }
 0x417   :  { %6121 = vmatpush1.bf16.msra.mxu1 %v7480_v59  ;;  %v7558_v59 = vld [vmem:[%s11201_s3 + $0x9e0] ss:$8 sps:$4 sm:$0xff]  }
 0x418   :  { %6122 = vmatprep.subr.bf16.mxu1 %v7485_v26  ;;  %v7561_v26 = vld [vmem:[%s11201_s3 + $0x9f0] ss:$8 sps:$4 sm:$0xff]  }
 0x41b   :  { %6123 = vmatpush1.bf16.msra.mxu1 %v7483_v54  ;;  %v7577_v54 = vld [vmem:[%s11202_s5 + $0x30] sm:$0xff]  }
 0x41c   :  { %6124 = vmatprep.subr.bf16.mxu1 %v7488_v24  ;;  %6817 = vmatpush3.bf16.msra.mxu0 %v7577_v54  ;;  %v7579_v24 = vld [vmem:[%s11202_s5 + $0x38] sm:$0xff]  }
 0x41d   :  { %6818 = vmatprep.subr.bf16.mxu0 %v7578_v51 }
 0x41f   :  { %6125 = vmatpush1.bf16.msra.mxu1 %v7486_v58  ;;  %v11780_v58 = vsub.s32 0, %v11779_v43 }
 0x420   :  { %6126 = vmatprep.subr.bf16.mxu1 %v7491_v16  ;;  %6819 = vmatpush3.bf16.msra.mxu0 %v7579_v24 }
 0x421   :  { %v4177_v16 = vrot.slane %v4172_v23, %v11780_v58 }
 0x423   :  { %6127 = vmatpush1.bf16.msra.mxu1 %v7489_v35  ;;  %v11781_v35 = vsub.s32 1, %v11779_v43 }
 0x424   :  { %6128 = vmatprep.subr.bf16.mxu1 %v7494_v29 }
 0x425   :  { %v4181_v29 = vrot.slane %v4172_v23, %v11781_v35 }
 0x427   :  { %6129 = vmatpush1.bf16.msra.mxu1 %v7492_v52 }
 0x428   :  { %6130 = vmatprep.subr.bf16.mxu1 %v7497_v45 }
 0x42b   :  { %6131 = vmatpush1.bf16.msra.mxu1 %v7495_v3 }
 0x42c   :  { %6132 = vmatprep.subr.bf16.mxu1 %v7500_v47 }
 0x42f   :  { %6133 = vmatpush1.bf16.msra.mxu1 %v7498_v57 }
 0x430   :  { %6134 = vmatprep.subr.bf16.mxu1 %v7503_v55 }
 0x433   :  { %6135 = vmatpush1.bf16.msra.mxu1 %v7501_v38 }
 0x434   :  { %6136 = vmatprep.subr.bf16.mxu1 %v7506_v7 }
 0x437   :  { %6137 = vmatpush1.bf16.msra.mxu1 %v7504_v37 }
 0x438   :  { %6138 = vmatprep.subr.bf16.mxu1 %v7509_v50 }
 0x43b   :  { %6139 = vmatpush1.bf16.msra.mxu1 %v7507_v1 }
 0x43c   :  { %6140 = vmatprep.subr.bf16.mxu1 %v7512_v12 }
 0x43f   :  { %6141 = vmatpush1.bf16.msra.mxu1 %v7510_v34 }
 0x440   :  { %6142 = vmatprep.subr.bf16.mxu1 %v7515_v63 }
 0x443   :  { %6143 = vmatpush1.bf16.msra.mxu1 %v7513_v9  ;;  %v6787_v9 = vld [vmem:[%s11204_s6] ss:$0 sm:$0xff] }
 0x444   :  { %6153 = vmatprep.subr.bf16.mxu1 %v7518_v42 }
 0x446   :  { %6145 = vmatmul.mubr.bf16.vlgmr.msra.gmra.mrb[32].mxu1 %v3798_v13 }
 0x447   :  { %6154 = vmatpush1.bf16.msra.mxu1 %v7516_v27  ;;  %6185 = vmatprep.mubr.bf16.mxu1 %v3849_v46 }
 0x448   :  { %6155 = vmatprep.subr.bf16.mxu1 %v7521_v8 }
 0x44a   :  { %v11090_v21 = vpop.f32.mrb[64].mxu0 }
 0x44b   :  { %6156 = vmatpush1.bf16.msra.mxu1 %v7519_v53  ;;  %v11092_v36 = vpop.f32.mrb[65].mxu0  ;;  %v6930_v52 = vadd.f32 %v11090_v21, %v4177_v16 }
 0x44c   :  { %6157 = vmatprep.subr.bf16.mxu1 %v7524_v30  ;;  %v5904_v60 = vpop.f32.mrb[66].mxu0  ;;  %v6932_v45 = vadd.f32 %v11092_v36, %v4181_v29 }
 0x44d   :  { %v5905_v4 = vpop.f32.mrb[67].mxu0 }
 0x44f   :  { %6158 = vmatpush1.bf16.msra.mxu1 %v7522_v28 }
 0x450   :  { %6159 = vmatprep.subr.bf16.mxu1 %v7527_v39 }
 0x453   :  { %6160 = vmatpush1.bf16.msra.mxu1 %v7525_v61 }
 0x454   :  { %6161 = vmatprep.subr.bf16.mxu1 %v7530_v6 }
 0x457   :  { %6162 = vmatpush1.bf16.msra.mxu1 %v7528_v32 }
 0x458   :  { %6163 = vmatprep.subr.bf16.mxu1 %v7533_v31 }
 0x45b   :  { %6164 = vmatpush1.bf16.msra.mxu1 %v7531_v2 }
 0x45c   :  { %6165 = vmatprep.subr.bf16.mxu1 %v7536_v56 }
 0x45f   :  { %6166 = vmatpush1.bf16.msra.mxu1 %v7534_v14 }
 0x460   :  { %6167 = vmatprep.subr.bf16.mxu1 %v7539_v5 }
 0x463   :  { %6168 = vmatpush1.bf16.msra.mxu1 %v7537_v10 }
 0x464   :  { %6169 = vmatprep.subr.bf16.mxu1 %v7542_v40 }
 0x467   :  { %6170 = vmatpush1.bf16.msra.mxu1 %v7540_v19 }
 0x468   :  { %6171 = vmatprep.subr.bf16.mxu1 %v7545_v20 }
 0x46b   :  { %6172 = vmatpush1.bf16.msra.mxu1 %v7543_v49 }
 0x46c   :  { %6173 = vmatprep.subr.bf16.mxu1 %v7548_v22 }
 0x46f   :  { %6174 = vmatpush1.bf16.msra.mxu1 %v7546_v0 }
 0x470   :  { %6175 = vmatprep.subr.bf16.mxu1 %v7551_v11 }
 0x473   :  { %6176 = vmatpush1.bf16.msra.mxu1 %v7549_v48 }
 0x474   :  { %6177 = vmatprep.subr.bf16.mxu1 %v7554_v18 }
 0x477   :  { %6178 = vmatpush1.bf16.msra.mxu1 %v7552_v44 }
 0x478   :  { %6179 = vmatprep.subr.bf16.mxu1 %v7557_v62 }
 0x47b   :  { %6180 = vmatpush1.bf16.msra.mxu1 %v7555_v41 }
 0x47c   :  { %6181 = vmatprep.subr.bf16.mxu1 %v7560_v17 }
 0x47f   :  { %6182 = vmatpush1.bf16.msra.mxu1 %v7558_v59 }
 0x480   :  { %6183 = vmatprep.subr.bf16.mxu1 %v7563_v25 }
 0x483   :  { %6184 = vmatpush1.bf16.msra.mxu1 %v7561_v26 }
 0x486   :  { %6186 = vmatmul.mubr.bf16.vlgmr.msra.gmra.mrb[32].mxu1 %v3848_v33 }
 0x559   :  { %v6187_v3 = vpop.f32.mrb[32].mxu1 }
 0x55a   :  { %v6931_v47 = vadd.f32 %v6930_v52, %v6187_v3  ;;  %v6189_v57 = vpop.f32.mrb[33].mxu1 }
 0x55b   :  { %v6933_v55 = vadd.f32 %v6932_v45, %v6189_v57  ;;  %v6191_v38 = vpop.f32.mrb[34].mxu1 }
 0x55c   :  { %v6194_v7 = vmax.f32 %v6931_v47, 0.0  ;;  %v6192_v37 = vpop.f32.mrb[35].mxu1 }
 0x55d   :  { %v6195_v50 = vmax.f32 %v6933_v55, 0.0 }
 0x55e   :  { %v6196_v12 = vpack.c.bf16 %v6194_v7, %v6194_v7 }
 0x55f   :  { %v6197_v1 = vpack.c.bf16 %v6195_v50, %v6195_v50 }
 0x561   :  { %6365 = vmatprep.mubr.bf16.mxu0 %v6197_v1 }
 0x562   :  { %6366 = vmatmul.mubr.bf16.vlgmr.msra.gmra.mrb[68].mxu0 %v6196_v12 }
 0x635   :  { %v6820_v34 = vpop.f32.mrb[68].mxu0 }
 0x636   :  { %v6821_v63 = vpop.f32.mrb[69].mxu0 }
 0x637   :  { %v6822_v42 = vadd.f32 %v6821_v63, %v6820_v34  ;;  %v6823_v27 = vpop.f32.mrb[70].mxu0 }
 0x638   :  { %v6824_v13 = vpop.f32.mrb[71].mxu0 }
 0x639   :  { %v6368_v8 = vadd.f32 %v6822_v42, %v6787_v9 }
 0x63b   :  { %6373 = vmax.xlane.f32.xlu0 %v6368_v8 }
 0x6c8   :  { %v6374_v46 = vpop.xlane.xlu0 %6373 }
 0x6c9   :  { %v6375_v53 = vsub.f32 %v6368_v8, %v6374_v46 }
 0x6cb   :  { %v6376_v30 = vmul.f32 1.442695, %v6375_v53 }
 0x6cd   :  { %7580 = vpow2.f32 %v6376_v30 }
 0x6d7   :  { %v7581_v28 = vpop.eup %7580 }
 0x6d8   :  { %6378 = vadd.xlane.f32.xlu1 %v7581_v28 }
 0x765   :  { %v6379_v39 = vpop.xlane.xlu1 %6378 }
 0x766   :  { %7582 = vrcp.f32 %v6379_v39 }
 0x770   :  { %v7583_v21 = vpop.eup %7582 }
 0x771   :  { %v6381_v36 = vmul.f32 %v7583_v21, %v7581_v28 }
 0x773   :  { %6382 = vst [vmem:[%s11205_s7] sm:$0xff] %v6381_v36 }

</bundles_post_ra>
